<compile_context>
chip_gen: v7x
topology: tpu7x:2x2x1
jax: 0.10.0
libtpu: 0.0.40
codegen_flags: <defaults>
</compile_context>

<pallas_src>
import jax
import jax.numpy as jnp
import numpy as np
from jax import lax
from jax.experimental import pallas as pl
from jax.experimental.pallas import tpu as pltpu

# ---------------- configuration (small, consistent with the module) ----------
B = 2
C_IN = 32
H = W = 8
N = H * W                    # 64 tokens
DIM = 16                     # per-head dim (LiteMSA self.dim)
HEADS = 2
TOTAL_DIM = HEADS * DIM      # 32
C_QKV = 3 * TOTAL_DIM        # 96  (qkv conv output channels)
G = 2 * HEADS                # 4   (attention groups after multi-scale concat)
KS = 5                       # aggreg depthwise kernel size
PAD = KS // 2
HP = H + 2 * PAD             # 12
WP = W + 2 * PAD             # 12
EPS = 1e-15                  # matches the float branch of forward_attn


# ------------------------------ fused kernel ----------------------------------
def _fused_kernel(x_ref, wqkv_ref, dw_ref, gd_ref, wproj_ref, o_ref, pad_ref):
    # x:     (1, N, C_IN)     token-major channels-last input slice (one batch element)
    # wqkv:  (C_IN, C_QKV)    qkv 1x1 conv weight (in, out)
    # dw:    (KS*KS, C_QKV)   depthwise 5x5 weights, tap-major
    # gd:    (C_QKV, C_QKV)   dense block-diagonal grouped 1x1 weight (in, out)
    # wproj: (G*DIM, C_IN)    proj 1x1 conv weight (in, out)
    # o:     (1, N, C_IN)     output slice (forward_attn(x) + x)
    # pad:   (HP, WP, C_QKV)  VMEM scratch for the zero-padded qkv feature map
    x = x_ref[0]                                                       # (N, C_IN)

    # ---- qkv 1x1 conv (MXU) ----
    qkv = jnp.dot(x, wqkv_ref[...], preferred_element_type=jnp.float32)   # (N, C_QKV)

    # ---- aggreg: 5x5 depthwise conv, pad=2 (VPU), all in VMEM ----
    pad_ref[...] = jnp.zeros_like(pad_ref)            # zero border every step (per-core)
    pad_ref[PAD:PAD + H, PAD:PAD + W, :] = qkv.reshape(H, W, C_QKV)
    dw = dw_ref[...]                                  # load taps once: (25, C_QKV)
    acc = jnp.zeros((H, W, C_QKV), jnp.float32)
    for ky in range(KS):
        for kx in range(KS):
            t = ky * KS + kx
            # (H, W, C) shifted window * (1, C) tap  (broadcasts over H, W)
            acc = acc + pad_ref[ky:ky + H, kx:kx + W, :] * dw[t:t + 1]

    # ---- grouped 1x1 conv as dense block-diagonal matmul (MXU) ----
    agg = jnp.dot(acc.reshape(N, C_QKV), gd_ref[...],
                  preferred_element_type=jnp.float32)                 # (N, C_QKV)

    # ---- ReLU linear attention per group + fused proj 1x1 conv + residual ----
    # multi-scale concat [qkv | agg] and the per-group reshape/transpose of the PyTorch
    # code become pure channel addressing here.  proj(out) = sum_g out_g @ Wp[g-rows],
    # so the attention output never needs to be re-assembled.
    out = x                                                            # residual
    for g in range(G):
        src = qkv if g < G // 2 else agg
        base = (g % (G // 2)) * 3 * DIM
        q = jnp.maximum(src[:, base:base + DIM], 0.0)                  # (N, DIM)
        k = jnp.maximum(src[:, base + DIM:base + 2 * DIM], 0.0)        # (N, DIM)
        v = src[:, base + 2 * DIM:base + 3 * DIM]                      # (N, DIM)
        # kv = k^T @ v  (the ones-column of PyTorch's padded v is handled below)
        kv = lax.dot_general(k, v, (((0,), (0,)), ((), ())),
                             preferred_element_type=jnp.float32)       # (DIM, DIM)
        num = jnp.dot(q, kv, preferred_element_type=jnp.float32)       # (N, DIM)
        # denominator = q @ (1^T k)^T, computed on VPU/XLU (no extra MXU push)
        ksum = jnp.sum(k, axis=0, keepdims=True)                       # (1, DIM)
        den = jnp.sum(q * ksum, axis=1, keepdims=True)                 # (N, 1)
        attn_g = num * pl.reciprocal(den + EPS, approx=True)           # EUP reciprocal
        out = out + jnp.dot(attn_g, wproj_ref[g * DIM:(g + 1) * DIM, :],
                            preferred_element_type=jnp.float32)        # (N, C_IN)

    o_ref[0] = out


# ------------------------------- wrapper --------------------------------------
def qaunt_mb_block_forward(x_nchw, params):
    w_qkv, w_dw, w_gd, w_proj = params
    Bx = x_nchw.shape[0]
    # NCHW -> token-major channels-last (the only layout glue outside the kernel)
    x_nc = x_nchw.reshape(Bx, C_IN, N).transpose(0, 2, 1)              # (B, N, C_IN)

    out_nc = pl.pallas_call(
        _fused_kernel,
        out_shape=jax.ShapeDtypeStruct((Bx, N, C_IN), jnp.float32),
        grid=(Bx,),
        in_specs=[
            pl.BlockSpec((1, N, C_IN), lambda b: (b, 0, 0)),
            pl.BlockSpec((C_IN, C_QKV), lambda b: (0, 0)),
            pl.BlockSpec((KS * KS, C_QKV), lambda b: (0, 0)),
            pl.BlockSpec((C_QKV, C_QKV), lambda b: (0, 0)),
            pl.BlockSpec((G * DIM, C_IN), lambda b: (0, 0)),
        ],
        out_specs=pl.BlockSpec((1, N, C_IN), lambda b: (b, 0, 0)),
        scratch_shapes=[pltpu.VMEM((HP, WP, C_QKV), jnp.float32)],
        compiler_params=pltpu.CompilerParams(dimension_semantics=("parallel",)),
    )(x_nc, w_qkv, w_dw, w_gd, w_proj)

    # back to NCHW
    return out_nc.transpose(0, 2, 1).reshape(Bx, C_IN, H, W)


# ------------------------- deterministic parameters ---------------------------
def init_params(key):
    k1, k2, k3, k4 = jax.random.split(key, 4)
    # PyTorch-shaped weights (all convs are bias-free, matching ConvLayer defaults)
    w_qkv_oi = jax.random.normal(k1, (C_QKV, C_IN), jnp.float32) * 0.1      # (O,I) 1x1
    w_dw_ohw = jax.random.normal(k2, (C_QKV, KS, KS), jnp.float32) * 0.05   # depthwise
    w_grp = jax.random.normal(k3, (C_QKV, DIM), jnp.float32) * 0.1          # grouped 1x1
    w_proj_oi = jax.random.normal(k4, (C_IN, 2 * TOTAL_DIM), jnp.float32) * 0.1
    return w_qkv_oi, w_dw_ohw, w_grp, w_proj_oi


def pack_params(raw):
    """Rearrange PyTorch-shaped weights into kernel-friendly layouts (host-side glue)."""
    w_qkv_oi, w_dw_ohw, w_grp, w_proj_oi = raw
    w_qkv = w_qkv_oi.T                                               # (C_IN, C_QKV)
    w_dw = w_dw_ohw.transpose(1, 2, 0).reshape(KS * KS, C_QKV)       # (25, C_QKV)
    # grouped 1x1 conv (groups=3*HEADS) -> dense block-diagonal (in, out) matrix
    gd = jnp.zeros((C_QKV, C_QKV), jnp.float32)
    for g in range(3 * HEADS):
        blk = w_grp[g * DIM:(g + 1) * DIM, :]                        # (o_within, i_within)
        gd = gd.at[g * DIM:(g + 1) * DIM, g * DIM:(g + 1) * DIM].set(blk.T)
    w_proj = w_proj_oi.T                                             # (2*TOTAL_DIM, C_IN)
    return w_qkv, w_dw, gd, w_proj


# ------------------------- plain-JAX reference (check) ------------------------
def ref_forward(x_nchw, raw):
    w_qkv_oi, w_dw_ohw, w_grp, w_proj_oi = raw
    dn = ("NCHW", "OIHW", "NCHW")
    hp = lax.Precision.HIGHEST
    qkv = lax.conv_general_dilated(x_nchw, w_qkv_oi[:, :, None, None], (1, 1), "VALID",
                                   dimension_numbers=dn, precision=hp)
    dw = lax.conv_general_dilated(qkv, w_dw_ohw[:, None, :, :], (1, 1),
                                  ((PAD, PAD), (PAD, PAD)), dimension_numbers=dn,
                                  feature_group_count=C_QKV, precision=hp)
    agg = lax.conv_general_dilated(dw, w_grp[:, :, None, None], (1, 1), "VALID",
                                   dimension_numbers=dn, feature_group_count=3 * HEADS,
                                   precision=hp)
    multi = jnp.concatenate([qkv, agg], axis=1)                      # (B, 192, H, W)
    m = multi.reshape(B, G, 3 * DIM, N).transpose(0, 1, 3, 2)        # (B, G, N, 3*DIM)
    q = jax.nn.relu(m[..., :DIM])
    k = jax.nn.relu(m[..., DIM:2 * DIM])
    v = m[..., 2 * DIM:]
    vpad = jnp.concatenate([v, jnp.ones(v.shape[:-1] + (1,), v.dtype)], axis=-1)
    kv = jnp.einsum("bgnd,bgne->bgde", k, vpad, precision=hp)
    out = jnp.einsum("bgnd,bgde->bgne", q, kv, precision=hp)
    out = out[..., :-1] / (out[..., -1:] + EPS)
    out = out.transpose(0, 1, 3, 2).reshape(B, G * DIM, H, W)
    fin = lax.conv_general_dilated(out, w_proj_oi[:, :, None, None], (1, 1), "VALID",
                                   dimension_numbers=dn, precision=hp)
    return fin + x_nchw


# TODO(synk): UniformAffineQuantizer observers / LogQuant / k_v_quant etc. (msa_quant
# branch) are only active when use_act_quant=True and calibrated; in the default float
# state they are identities and are not modeled here.

if __name__ == "__main__":
    key = jax.random.PRNGKey(0)
    kx, kp = jax.random.split(key)
    x = jax.random.normal(kx, (B, C_IN, H, W), jnp.float32)
    raw = init_params(kp)
    params = pack_params(raw)

    out = jax.jit(qaunt_mb_block_forward)(x, params)
    out = jax.block_until_ready(out)

    ref = ref_forward(x, raw)
    assert out.shape == x.shape
    if not np.allclose(np.asarray(out), np.asarray(ref), rtol=1e-2, atol=1e-2):
        raise AssertionError("Pallas output mismatch vs reference")
    print("KERNEL_OK")
</pallas_src>

<mosaic_0001>
module attributes {stable_mosaic.version = 11 : i64} {
  func.func @_fused_kernel(%arg0: i32, %arg1: memref<1x64x32xf32, #tpu.memory_space<vmem>>, %arg2: memref<32x96xf32, #tpu.memory_space<vmem>>, %arg3: memref<25x96xf32, #tpu.memory_space<vmem>>, %arg4: memref<96x96xf32, #tpu.memory_space<vmem>>, %arg5: memref<64x32xf32, #tpu.memory_space<vmem>>, %arg6: memref<1x64x32xf32, #tpu.memory_space<vmem>>, %arg7: memref<12x12x96xf32, #tpu.memory_space<vmem>>) attributes {dimension_semantics = [#tpu.dimension_semantics<parallel>], iteration_bounds = array<i64: 2>, scalar_prefetch = 0 : i64, scratch_operands = 1 : i64, tpu.core_type = #tpu.core_type<tc>, window_params = [{transform_indices = @transform_0, window_bounds = array<i64: 1, 64, 32>}, {pipeline_mode = #tpu.pipeline_mode<synchronous>, transform_indices = @transform_1, window_bounds = array<i64: 32, 96>}, {pipeline_mode = #tpu.pipeline_mode<synchronous>, transform_indices = @transform_2, window_bounds = array<i64: 25, 96>}, {pipeline_mode = #tpu.pipeline_mode<synchronous>, transform_indices = @transform_3, window_bounds = array<i64: 96, 96>}, {pipeline_mode = #tpu.pipeline_mode<synchronous>, transform_indices = @transform_4, window_bounds = array<i64: 64, 32>}, {transform_indices = @transform_5, window_bounds = array<i64: 1, 64, 32>}]} {
    %c0 = arith.constant 0 : index
    %c0_0 = arith.constant 0 : index
    %c0_1 = arith.constant 0 : index
    %0 = vector.load %arg1[%c0, %c0_0, %c0_1] : memref<1x64x32xf32, #tpu.memory_space<vmem>>, vector<1x64x32xf32>
    %1 = vector.shape_cast %0 : vector<1x64x32xf32> to vector<64x32xf32>
    %c0_2 = arith.constant 0 : index
    %c0_3 = arith.constant 0 : index
    %2 = vector.load %arg2[%c0_2, %c0_3] : memref<32x96xf32, #tpu.memory_space<vmem>>, vector<32x96xf32>
    %cst = arith.constant dense<0.000000e+00> : vector<64x96xf32>
    %3 = tpu.matmul %1, %2, %cst {dimension_numbers = #tpu.dot_dimension_numbers<[1], [0], [0], [1], [0, 0, 1, 1], [], []>} : vector<64x32xf32>, vector<32x96xf32>, vector<64x96xf32> -> vector<64x96xf32>
    %cst_4 = arith.constant 0.000000e+00 : f32
    %4 = vector.broadcast %cst_4 : f32 to vector<12x12x96xf32>
    %c0_5 = arith.constant 0 : index
    %c0_6 = arith.constant 0 : index
    %c0_7 = arith.constant 0 : index
    %5 = vector.load %arg7[%c0_5, %c0_6, %c0_7] : memref<12x12x96xf32, #tpu.memory_space<vmem>>, vector<12x12x96xf32>
    tpu.vector_store %arg7[%c0_5, %c0_6, %c0_7], %4 {strides = array<i32>} : memref<12x12x96xf32, #tpu.memory_space<vmem>>, vector<12x12x96xf32>,
    %6 = vector.shape_cast %3 : vector<64x96xf32> to vector<8x8x96xf32>
    %c2 = arith.constant 2 : index
    %c2_8 = arith.constant 2 : index
    %c0_9 = arith.constant 0 : index
    %7 = vector.load %arg7[%c2, %c2_8, %c0_9] : memref<12x12x96xf32, #tpu.memory_space<vmem>>, vector<8x8x96xf32>
    tpu.vector_store %arg7[%c2, %c2_8, %c0_9], %6 {strides = array<i32>} : memref<12x12x96xf32, #tpu.memory_space<vmem>>, vector<8x8x96xf32>,
    %c0_10 = arith.constant 0 : index
    %c0_11 = arith.constant 0 : index
    %8 = vector.load %arg3[%c0_10, %c0_11] : memref<25x96xf32, #tpu.memory_space<vmem>>, vector<25x96xf32>
    %cst_12 = arith.constant 0.000000e+00 : f32
    %9 = vector.broadcast %cst_12 : f32 to vector<8x8x96xf32>
    %c0_13 = arith.constant 0 : index
    %c0_14 = arith.constant 0 : index
    %c0_15 = arith.constant 0 : index
    %10 = vector.load %arg7[%c0_13, %c0_14, %c0_15] : memref<12x12x96xf32, #tpu.memory_space<vmem>>, vector<8x8x96xf32>
    %11 = vector.extract_strided_slice %8 {offsets = [0, 0], sizes = [1, 96], strides = [1, 1]} : vector<25x96xf32> to vector<1x96xf32>
    %12 = vector.shape_cast %11 : vector<1x96xf32> to vector<1x1x96xf32>
    %13 = vector.broadcast %12 : vector<1x1x96xf32> to vector<8x8x96xf32>
    %14 = arith.mulf %10, %13 : vector<8x8x96xf32>
    %15 = arith.addf %9, %14 : vector<8x8x96xf32>
    %c0_16 = arith.constant 0 : index
    %c1 = arith.constant 1 : index
    %c0_17 = arith.constant 0 : index
    %16 = vector.load %arg7[%c0_16, %c1, %c0_17] : memref<12x12x96xf32, #tpu.memory_space<vmem>>, vector<8x8x96xf32>
    %17 = vector.extract_strided_slice %8 {offsets = [1, 0], sizes = [1, 96], strides = [1, 1]} : vector<25x96xf32> to vector<1x96xf32>
    %18 = vector.shape_cast %17 : vector<1x96xf32> to vector<1x1x96xf32>
    %19 = vector.broadcast %18 : vector<1x1x96xf32> to vector<8x8x96xf32>
    %20 = arith.mulf %16, %19 : vector<8x8x96xf32>
    %21 = arith.addf %15, %20 : vector<8x8x96xf32>
    %c0_18 = arith.constant 0 : index
    %c2_19 = arith.constant 2 : index
    %c0_20 = arith.constant 0 : index
    %22 = vector.load %arg7[%c0_18, %c2_19, %c0_20] : memref<12x12x96xf32, #tpu.memory_space<vmem>>, vector<8x8x96xf32>
    %23 = vector.extract_strided_slice %8 {offsets = [2, 0], sizes = [1, 96], strides = [1, 1]} : vector<25x96xf32> to vector<1x96xf32>
    %24 = vector.shape_cast %23 : vector<1x96xf32> to vector<1x1x96xf32>
    %25 = vector.broadcast %24 : vector<1x1x96xf32> to vector<8x8x96xf32>
    %26 = arith.mulf %22, %25 : vector<8x8x96xf32>
    %27 = arith.addf %21, %26 : vector<8x8x96xf32>
    %c0_21 = arith.constant 0 : index
    %c3 = arith.constant 3 : index
    %c0_22 = arith.constant 0 : index
    %28 = vector.load %arg7[%c0_21, %c3, %c0_22] : memref<12x12x96xf32, #tpu.memory_space<vmem>>, vector<8x8x96xf32>
    %29 = vector.extract_strided_slice %8 {offsets = [3, 0], sizes = [1, 96], strides = [1, 1]} : vector<25x96xf32> to vector<1x96xf32>
    %30 = vector.shape_cast %29 : vector<1x96xf32> to vector<1x1x96xf32>
    %31 = vector.broadcast %30 : vector<1x1x96xf32> to vector<8x8x96xf32>
    %32 = arith.mulf %28, %31 : vector<8x8x96xf32>
    %33 = arith.addf %27, %32 : vector<8x8x96xf32>
    %c0_23 = arith.constant 0 : index
    %c4 = arith.constant 4 : index
    %c0_24 = arith.constant 0 : index
    %34 = vector.load %arg7[%c0_23, %c4, %c0_24] : memref<12x12x96xf32, #tpu.memory_space<vmem>>, vector<8x8x96xf32>
    %35 = vector.extract_strided_slice %8 {offsets = [4, 0], sizes = [1, 96], strides = [1, 1]} : vector<25x96xf32> to vector<1x96xf32>
    %36 = vector.shape_cast %35 : vector<1x96xf32> to vector<1x1x96xf32>
    %37 = vector.broadcast %36 : vector<1x1x96xf32> to vector<8x8x96xf32>
    %38 = arith.mulf %34, %37 : vector<8x8x96xf32>
    %39 = arith.addf %33, %38 : vector<8x8x96xf32>
    %c1_25 = arith.constant 1 : index
    %c0_26 = arith.constant 0 : index
    %c0_27 = arith.constant 0 : index
    %40 = vector.load %arg7[%c1_25, %c0_26, %c0_27] : memref<12x12x96xf32, #tpu.memory_space<vmem>>, vector<8x8x96xf32>
    %41 = vector.extract_strided_slice %8 {offsets = [5, 0], sizes = [1, 96], strides = [1, 1]} : vector<25x96xf32> to vector<1x96xf32>
    %42 = vector.shape_cast %41 : vector<1x96xf32> to vector<1x1x96xf32>
    %43 = vector.broadcast %42 : vector<1x1x96xf32> to vector<8x8x96xf32>
    %44 = arith.mulf %40, %43 : vector<8x8x96xf32>
    %45 = arith.addf %39, %44 : vector<8x8x96xf32>
    %c1_28 = arith.constant 1 : index
    %c1_29 = arith.constant 1 : index
    %c0_30 = arith.constant 0 : index
    %46 = vector.load %arg7[%c1_28, %c1_29, %c0_30] : memref<12x12x96xf32, #tpu.memory_space<vmem>>, vector<8x8x96xf32>
    %47 = vector.extract_strided_slice %8 {offsets = [6, 0], sizes = [1, 96], strides = [1, 1]} : vector<25x96xf32> to vector<1x96xf32>
    %48 = vector.shape_cast %47 : vector<1x96xf32> to vector<1x1x96xf32>
    %49 = vector.broadcast %48 : vector<1x1x96xf32> to vector<8x8x96xf32>
    %50 = arith.mulf %46, %49 : vector<8x8x96xf32>
    %51 = arith.addf %45, %50 : vector<8x8x96xf32>
    %c1_31 = arith.constant 1 : index
    %c2_32 = arith.constant 2 : index
    %c0_33 = arith.constant 0 : index
    %52 = vector.load %arg7[%c1_31, %c2_32, %c0_33] : memref<12x12x96xf32, #tpu.memory_space<vmem>>, vector<8x8x96xf32>
    %53 = vector.extract_strided_slice %8 {offsets = [7, 0], sizes = [1, 96], strides = [1, 1]} : vector<25x96xf32> to vector<1x96xf32>
    %54 = vector.shape_cast %53 : vector<1x96xf32> to vector<1x1x96xf32>
    %55 = vector.broadcast %54 : vector<1x1x96xf32> to vector<8x8x96xf32>
    %56 = arith.mulf %52, %55 : vector<8x8x96xf32>
    %57 = arith.addf %51, %56 : vector<8x8x96xf32>
    %c1_34 = arith.constant 1 : index
    %c3_35 = arith.constant 3 : index
    %c0_36 = arith.constant 0 : index
    %58 = vector.load %arg7[%c1_34, %c3_35, %c0_36] : memref<12x12x96xf32, #tpu.memory_space<vmem>>, vector<8x8x96xf32>
    %59 = vector.extract_strided_slice %8 {offsets = [8, 0], sizes = [1, 96], strides = [1, 1]} : vector<25x96xf32> to vector<1x96xf32>
    %60 = vector.shape_cast %59 : vector<1x96xf32> to vector<1x1x96xf32>
    %61 = vector.broadcast %60 : vector<1x1x96xf32> to vector<8x8x96xf32>
    %62 = arith.mulf %58, %61 : vector<8x8x96xf32>
    %63 = arith.addf %57, %62 : vector<8x8x96xf32>
    %c1_37 = arith.constant 1 : index
    %c4_38 = arith.constant 4 : index
    %c0_39 = arith.constant 0 : index
    %64 = vector.load %arg7[%c1_37, %c4_38, %c0_39] : memref<12x12x96xf32, #tpu.memory_space<vmem>>, vector<8x8x96xf32>
    %65 = vector.extract_strided_slice %8 {offsets = [9, 0], sizes = [1, 96], strides = [1, 1]} : vector<25x96xf32> to vector<1x96xf32>
    %66 = vector.shape_cast %65 : vector<1x96xf32> to vector<1x1x96xf32>
    %67 = vector.broadcast %66 : vector<1x1x96xf32> to vector<8x8x96xf32>
    %68 = arith.mulf %64, %67 : vector<8x8x96xf32>
    %69 = arith.addf %63, %68 : vector<8x8x96xf32>
    %c2_40 = arith.constant 2 : index
    %c0_41 = arith.constant 0 : index
    %c0_42 = arith.constant 0 : index
    %70 = vector.load %arg7[%c2_40, %c0_41, %c0_42] : memref<12x12x96xf32, #tpu.memory_space<vmem>>, vector<8x8x96xf32>
    %71 = vector.extract_strided_slice %8 {offsets = [10, 0], sizes = [1, 96], strides = [1, 1]} : vector<25x96xf32> to vector<1x96xf32>
    %72 = vector.shape_cast %71 : vector<1x96xf32> to vector<1x1x96xf32>
    %73 = vector.broadcast %72 : vector<1x1x96xf32> to vector<8x8x96xf32>
    %74 = arith.mulf %70, %73 : vector<8x8x96xf32>
    %75 = arith.addf %69, %74 : vector<8x8x96xf32>
    %c2_43 = arith.constant 2 : index
    %c1_44 = arith.constant 1 : index
    %c0_45 = arith.constant 0 : index
    %76 = vector.load %arg7[%c2_43, %c1_44, %c0_45] : memref<12x12x96xf32, #tpu.memory_space<vmem>>, vector<8x8x96xf32>
    %77 = vector.extract_strided_slice %8 {offsets = [11, 0], sizes = [1, 96], strides = [1, 1]} : vector<25x96xf32> to vector<1x96xf32>
    %78 = vector.shape_cast %77 : vector<1x96xf32> to vector<1x1x96xf32>
    %79 = vector.broadcast %78 : vector<1x1x96xf32> to vector<8x8x96xf32>
    %80 = arith.mulf %76, %79 : vector<8x8x96xf32>
    %81 = arith.addf %75, %80 : vector<8x8x96xf32>
    %c2_46 = arith.constant 2 : index
    %c2_47 = arith.constant 2 : index
    %c0_48 = arith.constant 0 : index
    %82 = vector.load %arg7[%c2_46, %c2_47, %c0_48] : memref<12x12x96xf32, #tpu.memory_space<vmem>>, vector<8x8x96xf32>
    %83 = vector.extract_strided_slice %8 {offsets = [12, 0], sizes = [1, 96], strides = [1, 1]} : vector<25x96xf32> to vector<1x96xf32>
    %84 = vector.shape_cast %83 : vector<1x96xf32> to vector<1x1x96xf32>
    %85 = vector.broadcast %84 : vector<1x1x96xf32> to vector<8x8x96xf32>
    %86 = arith.mulf %82, %85 : vector<8x8x96xf32>
    %87 = arith.addf %81, %86 : vector<8x8x96xf32>
    %c2_49 = arith.constant 2 : index
    %c3_50 = arith.constant 3 : index
    %c0_51 = arith.constant 0 : index
    %88 = vector.load %arg7[%c2_49, %c3_50, %c0_51] : memref<12x12x96xf32, #tpu.memory_space<vmem>>, vector<8x8x96xf32>
    %89 = vector.extract_strided_slice %8 {offsets = [13, 0], sizes = [1, 96], strides = [1, 1]} : vector<25x96xf32> to vector<1x96xf32>
    %90 = vector.shape_cast %89 : vector<1x96xf32> to vector<1x1x96xf32>
    %91 = vector.broadcast %90 : vector<1x1x96xf32> to vector<8x8x96xf32>
    %92 = arith.mulf %88, %91 : vector<8x8x96xf32>
    %93 = arith.addf %87, %92 : vector<8x8x96xf32>
    %c2_52 = arith.constant 2 : index
    %c4_53 = arith.constant 4 : index
    %c0_54 = arith.constant 0 : index
    %94 = vector.load %arg7[%c2_52, %c4_53, %c0_54] : memref<12x12x96xf32, #tpu.memory_space<vmem>>, vector<8x8x96xf32>
    %95 = vector.extract_strided_slice %8 {offsets = [14, 0], sizes = [1, 96], strides = [1, 1]} : vector<25x96xf32> to vector<1x96xf32>
    %96 = vector.shape_cast %95 : vector<1x96xf32> to vector<1x1x96xf32>
    %97 = vector.broadcast %96 : vector<1x1x96xf32> to vector<8x8x96xf32>
    %98 = arith.mulf %94, %97 : vector<8x8x96xf32>
    %99 = arith.addf %93, %98 : vector<8x8x96xf32>
    %c3_55 = arith.constant 3 : index
    %c0_56 = arith.constant 0 : index
    %c0_57 = arith.constant 0 : index
    %100 = vector.load %arg7[%c3_55, %c0_56, %c0_57] : memref<12x12x96xf32, #tpu.memory_space<vmem>>, vector<8x8x96xf32>
    %101 = vector.extract_strided_slice %8 {offsets = [15, 0], sizes = [1, 96], strides = [1, 1]} : vector<25x96xf32> to vector<1x96xf32>
    %102 = vector.shape_cast %101 : vector<1x96xf32> to vector<1x1x96xf32>
    %103 = vector.broadcast %102 : vector<1x1x96xf32> to vector<8x8x96xf32>
    %104 = arith.mulf %100, %103 : vector<8x8x96xf32>
    %105 = arith.addf %99, %104 : vector<8x8x96xf32>
    %c3_58 = arith.constant 3 : index
    %c1_59 = arith.constant 1 : index
    %c0_60 = arith.constant 0 : index
    %106 = vector.load %arg7[%c3_58, %c1_59, %c0_60] : memref<12x12x96xf32, #tpu.memory_space<vmem>>, vector<8x8x96xf32>
    %107 = vector.extract_strided_slice %8 {offsets = [16, 0], sizes = [1, 96], strides = [1, 1]} : vector<25x96xf32> to vector<1x96xf32>
    %108 = vector.shape_cast %107 : vector<1x96xf32> to vector<1x1x96xf32>
    %109 = vector.broadcast %108 : vector<1x1x96xf32> to vector<8x8x96xf32>
    %110 = arith.mulf %106, %109 : vector<8x8x96xf32>
    %111 = arith.addf %105, %110 : vector<8x8x96xf32>
    %c3_61 = arith.constant 3 : index
    %c2_62 = arith.constant 2 : index
    %c0_63 = arith.constant 0 : index
    %112 = vector.load %arg7[%c3_61, %c2_62, %c0_63] : memref<12x12x96xf32, #tpu.memory_space<vmem>>, vector<8x8x96xf32>
    %113 = vector.extract_strided_slice %8 {offsets = [17, 0], sizes = [1, 96], strides = [1, 1]} : vector<25x96xf32> to vector<1x96xf32>
    %114 = vector.shape_cast %113 : vector<1x96xf32> to vector<1x1x96xf32>
    %115 = vector.broadcast %114 : vector<1x1x96xf32> to vector<8x8x96xf32>
    %116 = arith.mulf %112, %115 : vector<8x8x96xf32>
    %117 = arith.addf %111, %116 : vector<8x8x96xf32>
    %c3_64 = arith.constant 3 : index
    %c3_65 = arith.constant 3 : index
    %c0_66 = arith.constant 0 : index
    %118 = vector.load %arg7[%c3_64, %c3_65, %c0_66] : memref<12x12x96xf32, #tpu.memory_space<vmem>>, vector<8x8x96xf32>
    %119 = vector.extract_strided_slice %8 {offsets = [18, 0], sizes = [1, 96], strides = [1, 1]} : vector<25x96xf32> to vector<1x96xf32>
    %120 = vector.shape_cast %119 : vector<1x96xf32> to vector<1x1x96xf32>
    %121 = vector.broadcast %120 : vector<1x1x96xf32> to vector<8x8x96xf32>
    %122 = arith.mulf %118, %121 : vector<8x8x96xf32>
    %123 = arith.addf %117, %122 : vector<8x8x96xf32>
    %c3_67 = arith.constant 3 : index
    %c4_68 = arith.constant 4 : index
    %c0_69 = arith.constant 0 : index
    %124 = vector.load %arg7[%c3_67, %c4_68, %c0_69] : memref<12x12x96xf32, #tpu.memory_space<vmem>>, vector<8x8x96xf32>
    %125 = vector.extract_strided_slice %8 {offsets = [19, 0], sizes = [1, 96], strides = [1, 1]} : vector<25x96xf32> to vector<1x96xf32>
    %126 = vector.shape_cast %125 : vector<1x96xf32> to vector<1x1x96xf32>
    %127 = vector.broadcast %126 : vector<1x1x96xf32> to vector<8x8x96xf32>
    %128 = arith.mulf %124, %127 : vector<8x8x96xf32>
    %129 = arith.addf %123, %128 : vector<8x8x96xf32>
    %c4_70 = arith.constant 4 : index
    %c0_71 = arith.constant 0 : index
    %c0_72 = arith.constant 0 : index
    %130 = vector.load %arg7[%c4_70, %c0_71, %c0_72] : memref<12x12x96xf32, #tpu.memory_space<vmem>>, vector<8x8x96xf32>
    %131 = vector.extract_strided_slice %8 {offsets = [20, 0], sizes = [1, 96], strides = [1, 1]} : vector<25x96xf32> to vector<1x96xf32>
    %132 = vector.shape_cast %131 : vector<1x96xf32> to vector<1x1x96xf32>
    %133 = vector.broadcast %132 : vector<1x1x96xf32> to vector<8x8x96xf32>
    %134 = arith.mulf %130, %133 : vector<8x8x96xf32>
    %135 = arith.addf %129, %134 : vector<8x8x96xf32>
    %c4_73 = arith.constant 4 : index
    %c1_74 = arith.constant 1 : index
    %c0_75 = arith.constant 0 : index
    %136 = vector.load %arg7[%c4_73, %c1_74, %c0_75] : memref<12x12x96xf32, #tpu.memory_space<vmem>>, vector<8x8x96xf32>
    %137 = vector.extract_strided_slice %8 {offsets = [21, 0], sizes = [1, 96], strides = [1, 1]} : vector<25x96xf32> to vector<1x96xf32>
    %138 = vector.shape_cast %137 : vector<1x96xf32> to vector<1x1x96xf32>
    %139 = vector.broadcast %138 : vector<1x1x96xf32> to vector<8x8x96xf32>
    %140 = arith.mulf %136, %139 : vector<8x8x96xf32>
    %141 = arith.addf %135, %140 : vector<8x8x96xf32>
    %c4_76 = arith.constant 4 : index
    %c2_77 = arith.constant 2 : index
    %c0_78 = arith.constant 0 : index
    %142 = vector.load %arg7[%c4_76, %c2_77, %c0_78] : memref<12x12x96xf32, #tpu.memory_space<vmem>>, vector<8x8x96xf32>
    %143 = vector.extract_strided_slice %8 {offsets = [22, 0], sizes = [1, 96], strides = [1, 1]} : vector<25x96xf32> to vector<1x96xf32>
    %144 = vector.shape_cast %143 : vector<1x96xf32> to vector<1x1x96xf32>
    %145 = vector.broadcast %144 : vector<1x1x96xf32> to vector<8x8x96xf32>
    %146 = arith.mulf %142, %145 : vector<8x8x96xf32>
    %147 = arith.addf %141, %146 : vector<8x8x96xf32>
    %c4_79 = arith.constant 4 : index
    %c3_80 = arith.constant 3 : index
    %c0_81 = arith.constant 0 : index
    %148 = vector.load %arg7[%c4_79, %c3_80, %c0_81] : memref<12x12x96xf32, #tpu.memory_space<vmem>>, vector<8x8x96xf32>
    %149 = vector.extract_strided_slice %8 {offsets = [23, 0], sizes = [1, 96], strides = [1, 1]} : vector<25x96xf32> to vector<1x96xf32>
    %150 = vector.shape_cast %149 : vector<1x96xf32> to vector<1x1x96xf32>
    %151 = vector.broadcast %150 : vector<1x1x96xf32> to vector<8x8x96xf32>
    %152 = arith.mulf %148, %151 : vector<8x8x96xf32>
    %153 = arith.addf %147, %152 : vector<8x8x96xf32>
    %c4_82 = arith.constant 4 : index
    %c4_83 = arith.constant 4 : index
    %c0_84 = arith.constant 0 : index
    %154 = vector.load %arg7[%c4_82, %c4_83, %c0_84] : memref<12x12x96xf32, #tpu.memory_space<vmem>>, vector<8x8x96xf32>
    %155 = vector.extract_strided_slice %8 {offsets = [24, 0], sizes = [1, 96], strides = [1, 1]} : vector<25x96xf32> to vector<1x96xf32>
    %156 = vector.shape_cast %155 : vector<1x96xf32> to vector<1x1x96xf32>
    %157 = vector.broadcast %156 : vector<1x1x96xf32> to vector<8x8x96xf32>
    %158 = arith.mulf %154, %157 : vector<8x8x96xf32>
    %159 = arith.addf %153, %158 : vector<8x8x96xf32>
    %160 = vector.shape_cast %159 : vector<8x8x96xf32> to vector<64x96xf32>
    %c0_85 = arith.constant 0 : index
    %c0_86 = arith.constant 0 : index
    %161 = vector.load %arg4[%c0_85, %c0_86] : memref<96x96xf32, #tpu.memory_space<vmem>>, vector<96x96xf32>
    %cst_87 = arith.constant dense<0.000000e+00> : vector<64x96xf32>
    %162 = tpu.matmul %160, %161, %cst_87 {dimension_numbers = #tpu.dot_dimension_numbers<[1], [0], [0], [1], [0, 0, 1, 1], [], []>} : vector<64x96xf32>, vector<96x96xf32>, vector<64x96xf32> -> vector<64x96xf32>
    %163 = vector.extract_strided_slice %3 {offsets = [0, 0], sizes = [64, 16], strides = [1, 1]} : vector<64x96xf32> to vector<64x16xf32>
    %cst_88 = arith.constant 0.000000e+00 : f32
    %164 = vector.broadcast %cst_88 : f32 to vector<64x16xf32>
    %165 = arith.maximumf %163, %164 : vector<64x16xf32>
    %166 = vector.extract_strided_slice %3 {offsets = [0, 16], sizes = [64, 16], strides = [1, 1]} : vector<64x96xf32> to vector<64x16xf32>
    %cst_89 = arith.constant 0.000000e+00 : f32
    %167 = vector.broadcast %cst_89 : f32 to vector<64x16xf32>
    %168 = arith.maximumf %166, %167 : vector<64x16xf32>
    %169 = vector.extract_strided_slice %3 {offsets = [0, 32], sizes = [64, 16], strides = [1, 1]} : vector<64x96xf32> to vector<64x16xf32>
    %cst_90 = arith.constant dense<0.000000e+00> : vector<16x16xf32>
    %170 = tpu.matmul %168, %169, %cst_90 {dimension_numbers = #tpu.dot_dimension_numbers<[0], [0], [1], [1], [0, 1, 1, 1], [], []>} : vector<64x16xf32>, vector<64x16xf32>, vector<16x16xf32> -> vector<16x16xf32>
    %cst_91 = arith.constant dense<0.000000e+00> : vector<64x16xf32>
    %171 = tpu.matmul %165, %170, %cst_91 {dimension_numbers = #tpu.dot_dimension_numbers<[1], [0], [0], [1], [0, 0, 1, 1], [], []>} : vector<64x16xf32>, vector<16x16xf32>, vector<64x16xf32> -> vector<64x16xf32>
    %cst_92 = arith.constant dense<0.000000e+00> : vector<16xf32>
    %172 = vector.multi_reduction <add>, %168, %cst_92 [0] : vector<64x16xf32> to vector<16xf32>
    %173 = vector.shape_cast %172 : vector<16xf32> to vector<1x16xf32>
    %174 = vector.broadcast %173 : vector<1x16xf32> to vector<64x16xf32>
    %175 = arith.mulf %165, %174 : vector<64x16xf32>
    %cst_93 = arith.constant dense<0.000000e+00> : vector<64xf32>
    %176 = vector.multi_reduction <add>, %175, %cst_93 [1] : vector<64x16xf32> to vector<64xf32>
    %177 = vector.shape_cast %176 : vector<64xf32> to vector<64x1xf32>
    %cst_94 = arith.constant 1.000000e-15 : f32
    %178 = vector.broadcast %cst_94 : f32 to vector<64x1xf32>
    %179 = arith.addf %177, %178 : vector<64x1xf32>
    %180 = tpu.reciprocal %179 {approx = true} : vector<64x1xf32> -> vector<64x1xf32>
    %181 = vector.broadcast %180 : vector<64x1xf32> to vector<64x16xf32>
    %182 = arith.mulf %171, %181 : vector<64x16xf32>
    %c0_95 = arith.constant 0 : index
    %c0_96 = arith.constant 0 : index
    %183 = vector.load %arg5[%c0_95, %c0_96] : memref<64x32xf32, #tpu.memory_space<vmem>>, vector<16x32xf32>
    %cst_97 = arith.constant dense<0.000000e+00> : vector<64x32xf32>
    %184 = tpu.matmul %182, %183, %cst_97 {dimension_numbers = #tpu.dot_dimension_numbers<[1], [0], [0], [1], [0, 0, 1, 1], [], []>} : vector<64x16xf32>, vector<16x32xf32>, vector<64x32xf32> -> vector<64x32xf32>
    %185 = arith.addf %1, %184 : vector<64x32xf32>
    %186 = vector.extract_strided_slice %3 {offsets = [0, 48], sizes = [64, 16], strides = [1, 1]} : vector<64x96xf32> to vector<64x16xf32>
    %cst_98 = arith.constant 0.000000e+00 : f32
    %187 = vector.broadcast %cst_98 : f32 to vector<64x16xf32>
    %188 = arith.maximumf %186, %187 : vector<64x16xf32>
    %189 = vector.extract_strided_slice %3 {offsets = [0, 64], sizes = [64, 16], strides = [1, 1]} : vector<64x96xf32> to vector<64x16xf32>
    %cst_99 = arith.constant 0.000000e+00 : f32
    %190 = vector.broadcast %cst_99 : f32 to vector<64x16xf32>
    %191 = arith.maximumf %189, %190 : vector<64x16xf32>
    %192 = vector.extract_strided_slice %3 {offsets = [0, 80], sizes = [64, 16], strides = [1, 1]} : vector<64x96xf32> to vector<64x16xf32>
    %cst_100 = arith.constant dense<0.000000e+00> : vector<16x16xf32>
    %193 = tpu.matmul %191, %192, %cst_100 {dimension_numbers = #tpu.dot_dimension_numbers<[0], [0], [1], [1], [0, 1, 1, 1], [], []>} : vector<64x16xf32>, vector<64x16xf32>, vector<16x16xf32> -> vector<16x16xf32>
    %cst_101 = arith.constant dense<0.000000e+00> : vector<64x16xf32>
    %194 = tpu.matmul %188, %193, %cst_101 {dimension_numbers = #tpu.dot_dimension_numbers<[1], [0], [0], [1], [0, 0, 1, 1], [], []>} : vector<64x16xf32>, vector<16x16xf32>, vector<64x16xf32> -> vector<64x16xf32>
    %cst_102 = arith.constant dense<0.000000e+00> : vector<16xf32>
    %195 = vector.multi_reduction <add>, %191, %cst_102 [0] : vector<64x16xf32> to vector<16xf32>
    %196 = vector.shape_cast %195 : vector<16xf32> to vector<1x16xf32>
    %197 = vector.broadcast %196 : vector<1x16xf32> to vector<64x16xf32>
    %198 = arith.mulf %188, %197 : vector<64x16xf32>
    %cst_103 = arith.constant dense<0.000000e+00> : vector<64xf32>
    %199 = vector.multi_reduction <add>, %198, %cst_103 [1] : vector<64x16xf32> to vector<64xf32>
    %200 = vector.shape_cast %199 : vector<64xf32> to vector<64x1xf32>
    %cst_104 = arith.constant 1.000000e-15 : f32
    %201 = vector.broadcast %cst_104 : f32 to vector<64x1xf32>
    %202 = arith.addf %200, %201 : vector<64x1xf32>
    %203 = tpu.reciprocal %202 {approx = true} : vector<64x1xf32> -> vector<64x1xf32>
    %204 = vector.broadcast %203 : vector<64x1xf32> to vector<64x16xf32>
    %205 = arith.mulf %194, %204 : vector<64x16xf32>
    %c16 = arith.constant 16 : index
    %c0_105 = arith.constant 0 : index
    %206 = vector.load %arg5[%c16, %c0_105] : memref<64x32xf32, #tpu.memory_space<vmem>>, vector<16x32xf32>
    %cst_106 = arith.constant dense<0.000000e+00> : vector<64x32xf32>
    %207 = tpu.matmul %205, %206, %cst_106 {dimension_numbers = #tpu.dot_dimension_numbers<[1], [0], [0], [1], [0, 0, 1, 1], [], []>} : vector<64x16xf32>, vector<16x32xf32>, vector<64x32xf32> -> vector<64x32xf32>
    %208 = arith.addf %185, %207 : vector<64x32xf32>
    %209 = vector.extract_strided_slice %162 {offsets = [0, 0], sizes = [64, 16], strides = [1, 1]} : vector<64x96xf32> to vector<64x16xf32>
    %cst_107 = arith.constant 0.000000e+00 : f32
    %210 = vector.broadcast %cst_107 : f32 to vector<64x16xf32>
    %211 = arith.maximumf %209, %210 : vector<64x16xf32>
    %212 = vector.extract_strided_slice %162 {offsets = [0, 16], sizes = [64, 16], strides = [1, 1]} : vector<64x96xf32> to vector<64x16xf32>
    %cst_108 = arith.constant 0.000000e+00 : f32
    %213 = vector.broadcast %cst_108 : f32 to vector<64x16xf32>
    %214 = arith.maximumf %212, %213 : vector<64x16xf32>
    %215 = vector.extract_strided_slice %162 {offsets = [0, 32], sizes = [64, 16], strides = [1, 1]} : vector<64x96xf32> to vector<64x16xf32>
    %cst_109 = arith.constant dense<0.000000e+00> : vector<16x16xf32>
    %216 = tpu.matmul %214, %215, %cst_109 {dimension_numbers = #tpu.dot_dimension_numbers<[0], [0], [1], [1], [0, 1, 1, 1], [], []>} : vector<64x16xf32>, vector<64x16xf32>, vector<16x16xf32> -> vector<16x16xf32>
    %cst_110 = arith.constant dense<0.000000e+00> : vector<64x16xf32>
    %217 = tpu.matmul %211, %216, %cst_110 {dimension_numbers = #tpu.dot_dimension_numbers<[1], [0], [0], [1], [0, 0, 1, 1], [], []>} : vector<64x16xf32>, vector<16x16xf32>, vector<64x16xf32> -> vector<64x16xf32>
    %cst_111 = arith.constant dense<0.000000e+00> : vector<16xf32>
    %218 = vector.multi_reduction <add>, %214, %cst_111 [0] : vector<64x16xf32> to vector<16xf32>
    %219 = vector.shape_cast %218 : vector<16xf32> to vector<1x16xf32>
    %220 = vector.broadcast %219 : vector<1x16xf32> to vector<64x16xf32>
    %221 = arith.mulf %211, %220 : vector<64x16xf32>
    %cst_112 = arith.constant dense<0.000000e+00> : vector<64xf32>
    %222 = vector.multi_reduction <add>, %221, %cst_112 [1] : vector<64x16xf32> to vector<64xf32>
    %223 = vector.shape_cast %222 : vector<64xf32> to vector<64x1xf32>
    %cst_113 = arith.constant 1.000000e-15 : f32
    %224 = vector.broadcast %cst_113 : f32 to vector<64x1xf32>
    %225 = arith.addf %223, %224 : vector<64x1xf32>
    %226 = tpu.reciprocal %225 {approx = true} : vector<64x1xf32> -> vector<64x1xf32>
    %227 = vector.broadcast %226 : vector<64x1xf32> to vector<64x16xf32>
    %228 = arith.mulf %217, %227 : vector<64x16xf32>
    %c32 = arith.constant 32 : index
    %c0_114 = arith.constant 0 : index
    %229 = vector.load %arg5[%c32, %c0_114] : memref<64x32xf32, #tpu.memory_space<vmem>>, vector<16x32xf32>
    %cst_115 = arith.constant dense<0.000000e+00> : vector<64x32xf32>
    %230 = tpu.matmul %228, %229, %cst_115 {dimension_numbers = #tpu.dot_dimension_numbers<[1], [0], [0], [1], [0, 0, 1, 1], [], []>} : vector<64x16xf32>, vector<16x32xf32>, vector<64x32xf32> -> vector<64x32xf32>
    %231 = arith.addf %208, %230 : vector<64x32xf32>
    %232 = vector.extract_strided_slice %162 {offsets = [0, 48], sizes = [64, 16], strides = [1, 1]} : vector<64x96xf32> to vector<64x16xf32>
    %cst_116 = arith.constant 0.000000e+00 : f32
    %233 = vector.broadcast %cst_116 : f32 to vector<64x16xf32>
    %234 = arith.maximumf %232, %233 : vector<64x16xf32>
    %235 = vector.extract_strided_slice %162 {offsets = [0, 64], sizes = [64, 16], strides = [1, 1]} : vector<64x96xf32> to vector<64x16xf32>
    %cst_117 = arith.constant 0.000000e+00 : f32
    %236 = vector.broadcast %cst_117 : f32 to vector<64x16xf32>
    %237 = arith.maximumf %235, %236 : vector<64x16xf32>
    %238 = vector.extract_strided_slice %162 {offsets = [0, 80], sizes = [64, 16], strides = [1, 1]} : vector<64x96xf32> to vector<64x16xf32>
    %cst_118 = arith.constant dense<0.000000e+00> : vector<16x16xf32>
    %239 = tpu.matmul %237, %238, %cst_118 {dimension_numbers = #tpu.dot_dimension_numbers<[0], [0], [1], [1], [0, 1, 1, 1], [], []>} : vector<64x16xf32>, vector<64x16xf32>, vector<16x16xf32> -> vector<16x16xf32>
    %cst_119 = arith.constant dense<0.000000e+00> : vector<64x16xf32>
    %240 = tpu.matmul %234, %239, %cst_119 {dimension_numbers = #tpu.dot_dimension_numbers<[1], [0], [0], [1], [0, 0, 1, 1], [], []>} : vector<64x16xf32>, vector<16x16xf32>, vector<64x16xf32> -> vector<64x16xf32>
    %cst_120 = arith.constant dense<0.000000e+00> : vector<16xf32>
    %241 = vector.multi_reduction <add>, %237, %cst_120 [0] : vector<64x16xf32> to vector<16xf32>
    %242 = vector.shape_cast %241 : vector<16xf32> to vector<1x16xf32>
    %243 = vector.broadcast %242 : vector<1x16xf32> to vector<64x16xf32>
    %244 = arith.mulf %234, %243 : vector<64x16xf32>
    %cst_121 = arith.constant dense<0.000000e+00> : vector<64xf32>
    %245 = vector.multi_reduction <add>, %244, %cst_121 [1] : vector<64x16xf32> to vector<64xf32>
    %246 = vector.shape_cast %245 : vector<64xf32> to vector<64x1xf32>
    %cst_122 = arith.constant 1.000000e-15 : f32
    %247 = vector.broadcast %cst_122 : f32 to vector<64x1xf32>
    %248 = arith.addf %246, %247 : vector<64x1xf32>
    %249 = tpu.reciprocal %248 {approx = true} : vector<64x1xf32> -> vector<64x1xf32>
    %250 = vector.broadcast %249 : vector<64x1xf32> to vector<64x16xf32>
    %251 = arith.mulf %240, %250 : vector<64x16xf32>
    %c48 = arith.constant 48 : index
    %c0_123 = arith.constant 0 : index
    %252 = vector.load %arg5[%c48, %c0_123] : memref<64x32xf32, #tpu.memory_space<vmem>>, vector<16x32xf32>
    %cst_124 = arith.constant dense<0.000000e+00> : vector<64x32xf32>
    %253 = tpu.matmul %251, %252, %cst_124 {dimension_numbers = #tpu.dot_dimension_numbers<[1], [0], [0], [1], [0, 0, 1, 1], [], []>} : vector<64x16xf32>, vector<16x32xf32>, vector<64x32xf32> -> vector<64x32xf32>
    %254 = arith.addf %231, %253 : vector<64x32xf32>
    %c0_125 = arith.constant 0 : index
    %c0_126 = arith.constant 0 : index
    %c0_127 = arith.constant 0 : index
    %255 = vector.load %arg6[%c0_125, %c0_126, %c0_127] : memref<1x64x32xf32, #tpu.memory_space<vmem>>, vector<1x64x32xf32>
    %256 = vector.shape_cast %255 : vector<1x64x32xf32> to vector<64x32xf32>
    %257 = vector.shape_cast %254 : vector<64x32xf32> to vector<1x64x32xf32>
    tpu.vector_store %arg6[%c0_125, %c0_126, %c0_127], %257 {strides = array<i32>} : memref<1x64x32xf32, #tpu.memory_space<vmem>>, vector<1x64x32xf32>,
    return
  }
  func.func @transform_0(%arg0: i32) -> (i32, i32, i32) {
    %c0_i32 = arith.constant 0 : i32
    %c0_i32_0 = arith.constant 0 : i32
    %c0_i32_1 = arith.constant 0 : i32
    return %arg0, %c0_i32, %c0_i32_0 : i32, i32, i32
  }
  func.func @transform_1(%arg0: i32) -> (i32, i32) {
    %c0_i32 = arith.constant 0 : i32
    %c0_i32_0 = arith.constant 0 : i32
    %c0_i32_1 = arith.constant 0 : i32
    return %c0_i32, %c0_i32_0 : i32, i32
  }
  func.func @transform_2(%arg0: i32) -> (i32, i32) {
    %c0_i32 = arith.constant 0 : i32
    %c0_i32_0 = arith.constant 0 : i32
    %c0_i32_1 = arith.constant 0 : i32
    return %c0_i32, %c0_i32_0 : i32, i32
  }
  func.func @transform_3(%arg0: i32) -> (i32, i32) {
    %c0_i32 = arith.constant 0 : i32
    %c0_i32_0 = arith.constant 0 : i32
    %c0_i32_1 = arith.constant 0 : i32
    return %c0_i32, %c0_i32_0 : i32, i32
  }
  func.func @transform_4(%arg0: i32) -> (i32, i32) {
    %c0_i32 = arith.constant 0 : i32
    %c0_i32_0 = arith.constant 0 : i32
    %c0_i32_1 = arith.constant 0 : i32
    return %c0_i32, %c0_i32_0 : i32, i32
  }
  func.func @transform_5(%arg0: i32) -> (i32, i32, i32) {
    %c0_i32 = arith.constant 0 : i32
    %c0_i32_0 = arith.constant 0 : i32
    %c0_i32_1 = arith.constant 0 : i32
    return %arg0, %c0_i32, %c0_i32_0 : i32, i32, i32
  }
}

</mosaic_0001>

<bundles_post_ra>
// kernel: qaunt_mb_block_forward.1
= control target key start
LH: loop header
LB: loop body
LE: loop exit
PB: predicated region body
PF: predicated region fallthrough
CT: control target
= control target key end

     0   :  { %10 = vsyncpa [#allocation4], 0  ;;  %s6250_s0 = inlined_call_operand.hbm [shape: f32[2,64,32], index: 0, kind: input, shape index: {}]   ;;  %s6251_s1 = inlined_call_operand.hbm [shape: f32[32,96], index: 1, kind: input, shape index: {}]   ;;  %s6252_s2 = inlined_call_operand.hbm [shape: f32[25,96], index: 2, kind: input, shape index: {}]   ;;  %s6253_s3 = inlined_call_operand.vmem [shape: f32[96,96], index: 3, kind: input, shape index: {}]   ;;  %s6254_s4 = inlined_call_operand.vmem [shape: f32[64,32], index: 4, kind: input, shape index: {}]   ;;  %s6255_s5 = inlined_call_operand.hbm [shape: f32[2,64,32], index: 5, kind: output, shape index: {}]  }
   0x1   :  { %12 = vsyncpa [#allocation4 + $0x1], 0 }
   0x2   :  { %13 = vsyncpa [#allocation7], 0 }
   0x3   :  { %14 = vsyncpa [#allocation5], 0 }
   0x4   :  { %16 = vsyncpa [#allocation5 + $0x1], 0  ;;  %s4679_s18 = smov 0   ;;  %s4681_s19 = smov 0  }
   0x5   :  { %s4683_s20 = smov 0   ;;  %s4685_s21 = smov 0  }
   0x6 LB: > { %s4700_s22 = sadd.s32 4294967295, %s4633_s21   ;;  %s3567_s23 = sadd.s32 4294967294, %s4633_s21   ;;  %s4633_s21 = sphi %s4685_s21, %s6463_s21   ;;  %s4629_s20 = sphi %s4683_s20, %s6462_s20   ;;  %s4625_s19 = sphi %s4681_s19, %s6461_s19   ;;  %s4621_s18 = sphi %s4679_s18, %s6460_s18  }
   0x7   : > { %p42_p0 = scmp.ne.s32.totalorder %s4625_s19, %s4621_s18  ;;  %p6256_p1 = scmp.eq.s32.totalorder %s4700_s22, 0 }
   0x8   : > { %p156_p3 = scmp.eq.s32.totalorder %s3567_s23, 1  ;;  %p3568_p5 = scmp.ge.s32.totalorder %s4633_s21, 1 }
   0x9   : > { %p4709_p4 = por %p6256_p1, %p42_p0  ;;  %p163_p7 = scmp.lt.s32.totalorder %s4633_s21, 3 }
   0xa   : > { %p4714_p6 = por %p156_p3, %p42_p0  ;;  %s4635_s27 = smov [#allocation6]  }
   0xb   : > { %s6328_s24 = scalar_select %p4709_p4, 1, 0 }
   0xc   : > { %s6329_s25 = scalar_select %p4714_p6, 1, 0 }
   0xd   : > { %p4719_p8 = pnand %p3568_p5, %p163_p7  ;;  %s175_s28 = sshll.u32 %s4635_s27, 4  ;;  %s4723_s28 = int_to_ptr.vmem [resolvable:$true] %s175_s28 }
   0xe   : > { %s4636_s30 = smov [#allocation8]   ;;  %s4477_s9 = scalar_lea.hbm %s6251_s1, 512 }
   0xf   : > { %p4260_p9 = pneg %p4719_p8  ;;  %s188_s6 = sshll.u32 %s4636_s30, 4  ;;  %s4734_s6 = int_to_ptr.vmem [resolvable:$true] %s188_s6 }
  0x10   : > { %p4478_p12 = scmp.ne.s32.totalorder %s6251_s1, %s4477_s9  ;;  %p4484_p5 = scmp.lt.u32.totalorder %s4477_s9, %s6251_s1 }
  0x11   : > { %p4730_p11 = pnand %p4260_p9, %p6256_p1 }
  0x13   : > { %p4479_p13 = pneg %p4730_p11 }
  0x15   : > { %p4480_p0 = pnand %p4479_p13, %p4478_p12 }
  0x17   : > { %p4481_p3 = pneg %p4480_p0 }
  0x19   : > { %p4486_p7 = pnand %p4484_p5, %p4481_p3 }
  0x1b   : > { %4489 = shalt.err (!%p4486_p7)
}
  0x1c   : > { %s4490_s14 = scalar_lea.vmem %s4723_s28, 512  ;;  %p4498_p2 = scmp.lt.s32.totalorder %s4723_s28, %s4723_s28 }
  0x1d   : > { %p4491_p9 = scmp.ne.s32.totalorder %s4723_s28, %s4490_s14  ;;  %p4499_p12 = scmp.lt.s32.totalorder %s4490_s14, %s4490_s14 }
  0x1f   : > { %p4493_p10 = pnand %p4491_p9, %p4479_p13  ;;  %p4500_p0 = por %p4499_p12, %p4498_p2 }
  0x21   : > { %p4494_p1 = pneg %p4493_p10 }
  0x23   : > { %p4501_p6 = pnand %p4500_p0, %p4494_p1 }
  0x25   : > { %4504 = shalt.err (!%p4501_p6)
}
  0x26   : > { %s4637_s15 = smov 128   ;;  %s4638_s16 = smov 8  }
  0x27   : > { %4263 = dma.hbm_to_vmem [thread:$0]  (!%p4730_p11), %s6251_s1, 512, %s4723_s28, [#allocation7], %s4637_s15, %s4637_s15, %s4638_s16  }
  0x28   : > { %s4505_s7 = scalar_lea.hbm %s6252_s2, 512 }
  0x29   : > { %p4506_p1 = scmp.ne.s32.totalorder %s6252_s2, %s4505_s7  ;;  %p4512_p10 = scmp.lt.u32.totalorder %s4505_s7, %s6252_s2 }
  0x2b   : > { %p4508_p2 = pnand %p4506_p1, %p4479_p13 }
  0x2d   : > { %p4509_p6 = pneg %p4508_p2 }
  0x2f   : > { %p4514_p3 = pnand %p4512_p10, %p4509_p6 }
  0x31   : > { %4517 = shalt.err (!%p4514_p3)
}
  0x32   : > { %s4518_s28 = scalar_lea.vmem %s4734_s6, 512  ;;  %p4526_p12 = scmp.lt.s32.totalorder %s4734_s6, %s4734_s6 }
  0x33   : > { %p4519_p5 = scmp.ne.s32.totalorder %s4734_s6, %s4518_s28  ;;  %p4527_p0 = scmp.lt.s32.totalorder %s4518_s28, %s4518_s28 }
  0x35   : > { %p4521_p7 = pnand %p4519_p5, %p4479_p13  ;;  %p4528_p1 = por %p4527_p0, %p4526_p12 }
  0x37   : > { %p4522_p9 = pneg %p4521_p7 }
  0x39   : > { %p4529_p2 = pnand %p4528_p1, %p4522_p9 }
  0x3b   : > { %4532 = shalt.err (!%p4529_p2)
}
  0x3c   : > { %4266 = dma.hbm_to_vmem [thread:$0]  (!%p4730_p11), %s6252_s2, 512, %s4734_s6, [#allocation7], %s4637_s15, %s4637_s15, %s4638_s16  }
  0x3d   : > { %s4795_s29 = sadd.s32 1, %s4633_s21   ;;  %s29_s14 = sadd.s32 1, %s4629_s20 }
  0x3e   : > { %s26_s17 = ssub.s32 %s4633_s21, %s4795_s29  ;;  %p36_p13 = scmp.ne.s32.totalorder %s4629_s20, %s4625_s19 }
  0x3f   : > { %p27_p6 = scmp.eq.s32.totalorder %s26_s17, 0  ;;  %p37_p10 = scmp.eq.s32.totalorder %s4633_s21, 0 }
  0x40   : > { %p6332_p3 = scmp.eq.s32.totalorder %s4700_s22, 1  ;;  %p4277_p7 = scmp.lt.s32.totalorder %s4633_s21, 2 }
  0x41   : > { %s4811_s27 = scalar_select %p27_p6, %s4629_s20, %s29_s14  }
  0x42   : > { %p4805_p5 = por %p6332_p3, %p36_p13  ;;  %p38_p9 = por %p37_p10, %p36_p13 }
  0x43   : > { %s208_s30 = sand.u32 1, %s4629_s20   ;;  %s3674_s6 = sshll.u32 %s4633_s21, 10 }
  0x44   : > { %s6333_s23 = scalar_select %p4805_p5, 1, 0 }
  0x45   : > { %s3572_s7 = sshll.u32 %s208_s30, 6  ;;  %s4818_s10 = scalar_lea.hbm %s6250_s0, %s3674_s6 }
  0x46   : > { %s212_s11 = scalar_lea.vmem [#allocation3], %s3572_s7  ;;  %p4822_p11 = pnand %p4277_p7, %p38_p9 }
  0x47   : > { %s219_s28 = sshll.u32 %s212_s11, 4  ;;  %s4826_s13 = scalar_lea.sflag [#allocation4], %s208_s30  ;;  %s4820_s28 = int_to_ptr.vmem [resolvable:$true] %s219_s28 }
  0x48   : > { %s4533_s14 = scalar_lea.hbm %s4818_s10, 1024  ;;  %p4535_p0 = pneg %p4822_p11 }
  0x49   : > { %p4534_p12 = scmp.ne.s32.totalorder %s4818_s10, %s4533_s14  ;;  %s4538_s6 = scalar_lea.hbm %s6250_s0, 2048 }
  0x4a   : > { %p4539_p13 = scmp.lt.u32.totalorder %s4818_s10, %s6250_s0  ;;  %p4540_p6 = scmp.lt.u32.totalorder %s4538_s6, %s4533_s14 }
  0x4b   : > { %p4536_p1 = pnand %p4535_p0, %p4534_p12  ;;  %p4542_p3 = scmp.lt.u32.totalorder %s4533_s14, %s4818_s10 }
  0x4c   : > { %p4541_p10 = por %p4540_p6, %p4539_p13 }
  0x4d   : > { %p4537_p2 = pneg %p4536_p1 }
  0x4e   : > { %p4543_p7 = por %p4542_p3, %p4541_p10 }
  0x50   : > { %p4544_p9 = pnand %p4543_p7, %p4537_p2 }
  0x52   : > { %4547 = shalt.err (!%p4544_p9)
}
  0x53   : > { %s4548_s30 = scalar_lea.vmem %s4820_s28, 1024  ;;  %s4639_s11 = smov [#allocation3]  }
  0x54   : > { %p4549_p12 = scmp.ne.s32.totalorder %s4820_s28, %s4548_s30  ;;  %s4553_s17 = sshll.u32 %s4639_s11, 4  ;;  %s4554_s17 = int_to_ptr.vmem [resolvable:$false] %s4553_s17 }
  0x55   : > { %s4555_s7 = scalar_lea.vmem %s4554_s17, 2048  ;;  %p4556_p4 = scmp.lt.s32.totalorder %s4820_s28, %s4554_s17 }
  0x56   : > { %p4551_p1 = pnand %p4549_p12, %p4535_p0  ;;  %p4557_p13 = scmp.lt.s32.totalorder %s4555_s7, %s4548_s30 }
  0x58   : > { %p4552_p5 = pneg %p4551_p1  ;;  %p4558_p6 = por %p4557_p13, %p4556_p4 }
  0x5a   : > { %p4559_p10 = pnand %p4558_p6, %p4552_p5 }
  0x5c   : > { %4562 = shalt.err (!%p4559_p10)
}
  0x5d   : > { %4270 = dma.hbm_to_vmem [thread:$0]  (!%p4822_p11), %s4818_s10, 1024, %s4820_s28, %s4826_s13, %s4637_s15, %s4637_s15, %s4638_s16  }
  0x5e   : > { %231 = sbr.rel (%p4719_p8) target bundleno = 1978 (0x7ba), region = 40 }
  0x65   : > { %s4860_s14 = sand.u32 1, %s4625_s19   ;;  %p6335_p4 = scmp.ne.s32.totalorder %s6328_s24, 0 }
  0x66   : > { %s3576_s6 = sshll.u32 %s4860_s14, 6  ;;  %s234_s8 = scalar_lea.sflag [#allocation4], %s4860_s14 }
  0x67   : > { %s4866_s12 = scalar_lea.vmem [#allocation3], %s3576_s6 }
  0x68   : > { %4608 = dma.done.wait (%p6335_p4), %s234_s8, 1024  }
  0x69   : > { %4610 = vsyncadd (%p6335_p4), %s234_s8, 4294966272  ;;  %p6336_p5 = scmp.eq.s32.totalorder %s4700_s22, 0 }
  0x6b   : > { %4612 = dma.done.wait (%p6336_p5), [#allocation7], 1024   ;;  %p6337_p8 = pmov %p6336_p5 }
  0x6c   : > { %vm284_vm0 = vcmask 261120   ;;  %v280_v0 = vld [vmem:[#allocation6] sm:$0xff]  ;;  %v281_v1 = vld [vmem:[#allocation6 + $0x8] sm:$0xff]  ;;  %v282_v2 = vld [vmem:[#allocation6 + $0x10] sm:$0xff]  ;;  %vm414_vm1 = vcmask 785408   ;;  %vm416_vm2 = vcmask 781312   ;;  %v461_v33 = vlaneseq }
  0x6d   : > { %4614 = vsyncadd (%p6337_p8), [#allocation7], 4294966272  ;;  %v4088_v3 = vpack.c.bf16 %v281_v1, %v280_v0  ;;  %v283_v4 = vld [vmem:[#allocation6 + $0x18] sm:$0xff]  ;;  %v272_v5 = vld [vmem:[%s4866_s12] sm:$0xff]  ;;  %v4640_v14 = vmov 0.0   ;;  %s4641_s7 = smov 112  }
  0x6e   : > { %v4092_v6 = vpack.c.bf16 %v283_v4, %v282_v2  ;;  %3836 = vmatprep.mubr.msk.f32.mxu0 %vm284_vm0, %v272_v5  ;;  %v273_v7 = vld [vmem:[%s4866_s12 + $0x8] sm:$0xff]  ;;  %v274_v8 = vld [vmem:[%s4866_s12 + $0x10] sm:$0xff]  ;;  %v275_v9 = vld [vmem:[%s4866_s12 + $0x18] sm:$0xff]  ;;  %422 = vst.msk [vmem:[#allocation2 + $0x30] sm:$0xff] %vm414_vm1, %v4640_v14  ;;  %v462_v34 = vshrl.u32 %v461_v33, 7  ;;  %s4642_s8 = smov 96  }
  0x6f   : > { %4089 = vmatprep.subr.bf16.mxu0 %v4088_v3  ;;  %v276_v10 = vld [vmem:[%s4866_s12 + $0x20] sm:$0xff]  ;;  %v277_v11 = vld [vmem:[%s4866_s12 + $0x28] sm:$0xff]  ;;  %v278_v12 = vld [vmem:[%s4866_s12 + $0x30] sm:$0xff]  ;;  %423 = vst.msk [vmem:[#allocation2 + $0x38] sm:$0xf] %vm416_vm2, %v4640_v14  ;;  %s4643_s24 = smov 64  }
  0x70   : > { %4091 = vmatpush3.bf16.msra.mxu0 %v4088_v3  ;;  %v279_v13 = vld [vmem:[%s4866_s12 + $0x38] sm:$0xff]  ;;  %415 = vst.msk [vmem:[#allocation2] sm:$0xff] %vm414_vm1, %v4640_v14  ;;  %418 = vst.msk [vmem:[#allocation2 + $0x10] sm:$0xff] %vm414_vm1, %v4640_v14  ;;  %v1156_v15 = vld [vmem:[%s6253_s3] sm:$0xff]  ;;  %v4952_v35 = vsub.s32 0, %v462_v34  ;;  %v4954_v36 = vsub.s32 1, %v462_v34 }
  0x71   : > { %4093 = vmatprep.subr.bf16.mxu0 %v4092_v6  ;;  %417 = vst.msk [vmem:[#allocation2 + $0x8] sm:$0xf] %vm416_vm2, %v4640_v14  ;;  %419 = vst.msk [vmem:[#allocation2 + $0x18] sm:$0xf] %vm416_vm2, %v4640_v14  ;;  %v1157_v16 = vld [vmem:[%s6253_s3 + $0x8] sm:$0xff]  ;;  %v1158_v17 = vld [vmem:[%s6253_s3 + $0x10] sm:$0xff] }
  0x72   : > { %420 = vst.msk [vmem:[#allocation2 + $0x20] sm:$0xff] %vm414_vm1, %v4640_v14  ;;  %424 = vst.msk [vmem:[#allocation2 + $0x40] sm:$0xff] %vm414_vm1, %v4640_v14  ;;  %v4096_v18 = vpack.c.bf16 %v1157_v16, %v1156_v15  ;;  %v1159_v19 = vld [vmem:[%s6253_s3 + $0x18] sm:$0xff]  ;;  %v1160_v21 = vld [vmem:[%s6253_s3 + $0x20] sm:$0xff]  ;;  %v4962_v40 = vsub.s32 2, %v462_v34  ;;  %v4967_v44 = vsub.s32 3, %v462_v34 }
  0x73   : > { %421 = vst.msk [vmem:[#allocation2 + $0x28] sm:$0xf] %vm416_vm2, %v4640_v14  ;;  %425 = vst.msk [vmem:[#allocation2 + $0x48] sm:$0xf] %vm416_vm2, %v4640_v14  ;;  %v4100_v20 = vpack.c.bf16 %v1159_v19, %v1158_v17  ;;  %v1161_v22 = vld [vmem:[%s6253_s3 + $0x28] sm:$0xff]  ;;  %v1162_v24 = vld [vmem:[%s6253_s3 + $0x30] sm:$0xff] }
  0x74   : > { %4095 = vmatpush3.bf16.msra.mxu0 %v4092_v6  ;;  %426 = vst.msk [vmem:[#allocation2 + $0x50] sm:$0xff] %vm414_vm1, %v4640_v14  ;;  %428 = vst.msk [vmem:[#allocation2 + $0x60] sm:$0xff] %vm414_vm1, %v4640_v14  ;;  %4097 = vmatprep.subr.bf16.mxu1 %v4096_v18  ;;  %v4104_v23 = vpack.c.bf16 %v1161_v22, %v1160_v21  ;;  %v1163_v25 = vld [vmem:[%s6253_s3 + $0x38] sm:$0xff]  ;;  %v1164_v27 = vld [vmem:[%s6253_s3 + $0x40] sm:$0xff]  ;;  %v4974_v49 = vsub.s32 4, %v462_v34  ;;  %v4980_v54 = vsub.s32 5, %v462_v34 }
  0x75   : > { %427 = vst.msk [vmem:[#allocation2 + $0x58] sm:$0xf] %vm416_vm2, %v4640_v14  ;;  %429 = vst.msk [vmem:[#allocation2 + $0x68] sm:$0xf] %vm416_vm2, %v4640_v14  ;;  %4099 = vmatpush3.bf16.msra.mxu1 %v4096_v18  ;;  %v4108_v26 = vpack.c.bf16 %v1163_v25, %v1162_v24  ;;  %v1165_v28 = vld [vmem:[%s6253_s3 + $0x48] sm:$0xff]  ;;  %v1166_v29 = vld [vmem:[%s6253_s3 + $0x50] sm:$0xff] }
  0x76   : > { %430 = vst.msk [vmem:[#allocation2 + $0x70] sm:$0xff] %vm414_vm1, %v4640_v14  ;;  %432 = vst.msk [vmem:[#allocation2 + $0x80] sm:$0xff] %vm414_vm1, %v4640_v14  ;;  %4101 = vmatprep.subr.bf16.mxu1 %v4100_v20  ;;  %v4112_v30 = vpack.c.bf16 %v1165_v28, %v1164_v27  ;;  %v1167_v31 = vld [vmem:[%s6253_s3 + $0x58] sm:$0xff]  ;;  %v449_v37 = vld [vmem:[#allocation8] sm:$0xff]  ;;  %v4986_v59 = vsub.s32 6, %v462_v34  ;;  %v4992_v0 = vsub.s32 7, %v462_v34 }
  0x77   : > { %3837 = vmatmul.mubr.msk.f32.vlgmr.msra.gmra.mrb[0].mxu0 %vm284_vm0, %v273_v7  ;;  %431 = vst.msk [vmem:[#allocation2 + $0x78] sm:$0xf] %vm416_vm2, %v4640_v14  ;;  %433 = vst.msk [vmem:[#allocation2 + $0x88] sm:$0xf] %vm416_vm2, %v4640_v14  ;;  %v4116_v32 = vpack.c.bf16 %v1167_v31, %v1166_v29  ;;  %v4957_v38 = vrot.slane %v449_v37, %v4952_v35  ;;  %v4960_v39 = vrot.slane %v449_v37, %v4954_v36  ;;  %v453_v41 = vld [vmem:[#allocation2] sm:$0xff]  ;;  %v454_v62 = vld [vmem:[#allocation2 + $0x10] sm:$0xff] }
  0x78   : > { %3839 = vmatprep.mubr.msk.f32.mxu0 %vm284_vm0, %v274_v8  ;;  %434 = vst.msk [vmem:[#allocation2 + $0x90] sm:$0xff] %vm414_vm1, %v4640_v14  ;;  %436 = vst.msk [vmem:[#allocation2 + $0xa0] sm:$0xff] %vm414_vm1, %v4640_v14  ;;  %v481_v42 = vld [vmem:[#allocation2 + $0x1] sm:$0xff]  ;;  %v4965_v43 = vrot.slane %v449_v37, %v4962_v40  ;;  %v4972_v48 = vrot.slane %v449_v37, %v4967_v44  ;;  %v4978_v53 = vrot.slane %v449_v37, %v4974_v49  ;;  %v482_v1 = vld [vmem:[#allocation2 + $0x11] sm:$0xff]  ;;  %s4644_s26 = smov 48   ;;  %vm1401_vm3 = vcmask 523264  }
  0x79   : > { %435 = vst.msk [vmem:[#allocation2 + $0x98] sm:$0xf] %vm416_vm2, %v4640_v14  ;;  %437 = vst.msk [vmem:[#allocation2 + $0xa8] sm:$0xf] %vm416_vm2, %v4640_v14  ;;  %4103 = vmatpush3.bf16.msra.mxu1 %v4100_v20  ;;  %v465_v45 = vmul.f32 %v4957_v38, %v453_v41  ;;  %v493_v46 = vmul.f32 %v4960_v39, %v481_v42  ;;  %v509_v47 = vld [vmem:[#allocation2 + $0x2] sm:$0xff]  ;;  %v4984_v58 = vrot.slane %v449_v37, %v4980_v54  ;;  %v510_v7 = vld [vmem:[#allocation2 + $0x12] sm:$0xff] }
  0x7a   : > { %438 = vst.msk [vmem:[#allocation2 + $0xb0] sm:$0xff] %vm414_vm1, %v4640_v14  ;;  %4105 = vmatprep.subr.bf16.mxu1 %v4104_v23  ;;  %v521_v51 = vmul.f32 %v4965_v43, %v509_v47  ;;  %v537_v52 = vld [vmem:[#allocation2 + $0x3] sm:$0xff]  ;;  %v4990_v63 = vrot.slane %v449_v37, %v4986_v59  ;;  %v466_v4 = vmul.f32 %v4957_v38, %v454_v62  ;;  %v538_v16 = vld [vmem:[#allocation2 + $0x13] sm:$0xff]  ;;  %vm1483_vm4 = vcmask 130048   ;;  %s4645_s15 = smov 80   ;;  %s271_s13 = scalar_lea.vmem [#allocation9], %s3576_s6 }
  0x7b   : > { %3840 = vmatmul.mubr.msk.f32.gmra.mrb[2].mxu0 %vm284_vm0, %v275_v9  ;;  %439 = vst.msk [vmem:[#allocation2 + $0xb8] sm:$0xf] %vm416_vm2, %v4640_v14  ;;  %v501_v50 = vadd.f32 %v493_v46, %v465_v45  ;;  %v549_v56 = vmul.f32 %v4972_v48, %v537_v52  ;;  %v565_v57 = vld [vmem:[#allocation2 + $0x4] sm:$0xff]  ;;  %v606_v3 = vmul.f32 %v4984_v58, %v454_v62  ;;  %v566_v25 = vld [vmem:[#allocation2 + $0x14] sm:$0xff]  ;;  %vm2124_vm5 = vcmask 654848   ;;  %s3675_s6 = sshll.u32 %s4700_s22, 10 }
  0x7c   : > { %3842 = vmatprep.mubr.msk.f32.mxu0 %vm284_vm0, %v276_v10  ;;  %v577_v61 = vmul.f32 %v4978_v53, %v565_v57  ;;  %v494_v5 = vmul.f32 %v4960_v39, %v482_v1  ;;  %v4998_v6 = vrot.slane %v449_v37, %v4992_v0  ;;  %v634_v9 = vmul.f32 %v4990_v63, %v482_v1  ;;  %v5001_v10 = vld [vmem:[#allocation8 + $0x8] sm:$0xff]  ;;  %s3475_s9 = sshll.u32 %s271_s13, 4  ;;  %s6201_s17 = scalar_lea.hbm %s6255_s5, %s3675_s6  ;;  %s6203_s9 = int_to_ptr.vmem [resolvable:$true] %s3475_s9 }
  0x7d   : > { %4107 = vmatpush3.bf16.msra.mxu1 %v4104_v23  ;;  %v529_v55 = vadd.f32 %v521_v51, %v501_v50  ;;  %v550_v21 = vmul.f32 %v4972_v48, %v538_v16  ;;  %v5016_v24 = vrot.slane %v5001_v10, %v4954_v36  ;;  %v578_v29 = vmul.f32 %v4978_v53, %v566_v25  ;;  %s3462_s22 = scalar_lea.sflag [#allocation5], %s4860_s14  ;;  %p6457_p0 = scmp.ne.s32.totalorder %s6333_s23, 0 }
  0x7e   : > { %4109 = vmatprep.subr.bf16.mxu1 %v4108_v26  ;;  %v662_v15 = vmul.f32 %v4998_v6, %v510_v7  ;;  %v5065_v62 = vrot.slane %v5001_v10, %v4962_v40  ;;  %vm1605_vm6 = vcmask 261248  }
  0x7f   : > { %3843 = vmatmul.mubr.msk.f32.gmra.mrb[4].mxu0 %vm284_vm0, %v277_v11  ;;  %v557_v60 = vadd.f32 %v549_v56, %v529_v55  ;;  %v502_v11 = vadd.f32 %v494_v5, %v466_v4  ;;  %v718_v37 = vmul.f32 %v5016_v24, %v566_v25  ;;  %v5075_v4 = vrot.slane %v5001_v10, %v4974_v49 }
  0x80   : > { %3845 = vmatprep.mubr.msk.f32.mxu0 %vm284_vm0, %v278_v12  ;;  %v522_v12 = vmul.f32 %v4965_v43, %v510_v7 }
  0x81   : > { %4111 = vmatpush3.bf16.msra.mxu1 %v4108_v26  ;;  %v585_v2 = vadd.f32 %v577_v61, %v557_v60  ;;  %v451_v60 = vld [vmem:[#allocation8 + $0x10] sm:$0xff] }
  0x82   : > { %4113 = vmatprep.subr.bf16.mxu1 %v4112_v30  ;;  %v530_v18 = vadd.f32 %v522_v12, %v502_v11 }
  0x83   : > { %3846 = vmatmul.mubr.msk.f32.gmra.mrb[6].mxu0 %vm284_vm0, %v279_v13  ;;  %v614_v8 = vadd.f32 %v606_v3, %v585_v2  ;;  %v5006_v13 = vrot.slane %v5001_v10, %v4952_v35  ;;  %v5071_v3 = vrot.slane %v5001_v10, %v4967_v44 }
  0x84   : > { %v558_v28 = vadd.f32 %v550_v21, %v530_v18  ;;  %v5107_v18 = vrot.slane %v5001_v10, %v4992_v0  ;;  %v5113_v21 = vrot.slane %v451_v60, %v4954_v36 }
  0x85   : > { %4115 = vmatpush3.bf16.msra.mxu1 %v4112_v30  ;;  %v642_v14 = vadd.f32 %v634_v9, %v614_v8  ;;  %v690_v23 = vmul.f32 %v5006_v13, %v538_v16 }
  0x86   : > { %4117 = vmatprep.subr.bf16.mxu1 %v4116_v32  ;;  %v586_v56 = vadd.f32 %v578_v29, %v558_v28  ;;  %6350 = vst [vmem:[#allocation25_spill] sm:$0xff] %v5107_v18  ;;  %6352 = vst [vmem:[#allocation27_spill] sm:$0xff] %v5113_v21  ;;  %v5123_v28 = vrot.slane %v451_v60, %v4967_v44 }
  0x87   : > { %v670_v22 = vadd.f32 %v662_v15, %v642_v14  ;;  %v5093_v14 = vrot.slane %v5001_v10, %v4980_v54  ;;  %v5097_v15 = vrot.slane %v5001_v10, %v4986_v59  ;;  %v5126_v10 = vrot.slane %v451_v60, %v4974_v49 }
  0x88   : > { %6355 = vst [vmem:[#allocation30_spill] sm:$0xff] %v5123_v28 }
  0x89   : > { %4119 = vmatpush3.bf16.msra.mxu1 %v4116_v32  ;;  %v698_v32 = vadd.f32 %v690_v23, %v670_v22  ;;  %6348 = vst [vmem:[#allocation23_spill] sm:$0xff] %v5097_v15  ;;  %v5116_v22 = vrot.slane %v451_v60, %v4962_v40  ;;  %6356 = vst [vmem:[#allocation31_spill] sm:$0xff] %v5126_v10 }
  0x8b   : > { %v5061_v61 = vadd.f32 %v718_v37, %v698_v32  ;;  %6353 = vst [vmem:[#allocation28_spill] sm:$0xff] %v5116_v22 }
 0x14a   : > { %v3838_v17 = vpop.f32.mrb[0].mxu0 }
 0x14b   : > { %442 = vst.msk [vmem:[#allocation2 + $0x32] sm:$0xff] %vm414_vm1, %v3838_v17  ;;  %v5010_v19 = vmax.f32 %v3838_v17, 0.0  ;;  %v375_v20 = vpop.f32.mrb[1].mxu0 }
 0x14c   : > { %441 = vst.msk [vmem:[#allocation2 + $0x22] sm:$0xff] %vm414_vm1, %v375_v20  ;;  %v5019_v26 = vpack.i.bf16 %v3838_v17, %v375_v20  ;;  %v5024_v30 = vmax.f32 %v375_v20, 0.0  ;;  %v5110_v20 = vrot.slane %v451_v60, %v4952_v35 }
 0x14d   : > { %6338 = vst [vmem:[#allocation13_spill] sm:$0xff] %v5010_v19  ;;  %1315 = vrot.lane.b32.xlu0 %v5010_v19, %s4641_s7 }
 0x14e   : > { %6339 = vst [vmem:[#allocation14_spill] sm:$0xff] %v5019_v26  ;;  %v3841_v27 = vpop.f32.mrb[2].mxu0  ;;  %6340 = vst [vmem:[#allocation15_spill] sm:$0xff] %v5024_v30 }
 0x14f   : > { %444 = vst.msk [vmem:[#allocation2 + $0x52] sm:$0xff] %vm414_vm1, %v3841_v27  ;;  %v385_v31 = vpop.f32.mrb[3].mxu0  ;;  %v5057_v57 = vmax.f32 %v3841_v27, 0.0  ;;  %6351 = vst [vmem:[#allocation26_spill] sm:$0xff] %v5110_v20 }
 0x150   : > { %443 = vst.msk [vmem:[#allocation2 + $0x42] sm:$0xff] %vm414_vm1, %v385_v31  ;;  %v5028_v33 = vmax.f32 %v385_v31, 0.0  ;;  %v5030_v34 = vpack.i.bf16 %v3841_v27, %v385_v31  ;;  %v5137_v31 = vrot.slane %v451_v60, %v4980_v54 }
 0x151   : > { %1313 = vrot.lane.b32.xlu0 %v5024_v30, %s4641_s7  ;;  %6345 = vst [vmem:[#allocation20_spill] sm:$0xff] %v5057_v57 }
 0x152   : > { %6341 = vst [vmem:[#allocation16_spill] sm:$0xff] %v5028_v33  ;;  %6342 = vst [vmem:[#allocation17_spill] sm:$0xff] %v5030_v34  ;;  %v5035_v41 = vld [vmem:[#allocation2 + $0x30] sm:$0xff]  ;;  %1317 = vrot.lane.b32.xlu1 %v5028_v33, %s4641_s7  ;;  %v5041_v45 = vpop.f32.mrb[4].mxu0 }
 0x153   : > { %v5037_v42 = vld [vmem:[#allocation2 + $0x31] sm:$0xff]  ;;  %v468_v46 = vmul.f32 %v4957_v38, %v5035_v41  ;;  %v5049_v51 = vld [vmem:[#allocation2 + $0x20] sm:$0xff]  ;;  %446 = vst.msk [vmem:[#allocation2 + $0x72] sm:$0xff] %vm414_vm1, %v5041_v45  ;;  %v5053_v52 = vpop.f32.mrb[5].mxu0  ;;  %6357 = vst [vmem:[#allocation32_spill] sm:$0xff] %v5137_v31 }
 0x154   : > { %6343 = vst [vmem:[#allocation18_spill] sm:$0xff] %v5037_v42  ;;  %v496_v47 = vmul.f32 %v4960_v39, %v5037_v42  ;;  %v5047_v50 = vld [vmem:[#allocation2 + $0x32] sm:$0xff]  ;;  %v5055_v55 = vld [vmem:[#allocation2 + $0x21] sm:$0xff]  ;;  %445 = vst.msk [vmem:[#allocation2 + $0x62] sm:$0xff] %vm414_vm1, %v5053_v52  ;;  %v467_v2 = vmul.f32 %v4957_v38, %v5049_v51  ;;  %v607_v49 = vmul.f32 %v4984_v58, %v5049_v51 }
 0x155   : > { %6344 = vst [vmem:[#allocation19_spill] sm:$0xff] %v5047_v50  ;;  %v524_v5 = vmul.f32 %v4965_v43, %v5047_v50  ;;  %v495_v7 = vmul.f32 %v4960_v39, %v5055_v55  ;;  %v5081_v8 = vld [vmem:[#allocation2 + $0x22] sm:$0xff]  ;;  %v5099_v16 = vld [vmem:[#allocation2 + $0x33] sm:$0xff] }
 0x156   : > { %v504_v1 = vadd.f32 %v496_v47, %v468_v46  ;;  %v5083_v9 = vld [vmem:[#allocation2 + $0x50] sm:$0xff]  ;;  %1319 = vrot.lane.b32.xlu1 %v5057_v57, %s4641_s7  ;;  %v5089_v12 = vpop.f32.mrb[6].mxu0  ;;  %6349 = vst [vmem:[#allocation24_spill] sm:$0xff] %v5099_v16  ;;  %v523_v35 = vmul.f32 %v4965_v43, %v5081_v8  ;;  %v5130_v36 = vld [vmem:[#allocation2 + $0x23] sm:$0xff]  ;;  %v552_v44 = vmul.f32 %v4972_v48, %v5099_v16 }
 0x157   : > { %6346 = vst [vmem:[#allocation21_spill] sm:$0xff] %v5083_v9  ;;  %v5085_v11 = vld [vmem:[#allocation2 + $0x51] sm:$0xff]  ;;  %448 = vst.msk [vmem:[#allocation2 + $0x92] sm:$0xff] %vm414_vm1, %v5089_v12  ;;  %v5103_v17 = vpop.f32.mrb[7].mxu0  ;;  %v503_v27 = vadd.f32 %v495_v7, %v467_v2  ;;  %v470_v40 = vmul.f32 %v4957_v38, %v5083_v9  ;;  %v5145_v37 = vld [vmem:[#allocation2 + $0x40] sm:$0xff]  ;;  %v5150_v47 = vrot.slane %v451_v60, %v4986_v59 }
 0x158   : > { %6347 = vst [vmem:[#allocation22_spill] sm:$0xff] %v5085_v11  ;;  %v532_v23 = vadd.f32 %v524_v5, %v504_v1  ;;  %v5118_v25 = vld [vmem:[#allocation2 + $0x34] sm:$0xff]  ;;  %447 = vst.msk [vmem:[#allocation2 + $0x82] sm:$0xff] %vm414_vm1, %v5103_v17  ;;  %v498_v29 = vmul.f32 %v4960_v39, %v5085_v11  ;;  %v5147_v46 = vld [vmem:[#allocation2 + $0x41] sm:$0xff]  ;;  %v5153_v1 = vrot.slane %v451_v60, %v4992_v0 }
 0x159   : > { %6354 = vst [vmem:[#allocation29_spill] sm:$0xff] %v5118_v25  ;;  %v5143_v32 = vld [vmem:[#allocation2 + $0x52] sm:$0xff]  ;;  %6359 = vst [vmem:[#allocation34_spill] sm:$0xff] %v5145_v37  ;;  %v580_v54 = vmul.f32 %v4978_v53, %v5118_v25  ;;  %v5159_v2 = vmul.f32 %v4984_v58, %v5035_v41  ;;  %v5163_v5 = vmul.f32 %v4990_v63, %v5037_v42  ;;  %v5165_v57 = vld [vmem:[#allocation2 + $0x24] sm:$0xff] }
 0x15a   : > { %6358 = vst [vmem:[#allocation33_spill] sm:$0xff] %v5143_v32  ;;  %6360 = vst [vmem:[#allocation35_spill] sm:$0xff] %v5147_v46  ;;  %v531_v7 = vadd.f32 %v523_v35, %v503_v27  ;;  %v560_v33 = vadd.f32 %v552_v44, %v532_v23  ;;  %v5169_v59 = vmul.f32 %v4998_v6, %v5047_v50  ;;  %v5181_v27 = vld [vmem:[#allocation2 + $0x54] sm:$0xff]  ;;  %v5187_v44 = vld [vmem:[#allocation2 + $0x42] sm:$0xff] }
 0x15b   : > { %6361 = vst [vmem:[#allocation36_spill] sm:$0xff] %v5150_v47  ;;  %6362 = vst [vmem:[#allocation37_spill] sm:$0xff] %v5153_v1  ;;  %v5173_v0 = vmul.f32 %v5006_v13, %v5099_v16  ;;  %v551_v60 = vmul.f32 %v4972_v48, %v5130_v36  ;;  %v506_v19 = vadd.f32 %v498_v29, %v470_v40  ;;  %v5179_v47 = vld [vmem:[#allocation2 + $0x53] sm:$0xff]  ;;  %v5223_v50 = vld [vmem:[#allocation2 + $0x43] sm:$0xff] }
 0x15c   : > { %6363 = vst [vmem:[#allocation38_spill] sm:$0xff] %v5163_v5  ;;  %6364 = vst [vmem:[#allocation39_spill] sm:$0xff] %v5165_v57  ;;  %v526_v1 = vmul.f32 %v4965_v43, %v5143_v32  ;;  %v469_v23 = vmul.f32 %v4957_v38, %v5145_v37  ;;  %v497_v35 = vmul.f32 %v4960_v39, %v5147_v46  ;;  %v5197_v31 = vld [vmem:[#allocation2 + $0x70] sm:$0xff] }
 0x15d   : > { %6365 = vst [vmem:[#allocation40_spill] sm:$0xff] %v5169_v59  ;;  %6366 = vst [vmem:[#allocation41_spill] sm:$0xff] %v5173_v0  ;;  %v5191_v0 = vmul.f32 %v5016_v24, %v5118_v25  ;;  %v579_v40 = vmul.f32 %v4978_v53, %v5165_v57  ;;  %v615_v29 = vadd.f32 %v607_v49, %v586_v56  ;;  %v5209_v25 = vld [vmem:[#allocation2 + $0x71] sm:$0xff] }
 0x15e   : > { %6367 = vst [vmem:[#allocation42_spill] sm:$0xff] %v5179_v47  ;;  %6368 = vst [vmem:[#allocation43_spill] sm:$0xff] %v5181_v27  ;;  %v635_v59 = vmul.f32 %v4990_v63, %v5055_v55  ;;  %v559_v10 = vadd.f32 %v551_v60, %v531_v7  ;;  %v663_v5 = vmul.f32 %v4998_v6, %v5081_v8  ;;  %v5211_v56 = vld [vmem:[#allocation2 + $0x72] sm:$0xff] }
 0x15f   : > { %6369 = vst [vmem:[#allocation44_spill] sm:$0xff] %v5191_v0  ;;  %6370 = vst [vmem:[#allocation45_spill] sm:$0xff] %v5197_v31  ;;  %v5203_v28 = vmul.f32 %v5006_v13, %v5130_v36  ;;  %v5207_v0 = vmul.f32 %v5016_v24, %v5165_v57  ;;  %v554_v49 = vmul.f32 %v4972_v48, %v5179_v47  ;;  %v5227_v42 = vld [vmem:[#allocation2 + $0x73] sm:$0xff] }
 0x160   : > { %6371 = vst [vmem:[#allocation46_spill] sm:$0xff] %v5209_v25  ;;  %6372 = vst [vmem:[#allocation47_spill] sm:$0xff] %v5211_v56  ;;  %v582_v7 = vmul.f32 %v4978_v53, %v5181_v27  ;;  %v505_v60 = vadd.f32 %v497_v35, %v469_v23  ;;  %v525_v30 = vmul.f32 %v4965_v43, %v5187_v44 }
 0x161   : > { %v588_v22 = vadd.f32 %v580_v54, %v560_v33  ;;  %v534_v16 = vadd.f32 %v526_v1, %v506_v19  ;;  %v5221_v21 = vmul.f32 %v4984_v58, %v5083_v9  ;;  %v472_v20 = vmul.f32 %v4957_v38, %v5197_v31  ;;  %6373 = vst [vmem:[#allocation48_spill] sm:$0xff] %v5227_v42  ;;  %v5237_v1 = vld [vmem:[#allocation2 + $0x60] sm:$0xff] }
 0x162   : > { %v643_v18 = vadd.f32 %v635_v59, %v615_v29  ;;  %v5231_v23 = vmul.f32 %v4990_v63, %v5085_v11  ;;  %v500_v33 = vmul.f32 %v4960_v39, %v5209_v25  ;;  %v528_v19 = vmul.f32 %v4965_v43, %v5211_v56  ;;  %v5251_v11 = vld [vmem:[#allocation2 + $0x62] sm:$0xff] }
 0x163   : > { %v587_v54 = vadd.f32 %v579_v40, %v559_v10  ;;  %v5241_v35 = vmul.f32 %v4998_v6, %v5143_v32  ;;  %v5245_v59 = vmul.f32 %v5006_v13, %v5179_v47  ;;  %v609_v29 = vmul.f32 %v4984_v58, %v5145_v37  ;;  %v5255_v10 = vld [vmem:[#allocation2 + $0x44] sm:$0xff]  ;;  %v5259_v32 = vld [vmem:[#allocation2 + $0x74] sm:$0xff] }
 0x164   : > { %6374 = vst [vmem:[#allocation49_spill] sm:$0xff] %v5231_v23  ;;  %v5249_v23 = vld [vmem:[#allocation2 + $0x61] sm:$0xff]  ;;  %v533_v9 = vadd.f32 %v525_v30, %v505_v60  ;;  %v553_v15 = vmul.f32 %v4972_v48, %v5223_v50  ;;  %v508_v40 = vadd.f32 %v500_v33, %v472_v20  ;;  %6377 = vst [vmem:[#allocation52_spill] sm:$0xff] %v5259_v32  ;;  %v5266_v37 = vmax.f32 %v5041_v45, 0.0 }
 0x165   : > { %6375 = vst [vmem:[#allocation50_spill] sm:$0xff] %v5241_v35  ;;  %6376 = vst [vmem:[#allocation51_spill] sm:$0xff] %v5245_v59  ;;  %v556_v35 = vmul.f32 %v4972_v48, %v5227_v42  ;;  %v562_v59 = vadd.f32 %v554_v49, %v534_v16  ;;  %v5263_v47 = vmul.f32 %v5016_v24, %v5181_v27 }
 0x166   : > { %6379 = vst [vmem:[#allocation54_spill] sm:$0xff] %v5266_v37  ;;  %v471_v30 = vmul.f32 %v4957_v38, %v5237_v1  ;;  %v5270_v60 = vadd.f32 %v663_v5, %v643_v18  ;;  %v536_v57 = vadd.f32 %v528_v19, %v508_v40  ;;  %v499_v20 = vmul.f32 %v4960_v39, %v5249_v23  ;;  %v5282_v38 = vld [vmem:[#allocation2 + $0x63] sm:$0xff] }
 0x167   : > { %6378 = vst [vmem:[#allocation53_spill] sm:$0xff] %v5263_v47  ;;  %v527_v33 = vmul.f32 %v4965_v43, %v5251_v11  ;;  %v581_v16 = vmul.f32 %v4978_v53, %v5255_v10  ;;  %v617_v49 = vadd.f32 %v609_v29, %v588_v22  ;;  %v637_v47 = vmul.f32 %v4990_v63, %v5147_v46  ;;  %v5289_v19 = vld [vmem:[#allocation2 + $0x80] sm:$0xff] }
 0x168   : > { %v584_v27 = vmul.f32 %v4978_v53, %v5259_v32  ;;  %1323 = vrot.lane.b32.xlu1 %v5266_v37, %s4641_s7  ;;  %v5287_v39 = vadd.f32 %v5159_v2, %v587_v54  ;;  %v561_v18 = vadd.f32 %v553_v15, %v533_v9  ;;  %v564_v43 = vadd.f32 %v556_v35, %v536_v57  ;;  %v5311_v35 = vld [vmem:[#allocation2 + $0x64] sm:$0xff] }
 0x169   : > { %v507_v5 = vadd.f32 %v499_v20, %v471_v30  ;;  %6380 = vst [vmem:[#allocation55_spill] sm:$0xff] %v5289_v19  ;;  %v590_v22 = vadd.f32 %v582_v7, %v562_v59  ;;  %v665_v29 = vmul.f32 %v4998_v6, %v5187_v44  ;;  %v611_v40 = vmul.f32 %v4984_v58, %v5237_v1  ;;  %v5323_v20 = vld [vmem:[#allocation2 + $0x81] sm:$0xff] }
 0x16a   : > { %v5296_v46 = vmax.f32 %v5053_v52, 0.0  ;;  %v5300_v37 = vmul.f32 %v5006_v13, %v5223_v50  ;;  %v555_v57 = vmul.f32 %v4972_v48, %v5282_v38  ;;  %v5305_v9 = vmax.f32 %v5089_v12, 0.0  ;;  %6383 = vst [vmem:[#allocation58_spill] sm:$0xff] %v5323_v20 }
 0x16b   : > { %v535_v2 = vadd.f32 %v527_v33, %v507_v5  ;;  %v645_v15 = vadd.f32 %v637_v47, %v617_v49  ;;  %v5309_v7 = vmul.f32 %v5016_v24, %v5255_v10  ;;  %v592_v54 = vadd.f32 %v584_v27, %v564_v43 }
 0x16c   : > { %6381 = vst [vmem:[#allocation56_spill] sm:$0xff] %v5305_v9  ;;  %1321 = vrot.lane.b32.xlu0 %v5296_v46, %s4641_s7  ;;  %v613_v59 = vmul.f32 %v4984_v58, %v5289_v19  ;;  %v589_v30 = vadd.f32 %v581_v16, %v561_v18  ;;  %v612_v48 = vmul.f32 %v4984_v58, %v5197_v31  ;;  %v6414_v19 = vld [vmem:[#allocation37_spill] sm:$0xff] }
 0x16d   : > { %v5321_v47 = vmul.f32 %v4990_v63, %v5209_v25  ;;  %1327 = vrot.lane.b32.xlu1 %v5305_v9, %s4641_s7  ;;  %v5329_v27 = vpack.i.bf16 %v5041_v45, %v5053_v52  ;;  %v619_v33 = vadd.f32 %v611_v40, %v590_v22  ;;  %v639_v16 = vmul.f32 %v4990_v63, %v5249_v23 }
 0x16e   : > { %v5335_v58 = vpack.i.bf16 %v5089_v12, %v5103_v17  ;;  %v746_v49 = vmul.f32 %v5065_v62, %v5049_v51  ;;  %v5341_v18 = vmul.f32 %v4998_v6, %v5211_v56  ;;  %v5345_v43 = vmul.f32 %v5006_v13, %v5227_v42 }
 0x16f   : > { %6382 = vst [vmem:[#allocation57_spill] sm:$0xff] %v5321_v47  ;;  %6384 = vst [vmem:[#allocation59_spill] sm:$0xff] %v5329_v27  ;;  %v563_v45 = vadd.f32 %v555_v57, %v535_v2  ;;  %v583_v52 = vmul.f32 %v4978_v53, %v5311_v35  ;;  %v621_v5 = vadd.f32 %v613_v59, %v592_v54  ;;  %v5367_v57 = vld [vmem:[#allocation2 + $0x82] sm:$0xff] }
 0x170   : > { %6385 = vst [vmem:[#allocation60_spill] sm:$0xff] %v5335_v58  ;;  %6386 = vst [vmem:[#allocation61_spill] sm:$0xff] %v5341_v18  ;;  %v641_v12 = vmul.f32 %v4990_v63, %v5323_v20  ;;  %4326 = vrot.lane.b32.xlu0 %v5019_v26, %s4642_s8  ;;  %v754_v51 = vadd.f32 %v746_v49, %v5061_v61  ;;  %v774_v22 = vmul.f32 %v5071_v3, %v5055_v55  ;;  %v5371_v54 = vld [vmem:[#allocation2 + $0x83] sm:$0xff]  ;;  %v6412_v20 = vld [vmem:[#allocation32_spill] sm:$0xff] }
 0x171   : > { %6387 = vst [vmem:[#allocation62_spill] sm:$0xff] %v5345_v43  ;;  %v5357_v40 = vadd.f32 %v5221_v21, %v589_v30  ;;  %v5359_v2 = vadd.f32 %v665_v29, %v645_v15  ;;  %v5363_v53 = vmul.f32 %v5016_v24, %v5259_v32  ;;  %v667_v63 = vmul.f32 %v4998_v6, %v5251_v11  ;;  %v5373_v55 = vld [vmem:[#allocation2 + $0x84] sm:$0xff] }
 0x172   : > { %6389 = vst [vmem:[#allocation64_spill] sm:$0xff] %v5367_v57  ;;  %4331 = vrot.lane.b32.xlu1 %v5030_v34, %s4642_s8  ;;  %v647_v61 = vadd.f32 %v639_v16, %v619_v33  ;;  %6390 = vst [vmem:[#allocation65_spill] sm:$0xff] %v5371_v54  ;;  %v5376_v21 = vmax.f32 %v5103_v17, 0.0  ;;  %v782_v29 = vadd.f32 %v774_v22, %v754_v51  ;;  %v6418_v26 = vld [vmem:[#allocation21_spill] sm:$0xff] }
 0x173   : > { %6388 = vst [vmem:[#allocation63_spill] sm:$0xff] %v5363_v53  ;;  %6391 = vst [vmem:[#allocation66_spill] sm:$0xff] %v5373_v55  ;;  %v802_v15 = vmul.f32 %v5075_v4, %v5081_v8  ;;  %v591_v59 = vadd.f32 %v583_v52, %v563_v45  ;;  %v5382_v30 = vmul.f32 %v5006_v13, %v5282_v38 }
 0x174   : > { %v5386_v49 = vmul.f32 %v5016_v24, %v5311_v35  ;;  %v699_v33 = vadd.f32 %v5203_v28, %v5270_v60  ;;  %v649_v16 = vadd.f32 %v641_v12, %v621_v5  ;;  %v669_v17 = vmul.f32 %v4998_v6, %v5367_v57  ;;  %1325 = vrot.lane.b32.xlu0 %v5376_v21, %s4641_s7  ;;  %v6395_v12 = vld [vmem:[#allocation23_spill] sm:$0xff] }
 0x175   : > { %v810_v8 = vadd.f32 %v802_v15, %v782_v29  ;;  %v830_v45 = vmul.f32 %v5093_v14, %v5130_v36  ;;  %v5398_v52 = vmul.f32 %v5006_v13, %v5371_v54  ;;  %v5402_v51 = vmul.f32 %v5016_v24, %v5373_v55  ;;  %v6394_v36 = vld [vmem:[#allocation39_spill] sm:$0xff]  ;;  %v6396_v13 = vld [vmem:[#allocation25_spill] sm:$0xff]  ;;  %v6398_v24 = vld [vmem:[#allocation18_spill] sm:$0xff] }
 0x176   : > { %4341 = vrot.lane.b32.xlu1 %v5335_v58, %s4642_s8  ;;  %v727_v6 = vadd.f32 %v5207_v0, %v699_v33  ;;  %v747_v28 = vmul.f32 %v5065_v62, %v5035_v41  ;;  %v5409_v60 = vadd.f32 %v667_v63, %v647_v61  ;;  %v858_v22 = vmul.f32 %v6395_v12, %v6394_v36  ;;  %v6399_v55 = vld [vmem:[#allocation26_spill] sm:$0xff]  ;;  %v6401_v61 = vld [vmem:[#allocation19_spill] sm:$0xff]  ;;  %v6403_v36 = vld [vmem:[#allocation24_spill] sm:$0xff] }
 0x177   : > { %6392 = vst [vmem:[#allocation67_spill] sm:$0xff] %v5398_v52  ;;  %6393 = vst [vmem:[#allocation68_spill] sm:$0xff] %v5402_v51  ;;  %v838_v5 = vadd.f32 %v830_v45, %v810_v8  ;;  %v887_v29 = vmul.f32 %v6396_v13, %v5035_v41  ;;  %v5415_v15 = vadd.f32 %v612_v48, %v591_v59  ;;  %v6402_v8 = vld [vmem:[#allocation27_spill] sm:$0xff]  ;;  %v6404_v41 = vld [vmem:[#allocation28_spill] sm:$0xff] }
 0x178   : > { %v915_v51 = vmul.f32 %v6399_v55, %v6398_v24  ;;  %v755_v58 = vadd.f32 %v747_v28, %v727_v6  ;;  %v775_v0 = vmul.f32 %v5071_v3, %v6398_v24  ;;  %v5421_v33 = vadd.f32 %v669_v17, %v649_v16  ;;  %4336 = vrot.lane.b32.xlu0 %v5329_v27, %s4642_s8  ;;  %v6405_v59 = vld [vmem:[#allocation15_spill] sm:$0xff]  ;;  %v5431_v6 = vld [vmem:[#allocation8 + $0x18] ss:$0 sm:$0xff]  ;;  %v6406_v28 = vld [vmem:[#allocation29_spill] sm:$0xff] }
 0x179   : > { %6397 = vst [vmem:[#allocation39_spill] sm:$0xff] %v5415_v15  ;;  %v866_v63 = vadd.f32 %v858_v22, %v838_v5  ;;  %v943_v45 = vmul.f32 %v6402_v8, %v6401_v61  ;;  %v971_v48 = vmul.f32 %v6404_v41, %v6403_v36  ;;  %v6407_v24 = vld [vmem:[#allocation30_spill] sm:$0xff]  ;;  %v803_v27 = vmul.f32 %v5075_v4, %v6401_v61  ;;  %v6411_v57 = vld [vmem:[#allocation35_spill] sm:$0xff]  ;;  %v6415_v61 = vld [vmem:[#allocation40_spill] sm:$0xff] }
 0x17a   : > { %6400 = vst [vmem:[#allocation23_spill] sm:$0xff] %v5421_v33  ;;  %1826 = vrot.lane.b32.xlu1 %v6405_v59, %s4643_s24  ;;  %v999_v16 = vmul.f32 %v6407_v24, %v6406_v28  ;;  %v783_v17 = vadd.f32 %v775_v0, %v755_v58  ;;  %v6408_v5 = vld [vmem:[#allocation38_spill] sm:$0xff]  ;;  %v6410_v33 = vld [vmem:[#allocation31_spill] sm:$0xff]  ;;  %v1056_v43 = vmul.f32 %v6412_v20, %v6411_v57  ;;  %v6413_v59 = vld [vmem:[#allocation36_spill] sm:$0xff] }
 0x17b   : > { %v644_v22 = vadd.f32 %v6408_v5, %v5287_v39  ;;  %v895_v54 = vadd.f32 %v887_v29, %v866_v63  ;;  %v6409_v52 = vld [vmem:[#allocation34_spill] sm:$0xff]  ;;  %v1084_v34 = vmul.f32 %v6413_v59, %v5187_v44  ;;  %v5447_v18 = vmul.f32 %v6414_v19, %v5223_v50  ;;  %v6416_v15 = vld [vmem:[#allocation13_spill] sm:$0xff] }
 0x17c   : > { %v1028_v53 = vmul.f32 %v6410_v33, %v6409_v52  ;;  %v811_v58 = vadd.f32 %v803_v27, %v783_v17  ;;  %v831_v0 = vmul.f32 %v5093_v14, %v6403_v36  ;;  %v5454_v63 = vmul.f32 %v5431_v6, %v5255_v10 }
 0x17d   : > { %v672_v39 = vadd.f32 %v6415_v61, %v644_v22  ;;  %v923_v29 = vadd.f32 %v915_v51, %v895_v54  ;;  %v859_v5 = vmul.f32 %v6395_v12, %v6406_v28  ;;  %v888_v47 = vmul.f32 %v6396_v13, %v6409_v52  ;;  %v6417_v51 = vld [vmem:[#allocation41_spill] sm:$0xff] }
 0x17e   : > { %1828 = vrot.lane.b32.xlu1 %v6416_v15, %s4643_s24  ;;  %v839_v27 = vadd.f32 %v831_v0, %v811_v58  ;;  %v916_v36 = vmul.f32 %v6399_v55, %v6411_v57  ;;  %v944_v54 = vmul.f32 %v6402_v8, %v5187_v44  ;;  %v972_v61 = vmul.f32 %v6404_v41, %v5223_v50  ;;  %v6419_v58 = vld [vmem:[#allocation44_spill] sm:$0xff] }
 0x17f   : > { %v700_v17 = vadd.f32 %v6417_v51, %v672_v39  ;;  %v951_v22 = vadd.f32 %v943_v45, %v923_v29  ;;  %v1000_v28 = vmul.f32 %v6407_v24, %v5255_v10  ;;  %v1029_v32 = vmul.f32 %v6410_v33, %v6418_v26  ;;  %v6420_v45 = vld [vmem:[#allocation22_spill] sm:$0xff]  ;;  %v6421_v51 = vld [vmem:[#allocation33_spill] sm:$0xff] }
 0x180   : > { %v867_v15 = vadd.f32 %v859_v5, %v839_v27  ;;  %v748_v42 = vmul.f32 %v5065_v62, %v6409_v52  ;;  %v701_v56 = vadd.f32 %v5300_v37, %v5359_v2  ;;  %v1057_v29 = vmul.f32 %v6412_v20, %v6420_v45  ;;  %v6422_v5 = vld [vmem:[#allocation16_spill] sm:$0xff] }
 0x181   : > { %v728_v0 = vadd.f32 %v6419_v58, %v700_v17  ;;  %v979_v39 = vadd.f32 %v971_v48, %v951_v22  ;;  %v5482_v9 = vmul.f32 %v6413_v59, %v6421_v51  ;;  %v776_v25 = vmul.f32 %v5071_v3, %v6411_v57  ;;  %v6423_v48 = vld [vmem:[#allocation42_spill] sm:$0xff]  ;;  %v6424_v58 = vld [vmem:[#allocation43_spill] sm:$0xff] }
 0x182   : > { %1830 = vrot.lane.b32.xlu1 %v6422_v5, %s4643_s24  ;;  %v896_v27 = vadd.f32 %v888_v47, %v867_v15  ;;  %v729_v52 = vadd.f32 %v5309_v7, %v701_v56  ;;  %v749_v37 = vmul.f32 %v5065_v62, %v6418_v26  ;;  %v5493_v22 = vmul.f32 %v6414_v19, %v6423_v48 }
 0x183   : > { %v756_v17 = vadd.f32 %v748_v42, %v728_v0  ;;  %v1007_v2 = vadd.f32 %v999_v16, %v979_v39  ;;  %v5497_v31 = vmul.f32 %v5431_v6, %v6424_v58  ;;  %v804_v57 = vmul.f32 %v5075_v4, %v5187_v44  ;;  %v6425_v39 = vld [vmem:[#allocation20_spill] sm:$0xff] }
 0x184   : > { %v924_v5 = vadd.f32 %v916_v36, %v896_v27  ;;  %v757_v42 = vadd.f32 %v749_v37, %v729_v52  ;;  %v777_v56 = vmul.f32 %v5071_v3, %v6420_v45  ;;  %v832_v15 = vmul.f32 %v5093_v14, %v5223_v50 }
 0x185   : > { %v784_v47 = vadd.f32 %v776_v25, %v756_v17  ;;  %v1036_v7 = vadd.f32 %v1028_v53, %v1007_v2  ;;  %v860_v16 = vmul.f32 %v6395_v12, %v5255_v10  ;;  %v889_v0 = vmul.f32 %v6396_v13, %v6418_v26  ;;  %v6426_v10 = vld [vmem:[#allocation49_spill] sm:$0xff] }
 0x186   : > { %1832 = vrot.lane.b32.xlu1 %v6425_v39, %s4643_s24  ;;  %v952_v44 = vadd.f32 %v944_v54, %v924_v5  ;;  %v785_v25 = vadd.f32 %v777_v56, %v757_v42  ;;  %v805_v27 = vmul.f32 %v5075_v4, %v6421_v51  ;;  %v917_v53 = vmul.f32 %v6399_v55, %v6420_v45  ;;  %v6427_v45 = vld [vmem:[#allocation50_spill] sm:$0xff] }
 0x187   : > { %v812_v36 = vadd.f32 %v804_v57, %v784_v47  ;;  %v1064_v17 = vadd.f32 %v1056_v43, %v1036_v7  ;;  %v945_v50 = vmul.f32 %v6402_v8, %v6421_v51  ;;  %v646_v52 = vadd.f32 %v6426_v10, %v5357_v40  ;;  %v6428_v7 = vld [vmem:[#allocation51_spill] sm:$0xff] }
 0x188   : > { %v980_v26 = vadd.f32 %v972_v61, %v952_v44  ;;  %v813_v2 = vadd.f32 %v805_v27, %v785_v25  ;;  %v833_v54 = vmul.f32 %v5093_v14, %v6423_v48  ;;  %v973_v57 = vmul.f32 %v6404_v41, %v6423_v48 }
 0x189   : > { %v840_v37 = vadd.f32 %v832_v15, %v812_v36  ;;  %v1092_v5 = vadd.f32 %v1084_v34, %v1064_v17  ;;  %v1001_v43 = vmul.f32 %v6407_v24, %v6424_v58  ;;  %v674_v47 = vadd.f32 %v6427_v45, %v646_v52  ;;  %v6430_v52 = vld [vmem:[#allocation54_spill] sm:$0xff] }
 0x18a   : > { %1834 = vrot.lane.b32.xlu1 %v5296_v46, %s4643_s24  ;;  %v1008_v51 = vadd.f32 %v1000_v28, %v980_v26  ;;  %v841_v61 = vadd.f32 %v833_v54, %v813_v2  ;;  %v861_v42 = vmul.f32 %v6395_v12, %v6424_v58  ;;  %v1030_v34 = vmul.f32 %v6410_v33, %v5237_v1 }
 0x18b   : > { %v868_v40 = vadd.f32 %v860_v16, %v840_v37  ;;  %v1120_v56 = vadd.f32 %v5447_v18, %v1092_v5  ;;  %v1058_v48 = vmul.f32 %v6412_v20, %v5249_v23  ;;  %v702_v15 = vadd.f32 %v6428_v7, %v674_v47  ;;  %v6429_v18 = vld [vmem:[#allocation53_spill] sm:$0xff] }
 0x18c   : > { %v1037_v44 = vadd.f32 %v1029_v32, %v1008_v51  ;;  %v869_v25 = vadd.f32 %v861_v42, %v841_v61  ;;  %v890_v28 = vmul.f32 %v6396_v13, %v5237_v1  ;;  %v1086_v58 = vmul.f32 %v6413_v59, %v5251_v11 }
 0x18d   : > { %v897_v36 = vadd.f32 %v889_v0, %v868_v40  ;;  %v1148_v16 = vadd.f32 %v5454_v63, %v1120_v56  ;;  %v730_v27 = vadd.f32 %v6429_v18, %v702_v15  ;;  %v750_v17 = vmul.f32 %v5065_v62, %v5237_v1 }
 0x18e   : > { %v1065_v10 = vadd.f32 %v1057_v29, %v1037_v44  ;;  %1836 = vrot.lane.b32.xlu1 %v6430_v52, %s4643_s24  ;;  %v898_v0 = vadd.f32 %v890_v28, %v869_v25  ;;  %v918_v26 = vmul.f32 %v6399_v55, %v5249_v23  ;;  %v1114_v63 = vmul.f32 %v6414_v19, %v5282_v38  ;;  %v6432_v28 = vld [vmem:[#allocation46_spill] sm:$0xff] }
 0x18f   : > { %v925_v32 = vadd.f32 %v917_v53, %v897_v36  ;;  %3872 = vmatprep.mubr.msk.f32.mxu1 %vm414_vm1, %v1148_v16  ;;  %v5553_v37 = vmul.f32 %v5431_v6, %v5311_v35  ;;  %v758_v2 = vadd.f32 %v750_v17, %v730_v27  ;;  %v778_v1 = vmul.f32 %v5071_v3, %v5249_v23  ;;  %v6433_v16 = vld [vmem:[#allocation56_spill] sm:$0xff] }
 0x190   : > { %v1093_v29 = vadd.f32 %v5482_v9, %v1065_v10  ;;  %v926_v54 = vadd.f32 %v918_v26, %v898_v0  ;;  %v946_v5 = vmul.f32 %v6402_v8, %v5251_v11  ;;  %v974_v45 = vmul.f32 %v6404_v41, %v5282_v38  ;;  %v6435_v26 = vld [vmem:[#allocation48_spill] sm:$0xff] }
 0x191   : > { %v953_v53 = vadd.f32 %v945_v50, %v925_v32  ;;  %v786_v47 = vadd.f32 %v778_v1, %v758_v2  ;;  %v806_v51 = vmul.f32 %v5075_v4, %v5251_v11  ;;  %v703_v40 = vadd.f32 %v5382_v30, %v5409_v60  ;;  %v6431_v11 = vld [vmem:[#allocation45_spill] sm:$0xff] }
 0x192   : > { %v1121_v61 = vadd.f32 %v5493_v22, %v1093_v29  ;;  %1838 = vrot.lane.b32.xlu1 %v5376_v21, %s4643_s24  ;;  %v954_v9 = vadd.f32 %v946_v5, %v926_v54  ;;  %v1002_v50 = vmul.f32 %v6407_v24, %v5311_v35  ;;  %v834_v56 = vmul.f32 %v5093_v14, %v5282_v38 }
 0x193   : > { %v981_v23 = vadd.f32 %v973_v57, %v953_v53  ;;  %v814_v42 = vadd.f32 %v806_v51, %v786_v47  ;;  %v731_v7 = vadd.f32 %v5386_v49, %v703_v40  ;;  %v751_v15 = vmul.f32 %v5065_v62, %v6431_v11  ;;  %v6436_v47 = vld [vmem:[#allocation52_spill] sm:$0xff]  ;;  %v6437_v51 = vld [vmem:[#allocation14_spill] sm:$0xff]  ;;  %v6438_v40 = vld [vmem:[#allocation39_spill] sm:$0xff] }
 0x194   : > { %v1149_v30 = vadd.f32 %v5497_v31, %v1121_v61  ;;  %v982_v22 = vadd.f32 %v974_v45, %v954_v9  ;;  %v1031_v57 = vmul.f32 %v6410_v33, %v6431_v11  ;;  %v862_v36 = vmul.f32 %v6395_v12, %v5311_v35  ;;  %v6434_v35 = vld [vmem:[#allocation47_spill] sm:$0xff]  ;;  %v6439_v61 = vld [vmem:[#allocation57_spill] sm:$0xff] }
 0x195   : > { %v1009_v60 = vadd.f32 %v1001_v43, %v981_v23  ;;  %v842_v44 = vadd.f32 %v834_v56, %v814_v42  ;;  %v759_v25 = vadd.f32 %v751_v15, %v731_v7  ;;  %v779_v38 = vmul.f32 %v5071_v3, %v6432_v28  ;;  %v6440_v15 = vld [vmem:[#allocation61_spill] sm:$0xff] }
 0x196   : > { %3873 = vmatmul.mubr.msk.f32.vlgmr.msra.gmra.mrb[0].mxu1 %vm414_vm1, %v1149_v30  ;;  %1840 = vrot.lane.b32.xlu1 %v6433_v16, %s4643_s24  ;;  %v1010_v31 = vadd.f32 %v1002_v50, %v982_v22  ;;  %v1059_v43 = vmul.f32 %v6412_v20, %v6432_v28  ;;  %v891_v27 = vmul.f32 %v6396_v13, %v6431_v11 }
 0x197   : > { %v1038_v49 = vadd.f32 %v1030_v34, %v1009_v60  ;;  %v870_v18 = vadd.f32 %v862_v36, %v842_v44  ;;  %v787_v17 = vadd.f32 %v779_v38, %v759_v25  ;;  %v807_v10 = vmul.f32 %v5075_v4, %v6434_v35  ;;  %v6441_v44 = vld [vmem:[#allocation55_spill] sm:$0xff] }
 0x198   : > { %v1039_v0 = vadd.f32 %v1031_v57, %v1010_v31  ;;  %v1087_v34 = vmul.f32 %v6413_v59, %v6434_v35  ;;  %v1115_v2 = vmul.f32 %v6414_v19, %v6435_v26  ;;  %v919_v29 = vmul.f32 %v6399_v55, %v6432_v28  ;;  %v741_v25 = vld [vmem:[#allocation2 + $0x90] sm:$0xff] }
 0x199   : > { %v1066_v32 = vadd.f32 %v1058_v48, %v1038_v49  ;;  %v899_v1 = vadd.f32 %v891_v27, %v870_v18  ;;  %v815_v53 = vadd.f32 %v807_v10, %v787_v17  ;;  %v835_v54 = vmul.f32 %v5093_v14, %v6435_v26  ;;  %v6443_v49 = vld [vmem:[#allocation62_spill] sm:$0xff] }
 0x19a   : > { %v1067_v45 = vadd.f32 %v1059_v43, %v1039_v0  ;;  %v1143_v48 = vmul.f32 %v5431_v6, %v6436_v47  ;;  %4346 = vrot.lane.b32.xlu1 %v6437_v51, %s4644_s26  ;;  %v648_v23 = vadd.f32 %v6439_v61, %v6438_v40  ;;  %v947_v50 = vmul.f32 %v6402_v8, %v6434_v35  ;;  %v6444_v35 = vld [vmem:[#allocation58_spill] sm:$0xff]  ;;  %v6445_v0 = vld [vmem:[#allocation64_spill] sm:$0xff]  ;;  %v6449_v51 = vld [vmem:[#allocation65_spill] sm:$0xff] }
 0x19b   : > { %v1094_v5 = vadd.f32 %v1086_v58, %v1066_v32  ;;  %v927_v9 = vadd.f32 %v919_v29, %v899_v1  ;;  %v843_v42 = vadd.f32 %v835_v54, %v815_v53  ;;  %v863_v56 = vmul.f32 %v6395_v12, %v6436_v47  ;;  %v6447_v54 = vld [vmem:[#allocation23_spill] sm:$0xff] }
 0x19c   : > { %v1095_v7 = vadd.f32 %v1087_v34, %v1067_v45  ;;  %v975_v11 = vmul.f32 %v6404_v41, %v6435_v26  ;;  %v676_v30 = vadd.f32 %v6440_v15, %v648_v23  ;;  %v1003_v22 = vmul.f32 %v6407_v24, %v6436_v47  ;;  %v1049_v26 = vld [vmem:[#allocation2 + $0x91] sm:$0xff] }
 0x19d   : > { %v1122_v58 = vadd.f32 %v1114_v63, %v1094_v5  ;;  %v955_v60 = vadd.f32 %v947_v50, %v927_v9  ;;  %v871_v57 = vadd.f32 %v863_v56, %v843_v42  ;;  %v892_v36 = vmul.f32 %v6396_v13, %v6441_v44  ;;  %v6442_v63 = vld [vmem:[#allocation17_spill] sm:$0xff]  ;;  %v6448_v5 = vld [vmem:[#allocation67_spill] sm:$0xff]  ;;  %v6450_v42 = vld [vmem:[#allocation68_spill] sm:$0xff] }
 0x19e   : > { %v1123_v38 = vadd.f32 %v1115_v2, %v1095_v7  ;;  %4351 = vrot.lane.b32.xlu1 %v6442_v63, %s4644_s26  ;;  %v704_v31 = vadd.f32 %v6443_v49, %v676_v30  ;;  %v752_v43 = vmul.f32 %v5065_v62, %v6441_v44  ;;  %v1032_v27 = vmul.f32 %v6410_v33, %v6441_v44  ;;  %v6446_v2 = vld [vmem:[#allocation63_spill] sm:$0xff] }
 0x19f   : > { %v1150_v28 = vadd.f32 %v5553_v37, %v1122_v58  ;;  %v983_v18 = vadd.f32 %v975_v11, %v955_v60  ;;  %v900_v17 = vadd.f32 %v892_v36, %v871_v57  ;;  %v920_v10 = vmul.f32 %v6399_v55, %v6444_v35  ;;  %v1077_v7 = vld [vmem:[#allocation2 + $0x92] sm:$0xff]  ;;  %v6451_v60 = vld [vmem:[#allocation66_spill] sm:$0xff] }
 0x1a0   : > { %v1151_v37 = vadd.f32 %v1143_v48, %v1123_v38  ;;  %v1060_v32 = vmul.f32 %v6412_v20, %v6444_v35  ;;  %v948_v34 = vmul.f32 %v6402_v8, %v6445_v0  ;;  %v732_v1 = vadd.f32 %v6446_v2, %v704_v31  ;;  %v6452_v63 = vld [vmem:[#allocation59_spill] sm:$0xff] }
 0x1a1   : > { %3875 = vmatprep.mubr.msk.f32.mxu1 %vm414_vm1, %v1150_v28  ;;  %v1011_v29 = vadd.f32 %v1003_v22, %v983_v18  ;;  %v928_v53 = vadd.f32 %v920_v10, %v900_v17  ;;  %v705_v45 = vadd.f32 %v6448_v5, %v6447_v54  ;;  %v753_v47 = vmul.f32 %v5065_v62, %v741_v25  ;;  %v1105_v28 = vld [vmem:[#allocation2 + $0x93] sm:$0xff]  ;;  %v1050_v54 = vld [vmem:[#allocation2 + $0xa1] sm:$0xff] }
 0x1a2   : > { %3876 = vmatmul.mubr.msk.f32.gmra.mrb[2].mxu1 %vm414_vm1, %v1151_v37  ;;  %v1088_v48 = vmul.f32 %v6413_v59, %v6445_v0  ;;  %v976_v40 = vmul.f32 %v6404_v41, %v6449_v51  ;;  %v760_v61 = vadd.f32 %v752_v43, %v732_v1  ;;  %v780_v23 = vmul.f32 %v5071_v3, %v6444_v35  ;;  %v1022_v43 = vld [vmem:[#allocation2 + $0xa0] sm:$0xff]  ;;  %v1133_v10 = vld [vmem:[#allocation2 + $0x94] sm:$0xff] }
 0x1a3   : > { %v1040_v9 = vadd.f32 %v1032_v27, %v1011_v29  ;;  %v956_v50 = vadd.f32 %v948_v34, %v928_v53  ;;  %v733_v56 = vadd.f32 %v6450_v42, %v705_v45  ;;  %v781_v58 = vmul.f32 %v1049_v26, %v5071_v3  ;;  %4356 = vrot.lane.b32.xlu1 %v6452_v63, %s4644_s26  ;;  %v6453_v45 = vld [vmem:[#allocation60_spill] sm:$0xff] }
 0x1a4   : > { %v788_v62 = vadd.f32 %v780_v23, %v760_v61  ;;  %v808_v11 = vmul.f32 %v5075_v4, %v6445_v0  ;;  %v1004_v22 = vmul.f32 %v6407_v24, %v6451_v60  ;;  %v1116_v44 = vmul.f32 %v6414_v19, %v6449_v51 }
 0x1a5   : > { %v1068_v15 = vadd.f32 %v1060_v32, %v1040_v9  ;;  %v984_v30 = vadd.f32 %v976_v40, %v956_v50  ;;  %v761_v57 = vadd.f32 %v753_v47, %v733_v56  ;;  %v1033_v36 = vmul.f32 %v6410_v33, %v741_v25 }
 0x1a6   : > { %v816_v38 = vadd.f32 %v808_v11, %v788_v62  ;;  %v836_v3 = vmul.f32 %v5093_v14, %v6449_v51  ;;  %v809_v27 = vmul.f32 %v1077_v7, %v5075_v4  ;;  %v1144_v17 = vmul.f32 %v5431_v6, %v6451_v60 }
 0x1a7   : > { %v1096_v49 = vadd.f32 %v1088_v48, %v1068_v15  ;;  %v1012_v31 = vadd.f32 %v1004_v22, %v984_v30  ;;  %v789_v18 = vadd.f32 %v781_v58, %v761_v57  ;;  %v1061_v35 = vmul.f32 %v6412_v20, %v1049_v26  ;;  %4361 = vrot.lane.b32.xlu1 %v6453_v45, %s4644_s26  ;;  %v1106_v58 = vld [vmem:[#allocation2 + $0xa3] sm:$0xff] }
 0x1a8   : > { %v844_v37 = vadd.f32 %v836_v3, %v816_v38  ;;  %v864_v32 = vmul.f32 %v6395_v12, %v6451_v60  ;;  %v837_v1 = vmul.f32 %v1105_v28, %v5093_v14  ;;  %v1089_v29 = vmul.f32 %v6413_v59, %v1077_v7  ;;  %v1078_v14 = vld [vmem:[#allocation2 + $0xa2] sm:$0xff]  ;;  %v1023_v38 = vld [vmem:[#allocation2 + $0xb0] sm:$0xff] }
 0x1a9   : > { %v1124_v0 = vadd.f32 %v1116_v44, %v1096_v49  ;;  %v1041_v34 = vadd.f32 %v1033_v36, %v1012_v31  ;;  %v817_v2 = vadd.f32 %v809_v27, %v789_v18  ;;  %v893_v4 = vmul.f32 %v6396_v13, %v741_v25  ;;  %v1134_v60 = vld [vmem:[#allocation2 + $0xa4] sm:$0xff] }
 0x1aa   : > { %v872_v53 = vadd.f32 %v864_v32, %v844_v37  ;;  %v894_v5 = vmul.f32 %v1022_v43, %v6396_v13  ;;  %v865_v40 = vmul.f32 %v1133_v10, %v6395_v12  ;;  %v921_v23 = vmul.f32 %v1049_v26, %v6399_v55  ;;  %v1107_v32 = vld [vmem:[#allocation2 + $0xb3] sm:$0xff] }
 0x1ab   : > { %v1152_v47 = vadd.f32 %v1144_v17, %v1124_v0  ;;  %v1069_v48 = vadd.f32 %v1061_v35, %v1041_v34  ;;  %v845_v51 = vadd.f32 %v837_v1, %v817_v2  ;;  %v1117_v25 = vmul.f32 %v6414_v19, %v1105_v28  ;;  %v1079_v17 = vld [vmem:[#allocation2 + $0xb2] sm:$0xff] }
 0x1ac   : > { %v901_v61 = vadd.f32 %v893_v4, %v872_v53  ;;  %v922_v13 = vmul.f32 %v1050_v54, %v6399_v55  ;;  %v949_v56 = vmul.f32 %v1077_v7, %v6402_v8  ;;  %v1145_v11 = vmul.f32 %v5431_v6, %v1133_v10  ;;  %v1135_v1 = vld [vmem:[#allocation2 + $0xb4] sm:$0xff] }
 0x1ad   : > { %3878 = vmatprep.mubr.msk.f32.mxu1 %vm414_vm1, %v1152_v47  ;;  %v1097_v9 = vadd.f32 %v1089_v29, %v1069_v48  ;;  %v873_v50 = vadd.f32 %v865_v40, %v845_v51  ;;  %v950_v15 = vmul.f32 %v1078_v14, %v6402_v8  ;;  %v977_v30 = vmul.f32 %v1105_v28, %v6404_v41  ;;  %v1051_v28 = vld [vmem:[#allocation2 + $0xb1] sm:$0xff] }
 0x1ae   : > { %v929_v42 = vadd.f32 %v921_v23, %v901_v61  ;;  %v978_v44 = vmul.f32 %v1106_v58, %v6404_v41  ;;  %v1005_v55 = vmul.f32 %v1133_v10, %v6407_v24  ;;  %v1034_v7 = vmul.f32 %v6410_v33, %v1022_v43 }
 0x1af   : > { %v1125_v62 = vadd.f32 %v1117_v25, %v1097_v9  ;;  %v902_v12 = vadd.f32 %v894_v5, %v873_v50  ;;  %v1006_v63 = vmul.f32 %v1134_v60, %v6407_v24  ;;  %v1062_v49 = vmul.f32 %v6412_v20, %v1050_v54 }
 0x1b0   : > { %v957_v26 = vadd.f32 %v949_v56, %v929_v42  ;;  %v1035_v18 = vmul.f32 %v6410_v33, %v1023_v38  ;;  %v1090_v41 = vmul.f32 %v6413_v59, %v1078_v14  ;;  %v1063_v43 = vmul.f32 %v6412_v20, %v1051_v28 }
 0x1b1   : > { %v1153_v22 = vadd.f32 %v1145_v11, %v1125_v62  ;;  %v930_v57 = vadd.f32 %v922_v13, %v902_v12  ;;  %v1118_v37 = vmul.f32 %v6414_v19, %v1106_v58  ;;  %v1091_v24 = vmul.f32 %v6413_v59, %v1079_v17 }
 0x1b2   : > { %v985_v36 = vadd.f32 %v977_v30, %v957_v26  ;;  %v1146_v2 = vmul.f32 %v5431_v6, %v1134_v60  ;;  %v1119_v33 = vmul.f32 %v6414_v19, %v1107_v32  ;;  %v1147_v54 = vmul.f32 %v5431_v6, %v1135_v1 }
 0x1b3   : > { %3879 = vmatmul.mubr.msk.f32.gmra.mrb[4].mxu1 %vm414_vm1, %v1153_v22  ;;  %v958_v3 = vadd.f32 %v950_v15, %v930_v57 }
 0x1b4   : > { %v1013_v8 = vadd.f32 %v1005_v55, %v985_v36 }
 0x1b5   : > { %v986_v31 = vadd.f32 %v978_v44, %v958_v3 }
 0x1b6   : > { %v1042_v27 = vadd.f32 %v1034_v7, %v1013_v8 }
 0x1b7   : > { %v1014_v35 = vadd.f32 %v1006_v63, %v986_v31 }
 0x1b8   : > { %v1070_v10 = vadd.f32 %v1062_v49, %v1042_v27  ;;  %v6454_v49 = vld [vmem:[#allocation15_spill] sm:$0xff] }
 0x1b9   : > { %v1043_v0 = vadd.f32 %v1035_v18, %v1014_v35 }
 0x1ba   : > { %v1098_v34 = vadd.f32 %v1090_v41, %v1070_v10 }
 0x1bb   : > { %v1071_v29 = vadd.f32 %v1063_v43, %v1043_v0 }
 0x1bc   : > { %v1126_v53 = vadd.f32 %v1118_v37, %v1098_v34 }
 0x1bd   : > { %v1099_v4 = vadd.f32 %v1091_v24, %v1071_v29 }
 0x1be   : > { %v1154_v5 = vadd.f32 %v1146_v2, %v1126_v53 }
 0x1bf   : > { %v1127_v20 = vadd.f32 %v1119_v33, %v1099_v4  ;;  %v1316_v47 = vpop.permute.xlu0 %1315 }
 0x1c0   : > { %3881 = vmatprep.mubr.msk.f32.mxu1 %vm414_vm1, %v1154_v5  ;;  %v6456_v5 = vld [vmem:[#allocation16_spill] sm:$0xff] }
 0x1c1   : > { %v1155_v45 = vadd.f32 %v1147_v54, %v1127_v20  ;;  %v6455_v54 = vld [vmem:[#allocation13_spill] sm:$0xff] }
 0x1c3   : > { %3882 = vmatmul.mubr.msk.f32.gmra.mrb[6].mxu1 %vm414_vm1, %v1155_v45  ;;  %v1314_v59 = vpop.permute.xlu0 %1313 }
 0x1c4   : > { %1337 = vxpose.xlu0.b32.start [1/8] (short) (narrow) %v1314_v59, 16  ;;  %v1318_v48 = vpop.permute.xlu1 %1317 }
 0x1c8   : > { %1338 = vxpose.xlu0.b32.cont [2/8] (short) (narrow) %v1316_v47, 16  ;;  %v1320_v51 = vpop.permute.xlu1 %1319 }
 0x1cc   : > { %1339 = vxpose.xlu0.b32.cont [3/8] (short) (narrow) %v1318_v48, 16 }
 0x1d0   : > { %1340 = vxpose.xlu0.b32.cont [4/8] (short) (narrow) %v1320_v51, 16 }
 0x1da   : > { %v1324_v19 = vpop.permute.xlu1 %1323 }
 0x1de   : > { %v1322_v40 = vpop.permute.xlu0 %1321 }
 0x1df   : > { %v1328_v61 = vpop.permute.xlu1 %1327  ;;  %1341 = vxpose.xlu0.b32.cont [5/8] (short) (narrow) %v1322_v40, 16 }
 0x1e2   : > { %v4327_v6 = vpop.permute.xlu0 %4326 }
 0x1e3   : > { %v4329_v23 = vunpack.i.h.bf16 %v4327_v6  ;;  %v4328_v14 = vunpack.i.l.bf16 %v4327_v6  ;;  %1342 = vxpose.xlu0.b32.cont [6/8] (short) (narrow) %v1324_v19, 16 }
 0x1e4   : > { %v4332_v9 = vpop.permute.xlu1 %4331 }
 0x1e5   : > { %v4334_v25 = vunpack.i.h.bf16 %v4332_v9  ;;  %v4333_v50 = vunpack.i.l.bf16 %v4332_v9  ;;  %v4120_v13 = vpack.c.bf16 %v4329_v23, %v4328_v14 }
 0x1e6   : > { %v1326_v42 = vpop.permute.xlu0 %1325 }
 0x1e7   : > { %v4124_v56 = vpack.c.bf16 %v4334_v25, %v4333_v50  ;;  %4121 = vmatprep.subr.bf16.mxu0 %v4120_v13  ;;  %1343 = vxpose.xlu0.b32.cont [7/8] (short) (narrow) %v1326_v42, 16 }
 0x1e8   : > { %v4342_v58 = vpop.permute.xlu1 %4341  ;;  %4123 = vmatpush3.bf16.msra.mxu0 %v4120_v13 }
 0x1e9   : > { %v4344_v62 = vunpack.i.h.bf16 %v4342_v58  ;;  %v4343_v11 = vunpack.i.l.bf16 %v4342_v58  ;;  %4125 = vmatprep.subr.bf16.mxu0 %v4124_v56 }
 0x1ea   : > { %v4337_v12 = vpop.permute.xlu0 %4336 }
 0x1eb   : > { %v4339_v15 = vunpack.i.h.bf16 %v4337_v12  ;;  %v4338_v26 = vunpack.i.l.bf16 %v4337_v12  ;;  %1344 = vxpose.xlu0.b32.end [8/8] (short) (narrow) %v1328_v61, 16  ;;  %v4132_v22 = vpack.c.bf16 %v4344_v62, %v4343_v11  ;;  %v2125_v62 = vsel %vm2124_vm5, %v6454_v49, 0.0 }
 0x1ec   : > { %v1827_v30 = vpop.permute.xlu1 %1826  ;;  %4127 = vmatpush3.bf16.msra.mxu0 %v4124_v56  ;;  %v2126_v11 = vsel %vm2124_vm5, %v6455_v54, 0.0 }
 0x1ed   : > { %1850 = vxpose.xlu1.b32.start [1/8] (short) (narrow) %v1827_v30, 16  ;;  %v4128_v60 = vpack.c.bf16 %v4339_v15, %v4338_v26  ;;  %v2128_v15 = vsel %vm2124_vm5, %v6456_v5, 0.0  ;;  %v2127_v26 = vadd.f32 %v2126_v11, %v2125_v62  ;;  %v2136_v62 = vsel %vm2124_vm5, %v5376_v21, 0.0 }
 0x1ef   : > { %4129 = vmatprep.subr.bf16.mxu0 %v4128_v60 }
 0x1f0   : > { %v1829_v57 = vpop.permute.xlu1 %1828  ;;  %4131 = vmatpush3.bf16.msra.mxu0 %v4128_v60 }
 0x1f1   : > { %1851 = vxpose.xlu1.b32.cont [2/8] (short) (narrow) %v1829_v57, 16  ;;  %4133 = vmatprep.subr.bf16.mxu0 %v4132_v22 }
 0x1f4   : > { %v1831_v44 = vpop.permute.xlu1 %1830  ;;  %4135 = vmatpush3.bf16.msra.mxu0 %v4132_v22 }
 0x1f5   : > { %1852 = vxpose.xlu1.b32.cont [3/8] (short) (narrow) %v1831_v44, 16 }
 0x1f8   : > { %v1833_v36 = vpop.permute.xlu1 %1832 }
 0x1f9   : > { %1853 = vxpose.xlu1.b32.cont [4/8] (short) (narrow) %v1833_v36, 16 }
 0x1fc   : > { %v1835_v55 = vpop.permute.xlu1 %1834 }
 0x1fd   : > { %1854 = vxpose.xlu1.b32.cont [5/8] (short) (narrow) %v1835_v55, 16  ;;  %v2129_v55 = vadd.f32 %v2128_v15, %v2127_v26 }
 0x200   : > { %v1837_v7 = vpop.permute.xlu1 %1836 }
 0x201   : > { %1855 = vxpose.xlu1.b32.cont [6/8] (short) (narrow) %v1837_v7, 16 }
 0x204   : > { %v1839_v38 = vpop.permute.xlu1 %1838 }
 0x205   : > { %1856 = vxpose.xlu1.b32.cont [7/8] (short) (narrow) %v1839_v38, 16  ;;  %v2130_v38 = vsel %vm2124_vm5, %v6425_v39, 0.0 }
 0x208   : > { %v1841_v3 = vpop.permute.xlu1 %1840 }
 0x209   : > { %1857 = vxpose.xlu1.b32.end [8/8] (short) (narrow) %v1841_v3, 16 }
 0x20c   : > { %v4347_v47 = vpop.permute.xlu1 %4346 }
 0x20d   : > { %v4349_v22 = vunpack.i.h.bf16 %v4347_v47  ;;  %v4348_v57 = vunpack.i.l.bf16 %v4347_v47 }
 0x210   : > { %v5769_v51 = vpop.permute.xlu1 %4351 }
 0x215   : > { %v5771_v19 = vpop.permute.xlu1 %4356 }
 0x219   : > { %v5773_v61 = vpop.permute.xlu1 %4361 }
 0x21a   : > { %v4364_v15 = vunpack.i.h.bf16 %v5773_v61  ;;  %v4363_v26 = vunpack.i.l.bf16 %v5773_v61 }
 0x21c   : > { %v4156_v61 = vpack.c.bf16 %v4364_v15, %v4363_v26 }
 0x24f   : > { %v1353_v63 = vpop.trf.xlu0 }
 0x250   : > { %3900 = vmatprep.mubr.msk.f32.mxu0 %vm1401_vm3, %v1353_v63 }
 0x253   : > { %v1354_v8 = vpop.trf.xlu0 }
 0x254   : > { %3901 = vmatmul.mubr.msk.f32.vlgmr.msra.gmra.mrb[8].mxu0 %vm1401_vm3, %v1354_v8 }
 0x255   : > { %3907 = vmatprep.mubr.msk.f32.mxu0 %vm1483_vm4, %v6454_v49 }
 0x269   : > { %v3874_v28 = vpop.f32.mrb[0].mxu1 }
 0x26a   : > { %v5697_v31 = vmax.f32 %v3874_v28, 0.0  ;;  %v1258_v18 = vpop.f32.mrb[1].mxu1 }
 0x26b   : > { %v4385_v27 = vpack.i.bf16 %v3874_v28, %v1258_v18  ;;  %v5701_v41 = vmax.f32 %v1258_v18, 0.0  ;;  %v1606_v28 = vsel %vm1605_vm6, %v6454_v49, 0.0  ;;  %v1607_v18 = vsel %vm1605_vm6, %v6455_v54, 0.0 }
 0x26c   : > { %2395 = vrot.lane.b32.xlu0 %v5697_v31, %s4641_s7  ;;  %v3202_v60 = vsel %vm2124_vm5, %v5697_v31, 0.0 }
 0x26d   : > { %v5775_v23 = vpop.trf.xlu1  ;;  %v3201_v30 = vsel %vm2124_vm5, %v5701_v41, 0.0 }
 0x26e   : > { %v3203_v8 = vadd.f32 %v3202_v60, %v3201_v30  ;;  %v1613_v30 = vsel %vm1605_vm6, %v5296_v46, 0.0 }
 0x270   : > { %2393 = vrot.lane.b32.xlu0 %v5701_v41, %s4641_s7 }
 0x271   : > { %v5777_v14 = vpop.trf.xlu1 }
 0x275   : > { %v3877_v17 = vpop.f32.mrb[2].mxu1 }
 0x276   : > { %v5705_v35 = vmax.f32 %v3877_v17, 0.0  ;;  %v1268_v43 = vpop.f32.mrb[3].mxu1 }
 0x277   : > { %v4390_v10 = vpack.i.bf16 %v3877_v17, %v1268_v43  ;;  %v5709_v37 = vmax.f32 %v1268_v43, 0.0  ;;  %v2131_v43 = vadd.f32 %v2130_v38, %v2129_v55  ;;  %v2138_v55 = vsel %vm2124_vm5, %v6433_v16, 0.0 }
 0x278   : > { %2399 = vrot.lane.b32.xlu0 %v5705_v35, %s4641_s7  ;;  %v1615_v38 = vsel %vm1605_vm6, %v6430_v52, 0.0 }
 0x279   : > { %v3204_v3 = vsel %vm2124_vm5, %v5709_v37, 0.0 }
 0x27c   : > { %2397 = vrot.lane.b32.xlu0 %v5709_v37, %s4641_s7 }
 0x286   : > { %v3880_v32 = vpop.f32.mrb[4].mxu1 }
 0x287   : > { %v5713_v0 = vmax.f32 %v3880_v32, 0.0  ;;  %v1278_v24 = vpop.f32.mrb[5].mxu1 }
 0x288   : > { %v4395_v34 = vpack.i.bf16 %v3880_v32, %v1278_v24  ;;  %v5717_v2 = vmax.f32 %v1278_v24, 0.0  ;;  %v4354_v32 = vunpack.i.h.bf16 %v5769_v51  ;;  %v4353_v24 = vunpack.i.l.bf16 %v5769_v51 }
 0x289   : > { %2403 = vrot.lane.b32.xlu0 %v5713_v0, %s4641_s7  ;;  %v3210_v60 = vsel %vm2124_vm5, %v5713_v0, 0.0 }
 0x28d   : > { %2401 = vrot.lane.b32.xlu0 %v5717_v2, %s4641_s7 }
 0x296   : > { %v3883_v1 = vpop.f32.mrb[6].mxu1 }
 0x297   : > { %v5721_v29 = vmax.f32 %v3883_v1, 0.0  ;;  %v1288_v33 = vpop.f32.mrb[7].mxu1 }
 0x298   : > { %v4400_v53 = vpack.i.bf16 %v3883_v1, %v1288_v33  ;;  %v5723_v4 = vmax.f32 %v1288_v33, 0.0  ;;  %v1609_v1 = vsel %vm1605_vm6, %v6456_v5, 0.0  ;;  %v1608_v33 = vadd.f32 %v1607_v18, %v1606_v28 }
 0x299   : > { %2407 = vrot.lane.b32.xlu0 %v5721_v29, %s4641_s7  ;;  %v1617_v18 = vsel %vm1605_vm6, %v5376_v21, 0.0 }
 0x29a   : > { %2405 = vrot.lane.b32.xlu1 %v5723_v4, %s4641_s7  ;;  %v1610_v51 = vadd.f32 %v1609_v1, %v1608_v33 }
 0x29d   : > { %4366 = vrot.lane.b32.xlu0 %v4385_v27, %s4642_s8 }
 0x29e   : > { %1995 = vrot.lane.b32.xlu1 %v5296_v46, %s4645_s15 }
 0x2a1   : > { %1987 = vrot.lane.b32.xlu0 %v6454_v49, %s4645_s15 }
 0x2a2   : > { %4381 = vrot.lane.b32.xlu1 %v4400_v53, %s4642_s8 }
 0x2a5   : > { %1989 = vrot.lane.b32.xlu0 %v6455_v54, %s4645_s15 }
 0x2a6   : > { %2001 = vrot.lane.b32.xlu1 %v6433_v16, %s4645_s15 }
 0x2a9   : > { %4371 = vrot.lane.b32.xlu0 %v4390_v10, %s4642_s8 }
 0x2aa   : > { %2903 = vrot.lane.b32.xlu1 %v5701_v41, %s4643_s24 }
 0x2ad   : > { %1991 = vrot.lane.b32.xlu0 %v6456_v5, %s4645_s15 }
 0x2ae   : > { %2905 = vrot.lane.b32.xlu1 %v5697_v31, %s4643_s24 }
 0x2b1   : > { %1993 = vrot.lane.b32.xlu0 %v6425_v39, %s4645_s15 }
 0x2b2   : > { %2907 = vrot.lane.b32.xlu1 %v5709_v37, %s4643_s24 }
 0x2b5   : > { %4376 = vrot.lane.b32.xlu0 %v4395_v34, %s4642_s8  ;;  %s4646_s8 = smov [#allocation9]  }
 0x2b6   : > { %2909 = vrot.lane.b32.xlu1 %v5705_v35, %s4643_s24 }
 0x2b9   : > { %1997 = vrot.lane.b32.xlu0 %v6430_v52, %s4645_s15 }
 0x2ba   : > { %2911 = vrot.lane.b32.xlu1 %v5717_v2, %s4643_s24 }
 0x2bd   : > { %1999 = vrot.lane.b32.xlu0 %v5376_v21, %s4645_s15 }
 0x2be   : > { %2913 = vrot.lane.b32.xlu1 %v5713_v0, %s4643_s24 }
 0x2c2   : > { %2915 = vrot.lane.b32.xlu1 %v5723_v4, %s4643_s24 }
 0x2c6   : > { %2917 = vrot.lane.b32.xlu1 %v5721_v29, %s4643_s24  ;;  %s4567_s24 = sshll.u32 %s4646_s8, 4  ;;  %s4568_s24 = int_to_ptr.vmem [resolvable:$false] %s4567_s24 }
 0x2c7   : > { %p4570_p7 = scmp.lt.s32.totalorder %s6203_s9, %s4568_s24 }
 0x2ca   : > { %4386 = vrot.lane.b32.xlu1 %v4385_v27, %s4644_s26  ;;  %v4144_v27 = vpack.c.bf16 %v4349_v22, %v4348_v57 }
 0x2ce   : > { %4391 = vrot.lane.b32.xlu1 %v4390_v10, %s4644_s26  ;;  %v3205_v10 = vadd.f32 %v3204_v3, %v3203_v8 }
 0x2d2   : > { %4396 = vrot.lane.b32.xlu1 %v4395_v34, %s4644_s26  ;;  %v2132_v34 = vsel %vm2124_vm5, %v5296_v46, 0.0 }
 0x2d3   : > { %v2133_v47 = vadd.f32 %v2132_v34, %v2131_v43 }
 0x2d6   : > { %4401 = vrot.lane.b32.xlu1 %v4400_v53, %s4644_s26  ;;  %v3206_v53 = vsel %vm2124_vm5, %v5705_v35, 0.0  ;;  %s4569_s26 = scalar_lea.vmem %s4568_s24, 2048 }
 0x2de   : > { %v2396_v20 = vpop.permute.xlu0 %2395 }
 0x2e2   : > { %v2394_v45 = vpop.permute.xlu0 %2393 }
 0x2e3   : > { %2417 = vxpose.xlu0.b32.start [1/8] (short) (narrow) %v2394_v45, 16 }
 0x2e7   : > { %2418 = vxpose.xlu0.b32.cont [2/8] (short) (narrow) %v2396_v20, 16  ;;  %v1611_v20 = vsel %vm1605_vm6, %v6425_v39, 0.0 }
 0x2ea   : > { %v2400_v59 = vpop.permute.xlu0 %2399 }
 0x2ee   : > { %v2398_v48 = vpop.permute.xlu0 %2397 }
 0x2ef   : > { %2419 = vxpose.xlu0.b32.cont [3/8] (short) (narrow) %v2398_v48, 16  ;;  %v3207_v48 = vadd.f32 %v3206_v53, %v3205_v10 }
 0x2f3   : > { %2420 = vxpose.xlu0.b32.cont [4/8] (short) (narrow) %v2400_v59, 16  ;;  %v2134_v59 = vsel %vm2124_vm5, %v6430_v52, 0.0 }
 0x2fb   : > { %v2404_v40 = vpop.permute.xlu0 %2403 }
 0x2ff   : > { %v2402_v6 = vpop.permute.xlu0 %2401 }
 0x300   : > { %2421 = vxpose.xlu0.b32.cont [5/8] (short) (narrow) %v2402_v6, 16  ;;  %v4359_v6 = vunpack.i.h.bf16 %v5771_v19 }
 0x304   : > { %2422 = vxpose.xlu0.b32.cont [6/8] (short) (narrow) %v2404_v40, 16  ;;  %v4148_v40 = vpack.c.bf16 %v4354_v32, %v4353_v24 }
 0x30b   : > { %v2408_v50 = vpop.permute.xlu0 %2407 }
 0x30c   : > { %v2406_v9 = vpop.permute.xlu1 %2405 }
 0x30d   : > { %2423 = vxpose.xlu0.b32.cont [7/8] (short) (narrow) %v2406_v9, 16  ;;  %v4358_v9 = vunpack.i.l.bf16 %v5771_v19 }
 0x30f   : > { %v4152_v19 = vpack.c.bf16 %v4359_v6, %v4358_v9  ;;  %v5847_v3 = vpop.permute.xlu0 %4366 }
 0x310   : > { %v5779_v25 = vpop.permute.xlu1 %1995 }
 0x311   : > { %2424 = vxpose.xlu0.b32.end [8/8] (short) (narrow) %v2408_v50, 16  ;;  %v3208_v50 = vsel %vm2124_vm5, %v5717_v2, 0.0 }
 0x312   : > { %v3209_v11 = vadd.f32 %v3208_v50, %v3207_v48 }
 0x313   : > { %v1988_v32 = vpop.permute.xlu0 %1987 }
 0x314   : > { %v5781_v13 = vpop.permute.xlu1 %4381 }
 0x318   : > { %v5783_v42 = vpop.permute.xlu1 %2001 }
 0x31c   : > { %v2904_v56 = vpop.permute.xlu1 %2903 }
 0x31d   : > { %2927 = vxpose.xlu1.b32.start [1/8] (short) (narrow) %v2904_v56, 16 }
 0x320   : > { %v2906_v58 = vpop.permute.xlu1 %2905 }
 0x321   : > { %2928 = vxpose.xlu1.b32.cont [2/8] (short) (narrow) %v2906_v58, 16  ;;  %v2135_v58 = vadd.f32 %v2134_v59, %v2133_v47 }
 0x323   : > { %v2137_v57 = vadd.f32 %v2136_v62, %v2135_v58  ;;  %v5879_v62 = vpop.permute.xlu0 %1989 }
 0x324   : > { %v2908_v12 = vpop.permute.xlu1 %2907 }
 0x325   : > { %2929 = vxpose.xlu1.b32.cont [3/8] (short) (narrow) %v2908_v12, 16  ;;  %v1612_v12 = vadd.f32 %v1611_v20, %v1610_v51 }
 0x327   : > { %v3902_v36 = vpop.f32.mrb[8].mxu0 }
 0x328   : > { %v2910_v44 = vpop.permute.xlu1 %2909  ;;  %v1474_v7 = vpop.f32.mrb[9].mxu0 }
 0x329   : > { %2930 = vxpose.xlu1.b32.cont [4/8] (short) (narrow) %v2910_v44, 16  ;;  %v4136_v63 = vpack.c.bf16 %v3902_v36, %v1474_v7  ;;  %v3211_v44 = vadd.f32 %v3210_v60, %v3209_v11  ;;  %v1614_v36 = vadd.f32 %v1613_v30, %v1612_v12  ;;  %v3212_v7 = vsel %vm2124_vm5, %v5723_v4, 0.0  ;;  %v5881_v11 = vpop.permute.xlu0 %4371 }
 0x32b   : > { %4137 = vmatprep.subr.bf16.mxu0 %v4136_v63  ;;  %v3213_v8 = vadd.f32 %v3212_v7, %v3211_v44  ;;  %v1616_v28 = vadd.f32 %v1615_v38, %v1614_v36  ;;  %v2686_v44 = vsel %vm1605_vm6, %v5709_v37, 0.0  ;;  %v2688_v7 = vsel %vm1605_vm6, %v5705_v35, 0.0 }
 0x32c   : > { %v2912_v17 = vpop.permute.xlu1 %2911  ;;  %4139 = vmatpush3.bf16.msra.mxu0 %v4136_v63  ;;  %v2139_v63 = vadd.f32 %v2138_v55, %v2137_v57  ;;  %v2684_v57 = vsel %vm1605_vm6, %v5697_v31, 0.0 }
 0x32d   : > { %2931 = vxpose.xlu1.b32.cont [5/8] (short) (narrow) %v2912_v17, 16  ;;  %4145 = vmatprep.subr.bf16.mxu0 %v4144_v27  ;;  %v1618_v10 = vadd.f32 %v1617_v18, %v1616_v28  ;;  %v5883_v12 = vpop.permute.xlu0 %1991 }
 0x32e   : > { %v2140_v17 = vrot.slane %v2139_v63, 4 }
 0x32f   : > { %3908 = vmatmul.mubr.msk.f32.vlgmr.msra.gmra.mrb[10].mxu0 %vm1483_vm4, %v6455_v54 }
 0x330   : > { %v2914_v45 = vpop.permute.xlu1 %2913  ;;  %3910 = vmatprep.mubr.msk.f32.mxu0 %vm1483_vm4, %v6456_v5  ;;  %4147 = vmatpush3.bf16.msra.mxu0 %v4144_v27  ;;  %v3214_v27 = vsel %vm2124_vm5, %v5721_v29, 0.0  ;;  %v2141_v24 = vadd.f32 %v2140_v17, %v2139_v63  ;;  %v2690_v63 = vsel %vm1605_vm6, %v5717_v2, 0.0 }
 0x331   : > { %2932 = vxpose.xlu1.b32.cont [6/8] (short) (narrow) %v2914_v45, 16  ;;  %4149 = vmatprep.subr.bf16.mxu0 %v4148_v40  ;;  %v3215_v43 = vadd.f32 %v3214_v27, %v3213_v8  ;;  %v2692_v27 = vsel %vm1605_vm6, %v5713_v0, 0.0 }
 0x332   : > { %v2142_v33 = vrot.slane %v2141_v24, 2 }
 0x333   : > { %3911 = vmatmul.mubr.msk.f32.gmra.mrb[12].mxu0 %vm1483_vm4, %v6425_v39  ;;  %v3216_v34 = vrot.slane %v3215_v43, 4 }
 0x334   : > { %v2916_v56 = vpop.permute.xlu1 %2915  ;;  %3913 = vmatprep.mubr.msk.f32.mxu0 %vm1483_vm4, %v5296_v46  ;;  %4151 = vmatpush3.bf16.msra.mxu0 %v4148_v40 }
 0x335   : > { %2933 = vxpose.xlu1.b32.cont [7/8] (short) (narrow) %v2916_v56, 16  ;;  %4153 = vmatprep.subr.bf16.mxu0 %v4152_v19  ;;  %v3217_v53 = vadd.f32 %v3216_v34, %v3215_v43  ;;  %v2694_v43 = vsel %vm1605_vm6, %v5723_v4, 0.0 }
 0x337   : > { %3914 = vmatmul.mubr.msk.f32.gmra.mrb[14].mxu0 %vm1483_vm4, %v6430_v52  ;;  %v3218_v45 = vrot.slane %v3217_v53, 2 }
 0x338   : > { %v2918_v22 = vpop.permute.xlu1 %2917  ;;  %3916 = vmatprep.mubr.msk.f32.mxu0 %vm1483_vm4, %v5376_v21  ;;  %4155 = vmatpush3.bf16.msra.mxu0 %v4152_v19  ;;  %v5885_v19 = vpop.permute.xlu0 %1993 }
 0x339   : > { %2934 = vxpose.xlu1.b32.end [8/8] (short) (narrow) %v2918_v22, 16  ;;  %4157 = vmatprep.subr.bf16.mxu0 %v4156_v61  ;;  %v3219_v48 = vadd.f32 %v3218_v45, %v3217_v53  ;;  %v2683_v22 = vsel %vm1605_vm6, %v5701_v41, 0.0 }
 0x33a   : > { %3064 = vrot.lane.b32.xlu0 %v5701_v41, %s4645_s15  ;;  %v2685_v36 = vadd.f32 %v2684_v57, %v2683_v22 }
 0x33b   : > { %3917 = vmatmul.mubr.msk.f32.gmra.mrb[16].mxu0 %vm1483_vm4, %v6433_v16  ;;  %v3220_v6 = vrot.slane %v3219_v48, 1 }
 0x33c   : > { %3951 = vmatprep.mubr.msk.f32.mxu0 %vm1401_vm3, %v5775_v23  ;;  %4159 = vmatpush3.bf16.msra.mxu0 %v4156_v61  ;;  %v1619_v23 = vsel %vm1605_vm6, %v6433_v16, 0.0  ;;  %v5887_v15 = vpop.permute.xlu0 %4376  ;;  %v2687_v61 = vadd.f32 %v2686_v44, %v2685_v36 }
 0x33d   : > { %v1620_v1 = vadd.f32 %v1619_v23, %v1618_v10  ;;  %v3221_v50 = vadd.f32 %v3220_v6, %v3219_v48 }
 0x33e   : > { %3066 = vrot.lane.b32.xlu0 %v5697_v31, %s4645_s15  ;;  %v2689_v38 = vadd.f32 %v2688_v7, %v2687_v61 }
 0x33f   : > { %3952 = vmatmul.mubr.msk.f32.vlgmr.msra.gmra.mrb[18].mxu0 %vm1401_vm3, %v5777_v14  ;;  %v1621_v20 = vrot.slane %v1620_v1, 4  ;;  %v2143_v14 = vadd.f32 %v2142_v33, %v2141_v24  ;;  %v2696_v24 = vsel %vm1605_vm6, %v5721_v29, 0.0 }
 0x340   : > { %3958 = vmatprep.mubr.msk.f32.mxu0 %vm1483_vm4, %v1988_v32  ;;  %v5889_v26 = vpop.permute.xlu0 %1997  ;;  %v2691_v28 = vadd.f32 %v2690_v63, %v2689_v38 }
 0x341   : > { %v1622_v47 = vadd.f32 %v1621_v20, %v1620_v1  ;;  %v2144_v59 = vrot.slane %v2143_v14, 1 }
 0x342   : > { %3068 = vrot.lane.b32.xlu0 %v5709_v37, %s4645_s15  ;;  %v2693_v17 = vadd.f32 %v2692_v27, %v2691_v28 }
 0x343   : > { %v1623_v51 = vrot.slane %v1622_v47, 2  ;;  %v2145_v40 = vadd.f32 %v2144_v59, %v2143_v14 }
 0x344   : > { %v5891_v30 = vpop.permute.xlu0 %1999  ;;  %v2695_v32 = vadd.f32 %v2694_v43, %v2693_v17 }
 0x345   : > { %v1624_v9 = vadd.f32 %v1623_v51, %v1622_v47 }
 0x346   : > { %3070 = vrot.lane.b32.xlu0 %v5705_v35, %s4645_s15  ;;  %v2697_v34 = vadd.f32 %v2696_v24, %v2695_v32 }
 0x347   : > { %v1625_v56 = vrot.slane %v1624_v9, 1 }
 0x348   : > { %v2698_v33 = vrot.slane %v2697_v34, 4 }
 0x349   : > { %v1626_v58 = vadd.f32 %v1625_v56, %v1624_v9 }
 0x34a   : > { %3072 = vrot.lane.b32.xlu0 %v5717_v2, %s4645_s15  ;;  %v2699_v20 = vadd.f32 %v2698_v33, %v2697_v34 }
 0x34c   : > { %v2700_v45 = vrot.slane %v2699_v20, 2 }
 0x34e   : > { %3074 = vrot.lane.b32.xlu0 %v5713_v0, %s4645_s15  ;;  %v2701_v51 = vadd.f32 %v2700_v45, %v2699_v20 }
 0x350   : > { %v2702_v9 = vrot.slane %v2701_v51, 1 }
 0x352   : > { %3078 = vrot.lane.b32.xlu0 %v5721_v29, %s4645_s15  ;;  %v2703_v56 = vadd.f32 %v2702_v9, %v2701_v51 }
 0x356   : > { %2147 = vrot.lane.b32.xlu0 %v2145_v40, %s4641_s7 }
 0x357   : > { %3076 = vrot.lane.b32.xlu1 %v5723_v4, %s4645_s15 }
 0x35a   : > { %3223 = vrot.lane.b32.xlu0 %v3221_v50, %s4641_s7 }
 0x35e   : > { %1628 = vrot.lane.b32.xlu0 %v1626_v58, %s4641_s7 }
 0x375   : > { %v5893_v60 = vpop.trf.xlu0 }
 0x379   : > { %v5901_v55 = vpop.trf.xlu0 }
 0x3ac   : > { %v5907_v8 = vpop.permute.xlu0 %3064 }
 0x3b0   : > { %v5909_v18 = vpop.permute.xlu0 %3066 }
 0x3b4   : > { %v5915_v10 = vpop.permute.xlu0 %3068 }
 0x3b8   : > { %v5917_v23 = vpop.permute.xlu0 %3070 }
 0x3bc   : > { %v5921_v1 = vpop.permute.xlu0 %3072 }
 0x3c0   : > { %v5923_v53 = vpop.permute.xlu0 %3074 }
 0x3c4   : > { %v5925_v14 = vpop.permute.xlu0 %3078 }
 0x3c8   : > { %v2148_v47 = vpop.permute.xlu0 %2147 }
 0x3c9   : > { %v2154_v59 = vmul.f32 %v2148_v47, %v5296_v46  ;;  %v2150_v48 = vmul.f32 %v2148_v47, %v6454_v49  ;;  %v2156_v40 = vmul.f32 %v2148_v47, %v5376_v21  ;;  %v2151_v6 = vmul.f32 %v2148_v47, %v6455_v54 }
 0x3ca   : > { %v2152_v50 = vmul.f32 %v2148_v47, %v6456_v5  ;;  %v2153_v58 = vmul.f32 %v2148_v47, %v6425_v39  ;;  %v2155_v22 = vmul.f32 %v2148_v47, %v6430_v52  ;;  %v2157_v57 = vmul.f32 %v2148_v47, %v6433_v16 }
 0x3cb   : > { %2174 = vrot.lane.b32.xlu1 %v2154_v59, %s4645_s15  ;;  %2166 = vrot.lane.b32.xlu0 %v2150_v48, %s4645_s15 }
 0x3cc   : > { %v5944_v44 = vpop.permute.xlu0 %3223 }
 0x3cf   : > { %2178 = vrot.lane.b32.xlu1 %v2156_v40, %s4645_s15  ;;  %2168 = vrot.lane.b32.xlu0 %v2151_v6, %s4645_s15  ;;  %v4369_v40 = vunpack.i.h.bf16 %v5847_v3  ;;  %v4368_v6 = vunpack.i.l.bf16 %v5847_v3  ;;  %v3233_v3 = vmul.f32 %v5944_v44, %v5721_v29 }
 0x3d0   : > { %v1629_v36 = vpop.permute.xlu0 %1628 }
 0x3d1   : > { %v1632_v61 = vmul.f32 %v1629_v36, %v6455_v54  ;;  %v1634_v38 = vmul.f32 %v1629_v36, %v6425_v39  ;;  %v1631_v63 = vmul.f32 %v1629_v36, %v6454_v49  ;;  %v1637_v27 = vmul.f32 %v1629_v36, %v5376_v21 }
 0x3d2   : > { %v1633_v43 = vmul.f32 %v1629_v36, %v6456_v5  ;;  %v1635_v39 = vmul.f32 %v1629_v36, %v5296_v46  ;;  %v1636_v34 = vmul.f32 %v1629_v36, %v6430_v52  ;;  %v1638_v45 = vmul.f32 %v1629_v36, %v6433_v16 }
 0x3d3   : > { %2170 = vrot.lane.b32.xlu0 %v2152_v50, %s4645_s15  ;;  %2705 = vrot.lane.b32.xlu1 %v2703_v56, %s4641_s7  ;;  %v1642_v7 = vsel %vm1483_vm4, %v1632_v61, 0.0  ;;  %v1648_v28 = vsel %vm1483_vm4, %v1634_v38, 0.0  ;;  %v1639_v17 = vsel %vm1483_vm4, %v1631_v63, 0.0  ;;  %v1657_v32 = vsel %vm1483_vm4, %v1637_v27, 0.0  ;;  %v5991_v61 = vpop.permute.xlu1 %4386  ;;  %v1688_v38 = vld [vmem:[%s6254_s4 + $0x8] sm:$0xff]  ;;  %s4563_s7 = scalar_lea.vmem %s6203_s9, 1024 }
 0x3d4   : > { %v1645_v54 = vsel %vm1483_vm4, %v1633_v43, 0.0  ;;  %v1651_v21 = vsel %vm1483_vm4, %v1635_v39, 0.0  ;;  %v1654_v20 = vsel %vm1483_vm4, %v1636_v34, 0.0  ;;  %v1660_v59 = vsel %vm1483_vm4, %v1638_v45, 0.0  ;;  %p4564_p11 = scmp.ne.s32.totalorder %s6203_s9, %s4563_s7  ;;  %p4571_p9 = scmp.lt.s32.totalorder %s4569_s26, %s4563_s7 }
 0x3d5   : > { %v3227_v52 = vmul.f32 %v5944_v44, %v5697_v31  ;;  %v3229_v16 = vmul.f32 %v5944_v44, %v5705_v35  ;;  %v3231_v56 = vmul.f32 %v5944_v44, %v5713_v0  ;;  %v4373_v36 = vunpack.i.l.bf16 %v5881_v11 }
 0x3d6   : > { %v4378_v27 = vunpack.i.l.bf16 %v5887_v15  ;;  %v4384_v43 = vunpack.i.h.bf16 %v5781_v13  ;;  %p4565_p2 = pnand %p4564_p11, %p6457_p0  ;;  %p4572_p12 = por %p4571_p9, %p4570_p7 }
 0x3d7   : > { %2172 = vrot.lane.b32.xlu0 %v2153_v58, %s4645_s15 }
 0x3d8   : > { %p4566_p3 = pneg %p4565_p2 }
 0x3da   : > { %p4573_p1 = pnand %p4572_p12, %p4566_p3 }
 0x3db   : > { %2176 = vrot.lane.b32.xlu0 %v2155_v22, %s4645_s15  ;;  %v4168_v22 = vpack.c.bf16 %v4369_v40, %v4368_v6 }
 0x3df   : > { %2180 = vrot.lane.b32.xlu0 %v2157_v57, %s4645_s15  ;;  %v4374_v57 = vunpack.i.h.bf16 %v5881_v11 }
 0x3e1   : > { %v4172_v11 = vpack.c.bf16 %v4374_v57, %v4373_v36 }
 0x3f7   : > { %1643 = vadd.xlane.f32.xlu1 %v1642_v7  ;;  %v1687_v7 = vld [vmem:[%s6254_s4] sm:$0xff] }
 0x3f8   : > { %v4140_v63 = vpack.c.bf16 %v1688_v38, %v1687_v7 }
 0x3fa   : > { %4141 = vmatprep.subr.bf16.mxu1 %v4140_v63 }
 0x3fb   : > { %1649 = vadd.xlane.f32.xlu1 %v1648_v28  ;;  %v4379_v28 = vunpack.i.h.bf16 %v5887_v15  ;;  %4143 = vmatpush3.bf16.msra.mxu1 %v4140_v63 }
 0x3fe   : > { %1640 = vadd.xlane.f32.xlu0 %v1639_v17  ;;  %v6008_v17 = vpop.permute.xlu1 %4391 }
 0x3ff   : > { %1658 = vadd.xlane.f32.xlu1 %v1657_v32  ;;  %v4383_v32 = vunpack.i.l.bf16 %v5781_v13  ;;  %v3230_v13 = vmul.f32 %v5944_v44, %v5717_v2 }
 0x402   : > { %1646 = vadd.xlane.f32.xlu0 %v1645_v54  ;;  %v5957_v24 = vpop.f32.mrb[10].mxu0  ;;  %v4176_v54 = vpack.c.bf16 %v4379_v28, %v4378_v27  ;;  %v6021_v15 = vpop.permute.xlu1 %4396 }
 0x403   : > { %v5959_v49 = vpop.f32.mrb[11].mxu0 }
 0x406   : > { %1652 = vadd.xlane.f32.xlu0 %v1651_v21  ;;  %v5963_v33 = vpop.f32.mrb[12].mxu0 }
 0x407   : > { %v5965_v5 = vpop.f32.mrb[13].mxu0 }
 0x40a   : > { %1655 = vadd.xlane.f32.xlu0 %v1654_v20  ;;  %v5969_v46 = vpop.f32.mrb[14].mxu0 }
 0x40b   : > { %v5971_v47 = vpop.f32.mrb[15].mxu0 }
 0x40e   : > { %1661 = vadd.xlane.f32.xlu0 %v1660_v59  ;;  %v5976_v48 = vpop.f32.mrb[16].mxu0 }
 0x40f   : > { %v5979_v51 = vpop.f32.mrb[17].mxu0 }
 0x410   : > { %3244 = vrot.lane.b32.xlu1 %v3227_v52, %s4645_s15 }
 0x412   : > { %v3953_v9 = vpop.f32.mrb[18].mxu0 }
 0x413   : > { %v1978_v50 = vpop.f32.mrb[19].mxu0 }
 0x414   : > { %3248 = vrot.lane.b32.xlu1 %v3229_v16, %s4645_s15  ;;  %v4160_v58 = vpack.c.bf16 %v3953_v9, %v1978_v50 }
 0x416   : > { %4161 = vmatprep.subr.bf16.mxu0 %v4160_v58 }
 0x417   : > { %4163 = vmatpush3.bf16.msra.mxu0 %v4160_v58 }
 0x418   : > { %3252 = vrot.lane.b32.xlu1 %v3231_v56, %s4645_s15  ;;  %4169 = vmatprep.subr.bf16.mxu0 %v4168_v22 }
 0x41a   : > { %3959 = vmatmul.mubr.msk.f32.vlgmr.msra.gmra.mrb[20].mxu0 %vm1483_vm4, %v5879_v62  ;;  %v3226_v62 = vmul.f32 %v5944_v44, %v5701_v41 }
 0x41b   : > { %3961 = vmatprep.mubr.msk.f32.mxu0 %vm1483_vm4, %v5883_v12  ;;  %4171 = vmatpush3.bf16.msra.mxu0 %v4168_v22  ;;  %v4180_v12 = vpack.c.bf16 %v4384_v43, %v4383_v32 }
 0x41c   : > { %3256 = vrot.lane.b32.xlu1 %v3233_v3, %s4645_s15  ;;  %4173 = vmatprep.subr.bf16.mxu0 %v4172_v11 }
 0x41e   : > { %3962 = vmatmul.mubr.msk.f32.gmra.mrb[22].mxu0 %vm1483_vm4, %v5885_v19  ;;  %v6034_v19 = vpop.permute.xlu1 %4401 }
 0x41f   : > { %3964 = vmatprep.mubr.msk.f32.mxu0 %vm1483_vm4, %v5779_v25  ;;  %4175 = vmatpush3.bf16.msra.mxu0 %v4172_v11  ;;  %v3228_v25 = vmul.f32 %v5944_v44, %v5709_v37 }
 0x420   : > { %4177 = vmatprep.subr.bf16.mxu0 %v4176_v54 }
 0x422   : > { %3965 = vmatmul.mubr.msk.f32.gmra.mrb[24].mxu0 %vm1483_vm4, %v5889_v26  ;;  %v6043_v26 = vpop.trf.xlu1 }
 0x423   : > { %3967 = vmatprep.mubr.msk.f32.mxu0 %vm1483_vm4, %v5891_v30  ;;  %4179 = vmatpush3.bf16.msra.mxu0 %v4176_v54 }
 0x424   : > { %3242 = vrot.lane.b32.xlu0 %v3226_v62, %s4645_s15  ;;  %4181 = vmatprep.subr.bf16.mxu0 %v4180_v12 }
 0x426   : > { %3968 = vmatmul.mubr.msk.f32.gmra.mrb[26].mxu0 %vm1483_vm4, %v5783_v42  ;;  %v3232_v42 = vmul.f32 %v5944_v44, %v5723_v4  ;;  %v6046_v30 = vpop.trf.xlu1 }
 0x427   : > { %4183 = vmatpush3.bf16.msra.mxu0 %v4180_v12  ;;  %4002 = vmatprep.mubr.msk.f32.mxu0 %vm1401_vm3, %v5893_v60 }
 0x428   : > { %3246 = vrot.lane.b32.xlu0 %v3228_v25, %s4645_s15 }
 0x42a   : > { %4003 = vmatmul.mubr.msk.f32.vlgmr.msra.gmra.mrb[28].mxu0 %vm1401_vm3, %v5901_v55  ;;  %v6048_v60 = vpop.permute.xlu1 %3076 }
 0x42b   : > { %4009 = vmatprep.mubr.msk.f32.mxu0 %vm1483_vm4, %v5701_v41 }
 0x42c   : > { %3250 = vrot.lane.b32.xlu0 %v3230_v13, %s4645_s15  ;;  %v2238_v13 = vld [vmem:[%s6254_s4 + $0x10] sm:$0xff] }
 0x430   : > { %3254 = vrot.lane.b32.xlu0 %v3232_v42, %s4645_s15  ;;  %v2239_v42 = vld [vmem:[%s6254_s4 + $0x18] sm:$0xff] }
 0x43d   : > { %v2167_v39 = vpop.permute.xlu0 %2166  ;;  %v2175_v34 = vpop.permute.xlu1 %2174 }
 0x43e   : > { %v2190_v21 = vsel %vm1483_vm4, %v2167_v39, 0.0  ;;  %v2202_v44 = vsel %vm1483_vm4, %v2175_v34, 0.0  ;;  %v4164_v39 = vpack.c.bf16 %v2239_v42, %v2238_v13 }
 0x440   : > { %2191 = vadd.xlane.f32.xlu1 %v2190_v21  ;;  %4165 = vmatprep.subr.bf16.mxu1 %v4164_v39 }
 0x441   : > { %v2169_v55 = vpop.permute.xlu0 %2168  ;;  %v2179_v20 = vpop.permute.xlu1 %2178 }
 0x442   : > { %v2208_v40 = vsel %vm1483_vm4, %v2179_v20, 0.0  ;;  %v2193_v6 = vsel %vm1483_vm4, %v2169_v55, 0.0 }
 0x445   : > { %v2171_v45 = vpop.permute.xlu0 %2170  ;;  %v2706_v52 = vpop.permute.xlu1 %2705 }
 0x446   : > { %v2196_v59 = vsel %vm1483_vm4, %v2171_v45, 0.0  ;;  %v2708_v9 = vmul.f32 %v2706_v52, %v5701_v41  ;;  %v2710_v22 = vmul.f32 %v2706_v52, %v5709_v37  ;;  %v2712_v3 = vmul.f32 %v2706_v52, %v5717_v2 }
 0x447   : > { %2197 = vadd.xlane.f32.xlu1 %v2196_v59  ;;  %v2709_v63 = vmul.f32 %v2706_v52, %v5697_v31  ;;  %v2714_v11 = vmul.f32 %v2706_v52, %v5723_v4  ;;  %v2711_v43 = vmul.f32 %v2706_v52, %v5705_v35  ;;  %v2713_v54 = vmul.f32 %v2706_v52, %v5713_v0 }
 0x448   : > { %v2716_v58 = vsel %vm1483_vm4, %v2708_v9, 0.0  ;;  %v2722_v36 = vsel %vm1483_vm4, %v2710_v22, 0.0  ;;  %v2728_v38 = vsel %vm1483_vm4, %v2712_v3, 0.0  ;;  %v2715_v12 = vmul.f32 %v2706_v52, %v5721_v29 }
 0x449   : > { %v2173_v16 = vpop.permute.xlu0 %2172  ;;  %v2719_v28 = vsel %vm1483_vm4, %v2709_v63, 0.0  ;;  %v2734_v27 = vsel %vm1483_vm4, %v2714_v11, 0.0  ;;  %v2725_v32 = vsel %vm1483_vm4, %v2711_v43, 0.0  ;;  %v2731_v62 = vsel %vm1483_vm4, %v2713_v54, 0.0 }
 0x44a   : > { %v2199_v56 = vsel %vm1483_vm4, %v2173_v16, 0.0  ;;  %v2737_v25 = vsel %vm1483_vm4, %v2715_v12, 0.0 }
 0x44b   : > { %2203 = vadd.xlane.f32.xlu1 %v2202_v44 }
 0x44d   : > { %v2177_v50 = vpop.permute.xlu0 %2176 }
 0x44e   : > { %v2205_v57 = vsel %vm1483_vm4, %v2177_v50, 0.0 }
 0x44f   : > { %2194 = vadd.xlane.f32.xlu0 %v2193_v6  ;;  %2209 = vadd.xlane.f32.xlu1 %v2208_v40 }
 0x451   : > { %v2181_v7 = vpop.permute.xlu0 %2180 }
 0x452   : > { %v2211_v41 = vsel %vm1483_vm4, %v2181_v7, 0.0 }
 0x453   : > { %2200 = vadd.xlane.f32.xlu0 %v2199_v56  ;;  %2717 = vadd.xlane.f32.xlu1 %v2716_v58 }
 0x457   : > { %2206 = vadd.xlane.f32.xlu0 %v2205_v57  ;;  %2723 = vadd.xlane.f32.xlu1 %v2722_v36 }
 0x45b   : > { %2212 = vadd.xlane.f32.xlu0 %v2211_v41  ;;  %2729 = vadd.xlane.f32.xlu1 %v2728_v38 }
 0x45f   : > { %2720 = vadd.xlane.f32.xlu0 %v2719_v28  ;;  %2735 = vadd.xlane.f32.xlu1 %v2734_v27 }
 0x463   : > { %2726 = vadd.xlane.f32.xlu0 %v2725_v32 }
 0x467   : > { %2732 = vadd.xlane.f32.xlu0 %v2731_v62 }
 0x46b   : > { %2738 = vadd.xlane.f32.xlu0 %v2737_v25 }
 0x484   : > { %v1644_v21 = vpop.xlane.xlu1 %1643 }
 0x485   : > { %v1664_v55 = vadd.f32 1e-15, %v1644_v21 }
 0x487   : > { %4405 = vrcp.f32 %v1664_v55 }
 0x488   : > { %v1650_v34 = vpop.xlane.xlu1 %1649 }
 0x489   : > { %v1666_v44 = vadd.f32 1e-15, %v1650_v34 }
 0x48b   : > { %v1641_v20 = vpop.xlane.xlu0 %1640 }
 0x48c   : > { %v1663_v45 = vadd.f32 1e-15, %v1641_v20  ;;  %v1659_v59 = vpop.xlane.xlu1 %1658 }
 0x48d   : > { %v1669_v58 = vadd.f32 1e-15, %v1659_v59 }
 0x48e   : > { %4407 = vrcp.f32 %v1663_v45 }
 0x48f   : > { %v1647_v52 = vpop.xlane.xlu0 %1646  ;;  %4409 = vrcp.f32 %v1666_v44 }
 0x490   : > { %v1665_v16 = vadd.f32 1e-15, %v1647_v52  ;;  %v3245_v40 = vpop.permute.xlu1 %3244 }
 0x491   : > { %v3269_v6 = vsel %vm1483_vm4, %v3245_v40, 0.0  ;;  %v4406_v57 = vpop.eup %4405 }
 0x492   : > { %4411 = vrcp.f32 %v1665_v16  ;;  %3270 = vadd.xlane.f32.xlu0 %v3269_v6  ;;  %v1680_v11 = vmul.f32 %v4406_v57, %v5957_v24 }
 0x493   : > { %v1653_v9 = vpop.xlane.xlu0 %1652 }
 0x494   : > { %v1667_v50 = vadd.f32 1e-15, %v1653_v9  ;;  %v3249_v56 = vpop.permute.xlu1 %3248 }
 0x495   : > { %v3275_v22 = vsel %vm1483_vm4, %v3249_v56, 0.0 }
 0x496   : > { %4413 = vrcp.f32 %v1667_v50  ;;  %3276 = vadd.xlane.f32.xlu0 %v3275_v22 }
 0x497   : > { %v1656_v36 = vpop.xlane.xlu0 %1655  ;;  %4415 = vrcp.f32 %v1669_v58 }
 0x498   : > { %v4408_v3 = vpop.eup %4407  ;;  %v1668_v7 = vadd.f32 1e-15, %v1656_v36  ;;  %v3253_v41 = vpop.permute.xlu1 %3252 }
 0x499   : > { %v3281_v38 = vsel %vm1483_vm4, %v3253_v41, 0.0  ;;  %v1679_v63 = vmul.f32 %v4408_v3, %v5959_v49  ;;  %v4410_v28 = vpop.eup %4409 }
 0x49a   : > { %4417 = vrcp.f32 %v1668_v7  ;;  %3282 = vadd.xlane.f32.xlu0 %v3281_v38  ;;  %v1682_v24 = vmul.f32 %v4410_v28, %v5963_v33 }
 0x49b   : > { %3923 = vmatprep.mubr.msk.f32.mxu1 %vm1483_vm4, %v1679_v63  ;;  %v1662_v27 = vpop.xlane.xlu0 %1661 }
 0x49c   : > { %v4412_v43 = vpop.eup %4411  ;;  %v1670_v32 = vadd.f32 1e-15, %v1662_v27  ;;  %3924 = vmatmul.mubr.msk.f32.vlgmr.msra.gmra.mrb[8].mxu1 %vm1483_vm4, %v1680_v11  ;;  %v3257_v54 = vpop.permute.xlu1 %3256 }
 0x49d   : > { %v3287_v62 = vsel %vm1483_vm4, %v3257_v54, 0.0  ;;  %v1681_v12 = vmul.f32 %v4412_v43, %v5965_v5  ;;  %4167 = vmatpush3.bf16.msra.mxu1 %v4164_v39 }
 0x49e   : > { %4419 = vrcp.f32 %v1670_v32  ;;  %3288 = vadd.xlane.f32.xlu0 %v3287_v62 }
 0x49f   : > { %v3243_v49 = vpop.permute.xlu0 %3242  ;;  %3926 = vmatprep.mubr.msk.f32.mxu1 %vm1483_vm4, %v1681_v12 }
 0x4a0   : > { %v4414_v25 = vpop.eup %4413  ;;  %v3266_v13 = vsel %vm1483_vm4, %v3243_v49, 0.0  ;;  %3927 = vmatmul.mubr.msk.f32.gmra.mrb[10].mxu1 %vm1483_vm4, %v1682_v24 }
 0x4a1   : > { %3267 = vadd.xlane.f32.xlu1 %v3266_v13  ;;  %v1683_v42 = vmul.f32 %v4414_v25, %v5971_v47  ;;  %v4416_v21 = vpop.eup %4415 }
 0x4a2   : > { %v1685_v55 = vmul.f32 %v4416_v21, %v5979_v51 }
 0x4a3   : > { %v3247_v34 = vpop.permute.xlu0 %3246  ;;  %3929 = vmatprep.mubr.msk.f32.mxu1 %vm1483_vm4, %v1683_v42 }
 0x4a4   : > { %v4418_v5 = vpop.eup %4417  ;;  %v3272_v39 = vsel %vm1483_vm4, %v3247_v34, 0.0 }
 0x4a5   : > { %3273 = vadd.xlane.f32.xlu1 %v3272_v39  ;;  %v1684_v33 = vmul.f32 %v4418_v5, %v5969_v46 }
 0x4a7   : > { %v3251_v20 = vpop.permute.xlu0 %3250  ;;  %3930 = vmatmul.mubr.msk.f32.gmra.mrb[12].mxu1 %vm1483_vm4, %v1684_v33 }
 0x4a8   : > { %v4420_v45 = vpop.eup %4419  ;;  %v3278_v59 = vsel %vm1483_vm4, %v3251_v20, 0.0  ;;  %3932 = vmatprep.mubr.msk.f32.mxu1 %vm1483_vm4, %v1685_v55 }
 0x4a9   : > { %3279 = vadd.xlane.f32.xlu1 %v3278_v59  ;;  %v1686_v47 = vmul.f32 %v4420_v45, %v5976_v48 }
 0x4ab   : > { %v3255_v44 = vpop.permute.xlu0 %3254  ;;  %3933 = vmatmul.mubr.msk.f32.gmra.mrb[14].mxu1 %vm1483_vm4, %v1686_v47  ;;  %v4389_v47 = vunpack.i.h.bf16 %v5991_v61 }
 0x4ac   : > { %v3284_v52 = vsel %vm1483_vm4, %v3255_v44, 0.0  ;;  %v4388_v44 = vunpack.i.l.bf16 %v5991_v61  ;;  %v4398_v61 = vunpack.i.l.bf16 %v6021_v15 }
 0x4ad   : > { %3285 = vadd.xlane.f32.xlu1 %v3284_v52 }
 0x4cd   : > { %v2192_v46 = vpop.xlane.xlu1 %2191 }
 0x4ce   : > { %v2214_v6 = vadd.f32 1e-15, %v2192_v46 }
 0x4d0   : > { %4421 = vrcp.f32 %v2214_v6  ;;  %v4393_v6 = vunpack.i.l.bf16 %v6008_v17 }
 0x4d4   : > { %v2198_v51 = vpop.xlane.xlu1 %2197 }
 0x4d5   : > { %v2216_v56 = vadd.f32 1e-15, %v2198_v51  ;;  %v4192_v51 = vpack.c.bf16 %v4389_v47, %v4388_v44 }
 0x4d8   : > { %v2204_v50 = vpop.xlane.xlu1 %2203 }
 0x4d9   : > { %v2218_v48 = vadd.f32 1e-15, %v2204_v50  ;;  %v4399_v50 = vunpack.i.h.bf16 %v6021_v15 }
 0x4da   : > { %v4422_v63 = vpop.eup %4421 }
 0x4dc   : > { %v2195_v16 = vpop.xlane.xlu0 %2194  ;;  %v2210_v57 = vpop.xlane.xlu1 %2209 }
 0x4dd   : > { %v2215_v9 = vadd.f32 1e-15, %v2195_v16  ;;  %v2220_v7 = vadd.f32 1e-15, %v2210_v57 }
 0x4df   : > { %4423 = vrcp.f32 %v2215_v9 }
 0x4e0   : > { %v2201_v40 = vpop.xlane.xlu0 %2200  ;;  %4425 = vrcp.f32 %v2216_v56  ;;  %v4200_v56 = vpack.c.bf16 %v4399_v50, %v4398_v61 }
 0x4e1   : > { %v2217_v22 = vadd.f32 1e-15, %v2201_v40  ;;  %v4394_v40 = vunpack.i.h.bf16 %v6008_v17  ;;  %v4403_v17 = vunpack.i.l.bf16 %v6034_v19 }
 0x4e3   : > { %4427 = vrcp.f32 %v2217_v22  ;;  %v4196_v9 = vpack.c.bf16 %v4394_v40, %v4393_v6 }
 0x4e4   : > { %v2207_v58 = vpop.xlane.xlu0 %2206  ;;  %4429 = vrcp.f32 %v2218_v48 }
 0x4e5   : > { %v2219_v36 = vadd.f32 1e-15, %v2207_v58  ;;  %v4404_v58 = vunpack.i.h.bf16 %v6034_v19 }
 0x4e7   : > { %4431 = vrcp.f32 %v2219_v36  ;;  %v4204_v15 = vpack.c.bf16 %v4404_v58, %v4403_v17 }
 0x4e8   : > { %v2213_v3 = vpop.xlane.xlu0 %2212  ;;  %4433 = vrcp.f32 %v2220_v7 }
 0x4e9   : > { %v2221_v41 = vadd.f32 1e-15, %v2213_v3  ;;  %v4424_v28 = vpop.eup %4423 }
 0x4ea   : > { %v4426_v54 = vpop.eup %4425 }
 0x4eb   : > { %4435 = vrcp.f32 %v2221_v41 }
 0x4ed   : > { %v3960_v38 = vpop.f32.mrb[20].mxu0  ;;  %v4428_v12 = vpop.eup %4427 }
 0x4ee   : > { %v2085_v11 = vpop.f32.mrb[21].mxu0  ;;  %v2231_v43 = vmul.f32 %v4424_v28, %v3960_v38  ;;  %v4430_v13 = vpop.eup %4429 }
 0x4ef   : > { %v2230_v27 = vmul.f32 %v4422_v63, %v2085_v11 }
 0x4f1   : > { %v3963_v32 = vpop.f32.mrb[22].mxu0  ;;  %3974 = vmatprep.mubr.msk.f32.mxu1 %vm1483_vm4, %v2230_v27  ;;  %v4432_v21 = vpop.eup %4431 }
 0x4f2   : > { %v2095_v62 = vpop.f32.mrb[23].mxu0  ;;  %3975 = vmatmul.mubr.msk.f32.vlgmr.msra.gmra.mrb[8].mxu1 %vm1483_vm4, %v2231_v43  ;;  %v2233_v49 = vmul.f32 %v4428_v12, %v3963_v32  ;;  %v4434_v33 = vpop.eup %4433 }
 0x4f3   : > { %v2232_v24 = vmul.f32 %v4426_v54, %v2095_v62 }
 0x4f5   : > { %v3966_v25 = vpop.f32.mrb[24].mxu0  ;;  %3977 = vmatprep.mubr.msk.f32.mxu1 %vm1483_vm4, %v2232_v24  ;;  %v4436_v20 = vpop.eup %4435 }
 0x4f6   : > { %v2105_v42 = vpop.f32.mrb[25].mxu0  ;;  %3978 = vmatmul.mubr.msk.f32.gmra.mrb[10].mxu1 %vm1483_vm4, %v2233_v49  ;;  %v2235_v5 = vmul.f32 %v4432_v21, %v3966_v25 }
 0x4f7   : > { %v2234_v34 = vmul.f32 %v4430_v13, %v2105_v42 }
 0x4f9   : > { %v3969_v39 = vpop.f32.mrb[26].mxu0  ;;  %3980 = vmatprep.mubr.msk.f32.mxu1 %vm1483_vm4, %v2234_v34 }
 0x4fa   : > { %v2115_v55 = vpop.f32.mrb[27].mxu0  ;;  %3981 = vmatmul.mubr.msk.f32.gmra.mrb[12].mxu1 %vm1483_vm4, %v2235_v5  ;;  %v2237_v59 = vmul.f32 %v4436_v20, %v3969_v39 }
 0x4fb   : > { %v2236_v45 = vmul.f32 %v4434_v33, %v2115_v55 }
 0x4fd   : > { %3983 = vmatprep.mubr.msk.f32.mxu1 %vm1483_vm4, %v2236_v45  ;;  %v4004_v52 = vpop.f32.mrb[28].mxu0 }
 0x4fe   : > { %3984 = vmatmul.mubr.msk.f32.gmra.mrb[14].mxu1 %vm1483_vm4, %v2237_v59  ;;  %v2553_v46 = vpop.f32.mrb[29].mxu0 }
 0x4ff   : > { %v4184_v16 = vpack.c.bf16 %v4004_v52, %v2553_v46 }
 0x501   : > { %4185 = vmatprep.subr.bf16.mxu0 %v4184_v16 }
 0x502   : > { %4187 = vmatpush3.bf16.msra.mxu0 %v4184_v16 }
 0x503   : > { %4193 = vmatprep.subr.bf16.mxu0 %v4192_v51 }
 0x505   : > { %4010 = vmatmul.mubr.msk.f32.vlgmr.msra.gmra.mrb[30].mxu0 %vm1483_vm4, %v5697_v31  ;;  %v2764_v31 = vld [vmem:[%s6254_s4 + $0x20] sm:$0xff] }
 0x506   : > { %4012 = vmatprep.mubr.msk.f32.mxu0 %vm1483_vm4, %v5709_v37  ;;  %4195 = vmatpush3.bf16.msra.mxu0 %v4192_v51 }
 0x507   : > { %4197 = vmatprep.subr.bf16.mxu0 %v4196_v9 }
 0x509   : > { %4013 = vmatmul.mubr.msk.f32.gmra.mrb[32].mxu0 %vm1483_vm4, %v5705_v35  ;;  %v2765_v35 = vld [vmem:[%s6254_s4 + $0x28] sm:$0xff] }
 0x50a   : > { %4015 = vmatprep.mubr.msk.f32.mxu0 %vm1483_vm4, %v5717_v2  ;;  %4199 = vmatpush3.bf16.msra.mxu0 %v4196_v9  ;;  %v4188_v37 = vpack.c.bf16 %v2765_v35, %v2764_v31  ;;  %v3315_v2 = vld [vmem:[%s6254_s4 + $0x38] sm:$0xff] }
 0x50b   : > { %4201 = vmatprep.subr.bf16.mxu0 %v4200_v56 }
 0x50c   : > { %4189 = vmatprep.subr.bf16.mxu1 %v4188_v37 }
 0x50d   : > { %4016 = vmatmul.mubr.msk.f32.gmra.mrb[34].mxu0 %vm1483_vm4, %v5713_v0  ;;  %4191 = vmatpush3.bf16.msra.mxu1 %v4188_v37  ;;  %v3314_v0 = vld [vmem:[%s6254_s4 + $0x30] sm:$0xff] }
 0x50e   : > { %4018 = vmatprep.mubr.msk.f32.mxu0 %vm1483_vm4, %v5723_v4  ;;  %4203 = vmatpush3.bf16.msra.mxu0 %v4200_v56  ;;  %v2718_v4 = vpop.xlane.xlu1 %2717 }
 0x50f   : > { %4205 = vmatprep.subr.bf16.mxu0 %v4204_v15 }
 0x511   : > { %4019 = vmatmul.mubr.msk.f32.gmra.mrb[36].mxu0 %vm1483_vm4, %v5721_v29  ;;  %v4212_v29 = vpack.c.bf16 %v3315_v2, %v3314_v0 }
 0x512   : > { %4207 = vmatpush3.bf16.msra.mxu0 %v4204_v15  ;;  %4053 = vmatprep.mubr.msk.f32.mxu0 %vm1401_vm3, %v6043_v26  ;;  %v2724_v19 = vpop.xlane.xlu1 %2723 }
 0x513   : > { %4213 = vmatprep.subr.bf16.mxu1 %v4212_v29  ;;  %v2742_v57 = vadd.f32 1e-15, %v2724_v19 }
 0x515   : > { %4054 = vmatmul.mubr.msk.f32.vlgmr.msra.gmra.mrb[38].mxu0 %vm1401_vm3, %v6046_v30  ;;  %v2740_v30 = vadd.f32 1e-15, %v2718_v4 }
 0x516   : > { %4060 = vmatprep.mubr.msk.f32.mxu0 %vm1483_vm4, %v5907_v8  ;;  %v2721_v8 = vpop.xlane.xlu0 %2720  ;;  %v2730_v48 = vpop.xlane.xlu1 %2729 }
 0x517   : > { %v2741_v22 = vadd.f32 1e-15, %v2721_v8  ;;  %4437 = vrcp.f32 %v2740_v30  ;;  %v2744_v7 = vadd.f32 1e-15, %v2730_v48 }
 0x519   : > { %4439 = vrcp.f32 %v2741_v22 }
 0x51a   : > { %v2727_v26 = vpop.xlane.xlu0 %2726  ;;  %4441 = vrcp.f32 %v2742_v57  ;;  %v2736_v41 = vpop.xlane.xlu1 %2735 }
 0x51b   : > { %v2743_v3 = vadd.f32 1e-15, %v2727_v26  ;;  %v2746_v11 = vadd.f32 1e-15, %v2736_v41 }
 0x51d   : > { %4443 = vrcp.f32 %v2743_v3 }
 0x51e   : > { %v2733_v36 = vpop.xlane.xlu0 %2732  ;;  %4445 = vrcp.f32 %v2744_v7 }
 0x51f   : > { %v2745_v38 = vadd.f32 1e-15, %v2733_v36 }
 0x521   : > { %4447 = vrcp.f32 %v2745_v38  ;;  %v4438_v43 = vpop.eup %4437 }
 0x522   : > { %v2739_v63 = vpop.xlane.xlu0 %2738  ;;  %4449 = vrcp.f32 %v2746_v11 }
 0x523   : > { %v2747_v28 = vadd.f32 1e-15, %v2739_v63  ;;  %v4440_v54 = vpop.eup %4439 }
 0x524   : > { %v4442_v49 = vpop.eup %4441 }
 0x525   : > { %4451 = vrcp.f32 %v2747_v28 }
 0x527   : > { %v4444_v13 = vpop.eup %4443 }
 0x528   : > { %v4446_v5 = vpop.eup %4445 }
 0x52b   : > { %v4448_v33 = vpop.eup %4447 }
 0x52c   : > { %v4450_v59 = vpop.eup %4449 }
 0x52e   : > { %v3268_v6 = vpop.xlane.xlu1 %3267 }
 0x52f   : > { %v4452_v44 = vpop.eup %4451 }
 0x532   : > { %v3274_v9 = vpop.xlane.xlu1 %3273 }
 0x533   : > { %v3292_v58 = vadd.f32 1e-15, %v3274_v9 }
 0x536   : > { %v3280_v56 = vpop.xlane.xlu1 %3279 }
 0x5d8   : > { %v4011_v27 = vpop.f32.mrb[30].mxu0 }
 0x5d9   : > { %v2644_v32 = vpop.f32.mrb[31].mxu0  ;;  %v2757_v12 = vmul.f32 %v4440_v54, %v4011_v27 }
 0x5da   : > { %v2756_v62 = vmul.f32 %v4438_v43, %v2644_v32 }
 0x5dc   : > { %v4014_v24 = vpop.f32.mrb[32].mxu0  ;;  %4025 = vmatprep.mubr.msk.f32.mxu1 %vm1483_vm4, %v2756_v62  ;;  %v4469_v62 = vld [vmem:[%s4866_s12 + $0x8] sm:$0xff] }
 0x5dd   : > { %v2654_v25 = vpop.f32.mrb[33].mxu0  ;;  %4026 = vmatmul.mubr.msk.f32.vlgmr.msra.gmra.mrb[8].mxu1 %vm1483_vm4, %v2757_v12  ;;  %v2759_v21 = vmul.f32 %v4444_v13, %v4014_v24 }
 0x5de   : > { %v2758_v42 = vmul.f32 %v4442_v49, %v2654_v25  ;;  %4215 = vmatpush3.bf16.msra.mxu1 %v4212_v29  ;;  %v4470_v49 = vld [vmem:[%s4866_s12] sm:$0xff] }
 0x5e0   : > { %v4017_v34 = vpop.f32.mrb[34].mxu0  ;;  %4028 = vmatprep.mubr.msk.f32.mxu1 %vm1483_vm4, %v2758_v42  ;;  %v4471_v42 = vld [vmem:[%s4866_s12 + $0x18] sm:$0xff] }
 0x5e1   : > { %v2664_v39 = vpop.f32.mrb[35].mxu0  ;;  %4029 = vmatmul.mubr.msk.f32.gmra.mrb[10].mxu1 %vm1483_vm4, %v2759_v21  ;;  %v2761_v20 = vmul.f32 %v4448_v33, %v4017_v34 }
 0x5e2   : > { %v2760_v55 = vmul.f32 %v4446_v5, %v2664_v39  ;;  %v4472_v5 = vld [vmem:[%s4866_s12 + $0x10] sm:$0xff] }
 0x5e4   : > { %v4020_v45 = vpop.f32.mrb[36].mxu0  ;;  %4031 = vmatprep.mubr.msk.f32.mxu1 %vm1483_vm4, %v2760_v55  ;;  %v4473_v55 = vld [vmem:[%s4866_s12 + $0x28] sm:$0xff] }
 0x5e5   : > { %v2674_v47 = vpop.f32.mrb[37].mxu0  ;;  %4032 = vmatmul.mubr.msk.f32.gmra.mrb[12].mxu1 %vm1483_vm4, %v2761_v20  ;;  %v2763_v46 = vmul.f32 %v4452_v44, %v4020_v45 }
 0x5e6   : > { %v2762_v52 = vmul.f32 %v4450_v59, %v2674_v47  ;;  %v4474_v59 = vld [vmem:[%s4866_s12 + $0x20] sm:$0xff] }
 0x5e8   : > { %4034 = vmatprep.mubr.msk.f32.mxu1 %vm1483_vm4, %v2762_v52  ;;  %v4055_v16 = vpop.f32.mrb[38].mxu0  ;;  %v4475_v52 = vld [vmem:[%s4866_s12 + $0x38] sm:$0xff] }
 0x5e9   : > { %4035 = vmatmul.mubr.msk.f32.gmra.mrb[14].mxu1 %vm1483_vm4, %v2763_v46  ;;  %v3055_v51 = vpop.f32.mrb[39].mxu0 }
 0x5ea   : > { %v4208_v40 = vpack.c.bf16 %v4055_v16, %v3055_v51  ;;  %v4476_v51 = vld [vmem:[%s4866_s12 + $0x30] sm:$0xff] }
 0x5ec   : > { %4209 = vmatprep.subr.bf16.mxu0 %v4208_v40 }
 0x5ed   : > { %4211 = vmatpush3.bf16.msra.mxu0 %v4208_v40 }
 0x5f0   : > { %4061 = vmatmul.mubr.msk.f32.vlgmr.msra.gmra.mrb[40].mxu0 %vm1483_vm4, %v5909_v18  ;;  %v3271_v18 = vpop.xlane.xlu0 %3270 }
 0x5f1   : > { %4063 = vmatprep.mubr.msk.f32.mxu0 %vm1483_vm4, %v5915_v10  ;;  %v3290_v10 = vadd.f32 1e-15, %v3268_v6  ;;  %v3291_v61 = vadd.f32 1e-15, %v3271_v18 }
 0x5f3   : > { %4453 = vrcp.f32 %v3290_v10 }
 0x5f4   : > { %4064 = vmatmul.mubr.msk.f32.gmra.mrb[42].mxu0 %vm1483_vm4, %v5917_v23  ;;  %v3277_v50 = vpop.xlane.xlu0 %3276  ;;  %4455 = vrcp.f32 %v3291_v61 }
 0x5f5   : > { %4066 = vmatprep.mubr.msk.f32.mxu0 %vm1483_vm4, %v5921_v1  ;;  %v3293_v1 = vadd.f32 1e-15, %v3277_v50  ;;  %4457 = vrcp.f32 %v3292_v58 }
 0x5f7   : > { %4459 = vrcp.f32 %v3293_v1 }
 0x5f8   : > { %4067 = vmatmul.mubr.msk.f32.gmra.mrb[44].mxu0 %vm1483_vm4, %v5923_v53  ;;  %v3283_v23 = vpop.xlane.xlu0 %3282  ;;  %v3294_v53 = vadd.f32 1e-15, %v3280_v56 }
 0x5f9   : > { %4069 = vmatprep.mubr.msk.f32.mxu0 %vm1483_vm4, %v6048_v60  ;;  %v3295_v17 = vadd.f32 1e-15, %v3283_v23  ;;  %v3286_v60 = vpop.xlane.xlu1 %3285 }
 0x5fa   : > { %4461 = vrcp.f32 %v3294_v53 }
 0x5fb   : > { %4463 = vrcp.f32 %v3295_v17 }
 0x5fc   : > { %4070 = vmatmul.mubr.msk.f32.gmra.mrb[46].mxu0 %vm1483_vm4, %v5925_v14  ;;  %v3289_v15 = vpop.xlane.xlu0 %3288  ;;  %v3296_v14 = vadd.f32 1e-15, %v3286_v60 }
 0x5fd   : > { %v3297_v31 = vadd.f32 1e-15, %v3289_v15  ;;  %v4454_v37 = vpop.eup %4453 }
 0x5fe   : > { %v4456_v2 = vpop.eup %4455  ;;  %4465 = vrcp.f32 %v3296_v14 }
 0x5ff   : > { %4467 = vrcp.f32 %v3297_v31  ;;  %v4458_v19 = vpop.eup %4457 }
 0x601   : > { %v4460_v30 = vpop.eup %4459 }
 0x604   : > { %v4462_v36 = vpop.eup %4461 }
 0x605   : > { %v4464_v7 = vpop.eup %4463 }
 0x608   : > { %v4466_v11 = vpop.eup %4465 }
 0x609   : > { %v4468_v27 = vpop.eup %4467 }
 0x6c3   : > { %v4062_v35 = vpop.f32.mrb[40].mxu0 }
 0x6c4   : > { %v3162_v0 = vpop.f32.mrb[41].mxu0  ;;  %v3307_v4 = vmul.f32 %v4456_v2, %v4062_v35 }
 0x6c5   : > { %v3306_v29 = vmul.f32 %v4454_v37, %v3162_v0 }
 0x6c7   : > { %v4065_v8 = vpop.f32.mrb[42].mxu0  ;;  %4076 = vmatprep.mubr.msk.f32.mxu1 %vm1483_vm4, %v3306_v29 }
 0x6c8   : > { %v3172_v26 = vpop.f32.mrb[43].mxu0  ;;  %4077 = vmatmul.mubr.msk.f32.vlgmr.msra.gmra.mrb[8].mxu1 %vm1483_vm4, %v3307_v4  ;;  %v3309_v48 = vmul.f32 %v4460_v30, %v4065_v8 }
 0x6c9   : > { %v3308_v22 = vmul.f32 %v4458_v19, %v3172_v26 }
 0x6cb   : > { %v4068_v57 = vpop.f32.mrb[44].mxu0  ;;  %4079 = vmatprep.mubr.msk.f32.mxu1 %vm1483_vm4, %v3308_v22 }
 0x6cc   : > { %v3182_v3 = vpop.f32.mrb[45].mxu0  ;;  %4080 = vmatmul.mubr.msk.f32.gmra.mrb[10].mxu1 %vm1483_vm4, %v3309_v48  ;;  %v3311_v38 = vmul.f32 %v4464_v7, %v4068_v57 }
 0x6cd   : > { %v3310_v41 = vmul.f32 %v4462_v36, %v3182_v3 }
 0x6cf   : > { %v4071_v63 = vpop.f32.mrb[46].mxu0  ;;  %4082 = vmatprep.mubr.msk.f32.mxu1 %vm1483_vm4, %v3310_v41 }
 0x6d0   : > { %v3192_v28 = vpop.f32.mrb[47].mxu0  ;;  %4083 = vmatmul.mubr.msk.f32.gmra.mrb[12].mxu1 %vm1483_vm4, %v3311_v38  ;;  %v3313_v32 = vmul.f32 %v4468_v27, %v4071_v63 }
 0x6d1   : > { %v3312_v43 = vmul.f32 %v4466_v11, %v3192_v28 }
 0x6d3   : > { %4085 = vmatprep.mubr.msk.f32.mxu1 %vm1483_vm4, %v3312_v43 }
 0x6d4   : > { %4086 = vmatmul.mubr.msk.f32.gmra.mrb[14].mxu1 %vm1483_vm4, %v3313_v32 }
 0x79b   : > { %v4078_v54 = vpop.f32.mrb[8].mxu1 }
 0x79c   : > { %v4216_v12 = vadd.f32 %v4469_v62, %v4078_v54  ;;  %v3406_v24 = vpop.f32.mrb[9].mxu1 }
 0x79d   : > { %v4217_v25 = vadd.f32 %v4470_v49, %v3406_v24 }
 0x79e   : > { %3454 = vst.msk [vmem:[%s271_s13 + $0x8] sm:$0xff] %vm284_vm0, %v4216_v12 }
 0x79f   : > { %3453 = vst.msk [vmem:[%s271_s13] sm:$0xff] %vm284_vm0, %v4217_v25  ;;  %v4081_v13 = vpop.f32.mrb[10].mxu1 }
 0x7a0   : > { %v4218_v21 = vadd.f32 %v4471_v42, %v4081_v13  ;;  %v3416_v34 = vpop.f32.mrb[11].mxu1 }
 0x7a1   : > { %v4219_v39 = vadd.f32 %v4472_v5, %v3416_v34 }
 0x7a2   : > { %3456 = vst.msk [vmem:[%s271_s13 + $0x18] sm:$0xff] %vm284_vm0, %v4218_v21 }
 0x7a3   : > { %3455 = vst.msk [vmem:[%s271_s13 + $0x10] sm:$0xff] %vm284_vm0, %v4219_v39  ;;  %v4084_v33 = vpop.f32.mrb[12].mxu1 }
 0x7a4   : > { %v4220_v20 = vadd.f32 %v4473_v55, %v4084_v33  ;;  %v3426_v45 = vpop.f32.mrb[13].mxu1 }
 0x7a5   : > { %v4221_v47 = vadd.f32 %v4474_v59, %v3426_v45 }
 0x7a6   : > { %3458 = vst.msk [vmem:[%s271_s13 + $0x28] sm:$0xff] %vm284_vm0, %v4220_v20 }
 0x7a7   : > { %3457 = vst.msk [vmem:[%s271_s13 + $0x20] sm:$0xff] %vm284_vm0, %v4221_v47  ;;  %v4087_v44 = vpop.f32.mrb[14].mxu1 }
 0x7a8   : > { %v4222_v46 = vadd.f32 %v4475_v52, %v4087_v44  ;;  %v3436_v16 = vpop.f32.mrb[15].mxu1 }
 0x7a9   : > { %v4223_v40 = vadd.f32 %v4476_v51, %v3436_v16 }
 0x7aa   : > { %3460 = vst.msk [vmem:[%s271_s13 + $0x38] sm:$0xff] %vm284_vm0, %v4222_v46 }
 0x7ab   : > { %3459 = vst.msk [vmem:[%s271_s13 + $0x30] sm:$0xff] %vm284_vm0, %v4223_v40 }
 0x7ac   : > { %4576 = shalt.err (!%p4573_p1)
}
 0x7ad   : > { %s4577_s12 = scalar_lea.hbm %s6201_s17, 1024  ;;  %s4581_s10 = scalar_lea.hbm %s6255_s5, 2048 }
 0x7ae   : > { %p4578_p13 = scmp.ne.s32.totalorder %s6201_s17, %s4577_s12  ;;  %p4582_p4 = scmp.lt.u32.totalorder %s6201_s17, %s6255_s5 }
 0x7af   : > { %p4583_p5 = scmp.lt.u32.totalorder %s4581_s10, %s4577_s12  ;;  %p4585_p11 = scmp.lt.u32.totalorder %s4577_s12, %s6201_s17 }
 0x7b0   : > { %p4579_p6 = pnand %p4578_p13, %p6457_p0 }
 0x7b1   : > { %p4584_p8 = por %p4583_p5, %p4582_p4 }
 0x7b2   : > { %p4580_p10 = pneg %p4579_p6 }
 0x7b3   : > { %p4586_p2 = por %p4585_p11, %p4584_p8 }
 0x7b5   : > { %p4587_p3 = pnand %p4586_p2, %p4580_p10 }
 0x7b7   : > { %4590 = shalt.err (!%p4587_p3)
}
 0x7b8   : > { %s4647_s6 = smov 128   ;;  %s4648_s30 = smov 8  }
 0x7b9   : > { %4258 = dma.vmem_to_hbm [thread:$0]  (%p6457_p0), %s6203_s9, 1024, %s6201_s17, %s3462_s22, %s4647_s6, %s4647_s6, %s4648_s30  }
 0x7ba PF: > { %s3490_s11 = sand.u32 1, %s4621_s18   ;;  %p6458_p7 = scmp.ne.s32.totalorder %s6329_s25, 0 }
 0x7bb   : > { %p6459_p9 = scmp.ge.s32.totalorder %s4633_s21, 2  ;;  %s3491_s7 = scalar_lea.sflag [#allocation5], %s3490_s11 }
 0x7bd   : > { %p4272_p12 = pnand %p6459_p9, %p6458_p7 }
 0x7bf   : > { %4616 = dma.done.wait (!%p4272_p12), %s3491_s7, 1024  }
 0x7c0   : > { %4618 = vsyncadd (!%p4272_p12), %s3491_s7, 4294966272  ;;  %p19_p1 = scmp.ge.s32.totalorder %s4795_s29, 4   ;;  %s6460_s18 = smov %s4625_s19 }
 0x7c1   : > { %s6461_s19 = smov %s4629_s20  ;;  %s6462_s20 = smov %s4811_s27 }
 0x7c2   : > { %s6463_s21 = smov %s4795_s29  ;;  %21 = sbr.rel (!%p19_p1) target bundleno = 6 (0x6), region = 97 }
 0x7c9   :  { %3496 = vsyncpa [#allocation4], 1 }
 0x7ca   :  { %3498 = vsyncpa [#allocation4 + $0x1], 1 }
 0x7cb   :  { %3499 = vsyncpa [#allocation7], 1 }
 0x7cc   :  { %3500 = vsyncpa [#allocation5], 1 }
 0x7cd   :  { %3502 = vsyncpa [#allocation5 + $0x1], 1 }

</bundles_post_ra>
